<compile_context>
chip_gen: v5e
topology: v5e:2x2
jax: 0.10.0
libtpu: 0.0.40
codegen_flags: <defaults>
</compile_context>

<pallas_src>
import functools

import numpy as np
import jax
import jax.numpy as jnp
from jax.experimental import pallas as pl
from jax.experimental.pallas import tpu as pltpu

# ----------------------- small synthetic configuration -----------------------
B = 2                      # batch
IMG_C, IMG_H, IMG_W = 3, 16, 16
PATCH = 8                  # -> 2x2 = 4 patches, 5 vision tokens
WIDTH_V = 128              # vision transformer width (lane-dense)
HEADS_V = 2                # head_dim = 64
LAYERS_V = 1
EMBED_DIM = 128            # joint embedding dim
CTX_DIM = 128              # text transformer width
HEADS_T = 2
LAYERS_T = 1
CONTEXT_LEN = 16           # tokenized prompt length
VOCAB = 64
N_CLS = 3                  # number of class names
NUM_PROMPT = 4             # args.num_prompt (prompt pool size)
K_PROMPT = 2               # args.text_prompt (top-k prompts chosen per image)
N_CTX = 4                  # n_ctx (context tokens per prompt)

S_V = (IMG_H // PATCH) * (IMG_W // PATCH) + 1
LN_EPS = 1e-5
L2_EPS = 1e-12


# ---------------------------- in-kernel helpers -------------------------------
def _ln(x, w, b):
    mean = jnp.mean(x, axis=-1, keepdims=True)
    var = jnp.mean(jnp.square(x - mean), axis=-1, keepdims=True)
    return (x - mean) * jax.lax.rsqrt(var + LN_EPS) * w + b


def _l2n(x):
    ss = jnp.sum(x * x, axis=-1, keepdims=True)
    return x * jax.lax.rsqrt(jnp.maximum(ss, L2_EPS))


def _res_block(x, l, ln1w, ln1b, wqkv, bqkv, wout, bout,
               ln2w, ln2b, wfc, bfc, wproj, bproj, *, n_heads, neg):
    """One CLIP ResidualAttentionBlock on a (S, D) f32 value.

    Weight args are Refs with a leading layer dim; bf16 matmul inputs with f32
    accumulation; q-scale already folded into W_qkv's q columns.  No concat:
    per-head outputs are folded through row-blocks of W_out and accumulated.
    """
    S, D = x.shape
    dh = D // n_heads

    h = _ln(x, ln1w[l], ln1b[l])
    qkv = jnp.dot(h.astype(jnp.bfloat16), wqkv[l],
                  preferred_element_type=jnp.float32) + bqkv[l]        # (S, 3D)
    wo = wout[l]                                                        # (D, D) bf16

    attn = jnp.zeros((S, D), jnp.float32)
    for hh in range(n_heads):                                           # static unroll
        q = qkv[:, hh * dh:(hh + 1) * dh]
        k = qkv[:, D + hh * dh:D + (hh + 1) * dh]
        v = qkv[:, 2 * D + hh * dh:2 * D + (hh + 1) * dh]
        s = jax.lax.dot_general(q.astype(jnp.bfloat16), k.astype(jnp.bfloat16),
                                (((1,), (1,)), ((), ())),
                                preferred_element_type=jnp.float32)     # (S, S)
        if neg is not None:
            s = s + neg
        s = s - jnp.max(s, axis=-1, keepdims=True)
        p = jnp.exp(s)
        p = p * pl.reciprocal(jnp.sum(p, axis=-1, keepdims=True), approx=True)
        o = jnp.dot(p.astype(jnp.bfloat16), v.astype(jnp.bfloat16),
                    preferred_element_type=jnp.float32)                 # (S, dh)
        attn = attn + jnp.dot(o.astype(jnp.bfloat16),
                              wo[hh * dh:(hh + 1) * dh, :],
                              preferred_element_type=jnp.float32)       # (S, D)
    x = x + attn + bout[l]

    h2 = _ln(x, ln2w[l], ln2b[l])
    m = jnp.dot(h2.astype(jnp.bfloat16), wfc[l],
                preferred_element_type=jnp.float32) + bfc[l]
    m = m * jax.nn.sigmoid(1.702 * m)                                   # QuickGELU
    m = jnp.dot(m.astype(jnp.bfloat16), wproj[l],
                preferred_element_type=jnp.float32) + bproj[l]
    return x + m


# ------------------------------ Pallas kernels -------------------------------
def _vision_tower_kernel(patch_ref, convw_ref, stem_ref, lnprew_ref, lnpreb_ref,
                         ln1w, ln1b, wqkv, bqkv, wout, bout,
                         ln2w, ln2b, wfc, bfc, wproj, bproj,
                         lnpostw_ref, lnpostb_ref, visproj_ref, key_ref,
                         feat_ref, prob_ref, *, n_heads, n_layers):
    # Stem: patch embedding matmul (row 0 of patches is zero -> cls slot), then
    # fused (pos + class_emb) add and ln_pre.  class_emb was folded into
    # stem_ref row 0 at init.
    pat = patch_ref[0].astype(jnp.bfloat16)                             # (S, Cpp)
    x = jnp.dot(pat, convw_ref[...],
                preferred_element_type=jnp.float32) + stem_ref[...]     # (S, W)
    x = _ln(x, lnprew_ref[...], lnpreb_ref[...])

    for l in range(n_layers):
        x = _res_block(x, l, ln1w, ln1b, wqkv, bqkv, wout, bout,
                       ln2w, ln2b, wfc, bfc, wproj, bproj,
                       n_heads=n_heads, neg=None)

    # ln_post -> vis proj -> L2 normalize on the cls token, fused.
    f = _ln(x[0:1, :], lnpostw_ref[...], lnpostb_ref[...])
    f = jnp.dot(f.astype(jnp.bfloat16), visproj_ref[...],
                preferred_element_type=jnp.float32)                     # (1, E)
    f = _l2n(f)
    feat_ref[0] = f

    # Key probability fused into the same call (image_feat @ l2n(key)^T).
    kn = _l2n(key_ref[...])                                             # (P, E)
    prob_ref[0] = jax.lax.dot_general(f, kn, (((1,), (1,)), ((), ())),
                                      preferred_element_type=jnp.float32)


def _text_tower_kernel(eot_ref, x_ref, post_ref,
                       ln1w, ln1b, wqkv, bqkv, wout, bout,
                       ln2w, ln2b, wfc, bfc, wproj, bproj,
                       lnfw_ref, lnfb_ref, tproj_ref,
                       feat_ref, *, n_heads, n_layers):
    x = x_ref[0] + post_ref[...]                                        # (S, D) f32
    S = x.shape[0]

    # causal mask built once from iota (no (S,S) HBM mask DMA), hoisted out of
    # the layer loop.
    rows = jax.lax.broadcasted_iota(jnp.int32, (S, S), 0)
    cols = jax.lax.broadcasted_iota(jnp.int32, (S, S), 1)
    neg = jnp.where(cols > rows, jnp.float32(-1e9), jnp.float32(0.0))

    for l in range(n_layers):
        x = _res_block(x, l, ln1w, ln1b, wqkv, bqkv, wout, bout,
                       ln2w, ln2b, wfc, bfc, wproj, bproj,
                       n_heads=n_heads, neg=neg)

    # EOT-row gather via one-hot matmul (MXU-friendly, no dynamic slice),
    # then fused ln_final -> text_projection -> L2 normalize.
    eot = eot_ref[pl.program_id(0)]
    sel = (jax.lax.broadcasted_iota(jnp.int32, (1, S), 1) == eot).astype(jnp.float32)
    row = jnp.dot(sel, x, preferred_element_type=jnp.float32)           # (1, D)
    f = _ln(row, lnfw_ref[...], lnfb_ref[...])
    f = jnp.dot(f.astype(jnp.bfloat16), tproj_ref[...],
                preferred_element_type=jnp.float32)                     # (1, E)
    feat_ref[0] = _l2n(f)


def _tail_kernel(scale_ref, img_ref, txt_ref, nc_ref, logits_ref, loss_ref):
    # Per-class logits: one MXU matmul img @ txt^T, then pick the per-image
    # class block (avoids the (B, C, E) broadcast + XLU lane reduce).
    scale = scale_ref[0]
    img = img_ref[...]                                                  # (B, E)
    txt = txt_ref[...]                                                  # (B*C, E)
    full = jax.lax.dot_general(img, txt, (((1,), (1,)), ((), ())),
                               preferred_element_type=jnp.float32)      # (B, B*C)
    Bb = img.shape[0]
    C = logits_ref.shape[1]
    for b in range(Bb):                                                 # static
        logits_ref[b:b + 1, :] = full[b:b + 1, b * C:(b + 1) * C] * scale

    # Prompt-pool orthogonality (Gram) loss, fused into the same call.
    nc = nc_ref[...]                                                    # (P, E), L2-normalized
    g = jax.lax.dot_general(nc, nc, (((1,), (1,)), ((), ())),
                            preferred_element_type=jnp.float32)         # (P, P)
    P = nc.shape[0]
    r = jax.lax.broadcasted_iota(jnp.int32, (P, P), 0)
    c = jax.lax.broadcasted_iota(jnp.int32, (P, P), 1)
    off = jnp.where(r == c, jnp.float32(0.0), jnp.abs(g))
    s = jnp.sum(off, axis=1, keepdims=True)
    loss_ref[...] = jnp.sum(s, axis=0, keepdims=True) * (1.0 / float(P * (P - 1)))


# ------------------------------ pallas wrappers -------------------------------
def vision_tower(params, patches):
    Bb, S, Cpp = patches.shape
    W, E, P, L = WIDTH_V, EMBED_DIM, NUM_PROMPT, LAYERS_V
    H3, H4 = 3 * W, 4 * W
    vb = params["vis_blocks"]

    def c(shape):
        z = (0,) * len(shape)
        return pl.BlockSpec(shape, lambda b, _z=z: _z)

    kernel = functools.partial(_vision_tower_kernel, n_heads=HEADS_V, n_layers=L)
    feat, prob = pl.pallas_call(
        kernel,
        grid=(Bb,),
        in_specs=[
            pl.BlockSpec((1, S, Cpp), lambda b: (b, 0, 0)),   # patches (row 0 = zeros)
            c((Cpp, W)),                                       # conv1 weight (in, out) bf16
            c((S, W)),                                         # pos + folded class emb
            c((1, W)), c((1, W)),                              # ln_pre
            c((L, 1, W)), c((L, 1, W)),                        # ln1
            c((L, W, H3)), c((L, 1, H3)),                      # qkv (q-scale folded)
            c((L, W, W)), c((L, 1, W)),                        # attn out proj
            c((L, 1, W)), c((L, 1, W)),                        # ln2
            c((L, W, H4)), c((L, 1, H4)),                      # mlp fc
            c((L, H4, W)), c((L, 1, W)),                       # mlp proj
            c((1, W)), c((1, W)),                              # ln_post
            c((W, E)),                                         # visual projection
            c((P, E)),                                         # text_key
        ],
        out_specs=[pl.BlockSpec((1, 1, E), lambda b: (b, 0, 0)),
                   pl.BlockSpec((1, 1, P), lambda b: (b, 0, 0))],
        out_shape=(jax.ShapeDtypeStruct((Bb, 1, E), jnp.float32),
                   jax.ShapeDtypeStruct((Bb, 1, P), jnp.float32)),
        compiler_params=pltpu.CompilerParams(dimension_semantics=("parallel",)),
    )(patches, params["conv1_w2d"], params["stem_pos_v"],
      params["ln_pre_w"], params["ln_pre_b"],
      vb["ln1_w"], vb["ln1_b"], vb["attn_in_w"], vb["attn_in_b"],
      vb["attn_out_w"], vb["attn_out_b"],
      vb["ln2_w"], vb["ln2_b"], vb["fc_w"], vb["fc_b"],
      vb["proj_w"], vb["proj_b"],
      params["ln_post_w"], params["ln_post_b"], params["vis_proj"],
      params["text_key"])
    return feat, prob


def text_tower(params, prompts, eot):
    N, S, D = prompts.shape
    E, L = EMBED_DIM, LAYERS_T
    H3, H4 = 3 * D, 4 * D
    tb = params["text_blocks"]

    def c(shape):
        z = (0,) * len(shape)
        return pl.BlockSpec(shape, lambda n, _s, _z=z: _z)

    kernel = functools.partial(_text_tower_kernel, n_heads=HEADS_T, n_layers=L)
    gs = pltpu.PrefetchScalarGridSpec(
        num_scalar_prefetch=1,                                  # EOT indices in SMEM
        grid=(N,),
        in_specs=[
            pl.BlockSpec((1, S, D), lambda n, _s: (n, 0, 0)),   # prompt embeddings
            c((S, D)),                                          # positional embedding
            c((L, 1, D)), c((L, 1, D)),
            c((L, D, H3)), c((L, 1, H3)),
            c((L, D, D)), c((L, 1, D)),
            c((L, 1, D)), c((L, 1, D)),
            c((L, D, H4)), c((L, 1, H4)),
            c((L, H4, D)), c((L, 1, D)),
            c((1, D)), c((1, D)),                               # ln_final
            c((D, E)),                                          # text_projection
        ],
        out_specs=pl.BlockSpec((1, 1, E), lambda n, _s: (n, 0, 0)),
    )
    return pl.pallas_call(
        kernel,
        grid_spec=gs,
        out_shape=jax.ShapeDtypeStruct((N, 1, E), jnp.float32),
        compiler_params=pltpu.CompilerParams(dimension_semantics=("parallel",)),
    )(eot, prompts, params["pos_emb_t"],
      tb["ln1_w"], tb["ln1_b"], tb["attn_in_w"], tb["attn_in_b"],
      tb["attn_out_w"], tb["attn_out_b"],
      tb["ln2_w"], tb["ln2_b"], tb["fc_w"], tb["fc_b"],
      tb["proj_w"], tb["proj_b"],
      params["ln_final_w"], params["ln_final_b"], params["text_projection"])


def tail(scale_exp, img_feat, txt_feat, nc_feat):
    Bb, E = img_feat.shape
    BC = txt_feat.shape[0]
    P = nc_feat.shape[0]
    C = BC // Bb
    return pl.pallas_call(
        _tail_kernel,
        grid=(1,),
        in_specs=[pl.BlockSpec(memory_space=pltpu.MemorySpace.SMEM),   # logit scale
                  pl.BlockSpec((Bb, E), lambda i: (0, 0)),
                  pl.BlockSpec((BC, E), lambda i: (0, 0)),
                  pl.BlockSpec((P, E), lambda i: (0, 0))],
        out_specs=[pl.BlockSpec((Bb, C), lambda i: (0, 0)),
                   pl.BlockSpec((1, 1), lambda i: (0, 0))],
        out_shape=(jax.ShapeDtypeStruct((Bb, C), jnp.float32),
                   jax.ShapeDtypeStruct((1, 1), jnp.float32)),
    )(scale_exp, img_feat, txt_feat, nc_feat)


# ------------------------------- CLIP.forward ---------------------------------
def clip_forward(params, image):
    Bb = image.shape[0]
    # im2patch (glue): NCHW -> (B, n_patch, C*ph*pw), plus a zero row 0 that the
    # kernel turns into the class-token slot.
    gh, gw = IMG_H // PATCH, IMG_W // PATCH
    patches = image.reshape(Bb, IMG_C, gh, PATCH, gw, PATCH)
    patches = patches.transpose(0, 2, 4, 1, 3, 5).reshape(Bb, gh * gw,
                                                          IMG_C * PATCH * PATCH)
    patches = jnp.concatenate(
        [jnp.zeros((Bb, 1, patches.shape[-1]), patches.dtype), patches], axis=1)

    # == image encoder + key probability (one pallas_call) ==
    img_feat3, prob3 = vision_tower(params, patches)          # (B,1,E), (B,1,P)
    img_feat = img_feat3[:, 0, :]
    probability = prob3[:, 0, :]
    _, indices = jax.lax.top_k(probability, K_PROMPT)          # (B, K)
    key_choose = params["text_key"][indices]                   # (B, K, E), unnormalized

    # == PromptLearner.forward (prompt_pos == 2) ==
    ctx = params["text_prompt"][indices].reshape(Bb, N_CTX * K_PROMPT, CTX_DIM)
    prefix = params["token_prefix"]                            # (n_cls, 1, D)
    suffix = params["token_suffix"]                            # (n_cls, suf, D)
    prompts = jnp.concatenate([
        jnp.broadcast_to(prefix[None], (Bb,) + prefix.shape),
        jnp.broadcast_to(ctx[:, None], (Bb, N_CLS, N_CTX * K_PROMPT, CTX_DIM)),
        jnp.broadcast_to(suffix[None], (Bb,) + suffix.shape),
    ], axis=2).reshape(Bb * N_CLS, CONTEXT_LEN, CTX_DIM)

    # == PromptLearner.only_prefix ==
    nc_prompts = jnp.concatenate([
        jnp.broadcast_to(params["nc_token_prefix"], (NUM_PROMPT, 1, CTX_DIM)),
        params["text_prompt"],
        jnp.broadcast_to(params["nc_token_suffix"],
                         (NUM_PROMPT,) + params["nc_token_suffix"].shape[1:]),
    ], axis=1)                                                  # (P, S, D)

    # EOT indices (argmax over token ids; EOT is the largest id) for both sets.
    eot_cls = jnp.argmax(params["tokenized_prompts"], axis=-1).astype(jnp.int32)
    eot_cls = jnp.broadcast_to(eot_cls[None], (Bb, N_CLS)).reshape(Bb * N_CLS)
    eot_nc = jnp.broadcast_to(
        jnp.argmax(params["nc_tokenized_prompts"], axis=-1).astype(jnp.int32),
        (NUM_PROMPT,))

    # == text encoder: class prompts and prompt-pool prompts in ONE pallas_call ==
    all_prompts = jnp.concatenate([prompts, nc_prompts], axis=0)
    all_eot = jnp.concatenate([eot_cls, eot_nc], axis=0)
    feats = text_tower(params, all_prompts, all_eot)[:, 0, :]   # (B*C + P, E)
    txt_feat = feats[:Bb * N_CLS]                               # (B*C, E) normalized
    nc_feat = feats[Bb * N_CLS:]                                # (P, E) normalized

    # == logits + orthogonality loss (one pallas_call) ==
    scale_exp = jnp.exp(params["logit_scale"]).reshape(1)
    logits, loss = tail(scale_exp, img_feat, txt_feat, nc_feat)

    return logits, img_feat3, key_choose, loss[0, 0]


# --------------------------- deterministic parameters --------------------------
def _normal(key, shape, scale=0.02):
    return scale * jax.random.normal(key, shape, dtype=jnp.float32)


def init_block(key, d, n_heads):
    ks = jax.random.split(key, 4)
    dh = d // n_heads
    scale = dh ** -0.5
    # Weights stored pre-transposed (in, out) and bf16; the 1/sqrt(dh) q-scale
    # is folded into the q columns of W_qkv (and the q bias) at init.
    attn_in_w = _normal(ks[0], (d, 3 * d))
    attn_in_w = attn_in_w.at[:, :d].multiply(scale)
    attn_in_b = jnp.zeros((1, 3 * d), jnp.float32)
    return dict(
        ln1_w=jnp.ones((1, d), jnp.float32), ln1_b=jnp.zeros((1, d), jnp.float32),
        attn_in_w=attn_in_w.astype(jnp.bfloat16), attn_in_b=attn_in_b,
        attn_out_w=_normal(ks[1], (d, d)).astype(jnp.bfloat16),
        attn_out_b=jnp.zeros((1, d), jnp.float32),
        ln2_w=jnp.ones((1, d), jnp.float32), ln2_b=jnp.zeros((1, d), jnp.float32),
        fc_w=_normal(ks[2], (d, 4 * d)).astype(jnp.bfloat16),
        fc_b=jnp.zeros((1, 4 * d), jnp.float32),
        proj_w=_normal(ks[3], (4 * d, d)).astype(jnp.bfloat16),
        proj_b=jnp.zeros((1, d), jnp.float32),
    )


def stack_blocks(blocks):
    return {k: jnp.stack([b[k] for b in blocks], axis=0) for k in blocks[0]}


def make_params(seed=0):
    key = jax.random.PRNGKey(seed)
    ks = list(jax.random.split(key, 20))

    # TODO(synk): CLIP's BPE tokenizer has no Pallas/JAX equivalent — tokenized
    # prompts are synthesized deterministically with EOT = VOCAB-1 (largest id),
    # preserving the argmax(-1)-selects-EOT semantics.
    rng = np.random.RandomState(0)
    name_lens = [1, 2, 1]
    tokenized = np.zeros((N_CLS, CONTEXT_LEN), np.int32)
    for i in range(N_CLS):
        eot = 1 + N_CTX * K_PROMPT + name_lens[i] + 1
        tokenized[i, 0] = 1
        tokenized[i, 1:eot] = rng.randint(2, VOCAB - 2, size=eot - 1)
        tokenized[i, eot] = VOCAB - 1
    nc_tokenized = np.zeros((1, CONTEXT_LEN), np.int32)
    nc_eot = 1 + N_CTX + 1
    nc_tokenized[0, 0] = 1
    nc_tokenized[0, 1:nc_eot] = rng.randint(2, VOCAB - 2, size=nc_eot - 1)
    nc_tokenized[0, nc_eot] = VOCAB - 1
    # EOT must be the max token id for argmax-based row selection.
    assert int(tokenized.max(axis=-1).min()) == VOCAB - 1
    assert int(nc_tokenized.max()) == VOCAB - 1

    token_embedding = _normal(ks[0], (VOCAB, CTX_DIM))
    emb = token_embedding[jnp.asarray(tokenized)]               # (n_cls, S, D)
    nc_emb = token_embedding[jnp.asarray(nc_tokenized)]         # (1, S, D)

    # conv1 weight flattened + transposed once at init (im2patch @ W layout).
    conv1_w = _normal(ks[1], (WIDTH_V, IMG_C, PATCH, PATCH))
    conv1_w2d = conv1_w.reshape(WIDTH_V, IMG_C * PATCH * PATCH).T.astype(jnp.bfloat16)

    class_emb = _normal(ks[2], (1, WIDTH_V))
    pos_emb_v = _normal(ks[3], (S_V, WIDTH_V))
    # Fold class_embedding into row 0 of the positional embedding (parameter
    # preprocessing: x = [cls; patches] + pos  ==  conv_out_with_zero_row0 + stem).
    stem_pos_v = pos_emb_v.at[0, :].add(class_emb[0])

    params = dict(
        # vision tower (clip_model.visual)
        conv1_w2d=conv1_w2d,
        stem_pos_v=stem_pos_v,
        ln_pre_w=jnp.ones((1, WIDTH_V), jnp.float32),
        ln_pre_b=jnp.zeros((1, WIDTH_V), jnp.float32),
        vis_blocks=stack_blocks([init_block(ks[4 + i], WIDTH_V, HEADS_V)
                                 for i in range(LAYERS_V)]),
        ln_post_w=jnp.ones((1, WIDTH_V), jnp.float32),
        ln_post_b=jnp.zeros((1, WIDTH_V), jnp.float32),
        vis_proj=_normal(ks[8], (WIDTH_V, EMBED_DIM)).astype(jnp.bfloat16),
        # text tower
        pos_emb_t=_normal(ks[9], (CONTEXT_LEN, CTX_DIM)),
        text_blocks=stack_blocks([init_block(ks[10 + i], CTX_DIM, HEADS_T)
                                  for i in range(LAYERS_T)]),
        ln_final_w=jnp.ones((1, CTX_DIM), jnp.float32),
        ln_final_b=jnp.zeros((1, CTX_DIM), jnp.float32),
        text_projection=_normal(ks[14], (CTX_DIM, EMBED_DIM)).astype(jnp.bfloat16),
        logit_scale=jnp.asarray(np.log(1.0 / 0.07), jnp.float32),
        # CLIP-module learnables
        text_key=_normal(ks[15], (NUM_PROMPT, EMBED_DIM)),
        text_prompt=_normal(ks[16], (NUM_PROMPT, N_CTX, CTX_DIM)),
        # PromptLearner buffers (prompt_pos == 2)
        tokenized_prompts=jnp.asarray(tokenized, jnp.int32),
        token_prefix=emb[:, :1, :],
        token_suffix=emb[:, 1 + N_CTX * K_PROMPT:, :],
        nc_tokenized_prompts=jnp.asarray(nc_tokenized, jnp.int32),
        nc_token_prefix=nc_emb[:, :1, :],
        nc_token_suffix=nc_emb[:, 1 + N_CTX:, :],
    )
    return params


# ------------------------------------ main ------------------------------------
if __name__ == "__main__":
    params = make_params(0)
    image = jax.random.normal(jax.random.PRNGKey(0),
                              (B, IMG_C, IMG_H, IMG_W), dtype=jnp.float32)

    fwd = jax.jit(clip_forward)
    logits, image_features, key_choose, loss_m = fwd(params, image)
    jax.block_until_ready((logits, image_features, key_choose, loss_m))

    assert logits.shape == (B, N_CLS)
    assert image_features.shape == (B, 1, EMBED_DIM)
    assert key_choose.shape == (B, K_PROMPT, EMBED_DIM)
    assert loss_m.shape == ()
    assert bool(jnp.all(jnp.isfinite(logits)))
    assert bool(jnp.all(jnp.isfinite(image_features)))
    assert bool(jnp.isfinite(loss_m))
    print("KERNEL_OK")
</pallas_src>

<mosaic_0001>
module attributes {stable_mosaic.version = 11 : i64} {
  func.func @_vision_tower_kernel(%arg0: i32, %arg1: memref<1x5x192xf32, #tpu.memory_space<vmem>>, %arg2: memref<192x128xbf16, #tpu.memory_space<vmem>>, %arg3: memref<5x128xf32, #tpu.memory_space<vmem>>, %arg4: memref<1x128xf32, #tpu.memory_space<vmem>>, %arg5: memref<1x128xf32, #tpu.memory_space<vmem>>, %arg6: memref<1x1x128xf32, #tpu.memory_space<vmem>>, %arg7: memref<1x1x128xf32, #tpu.memory_space<vmem>>, %arg8: memref<1x128x384xbf16, #tpu.memory_space<vmem>>, %arg9: memref<1x1x384xf32, #tpu.memory_space<vmem>>, %arg10: memref<1x128x128xbf16, #tpu.memory_space<vmem>>, %arg11: memref<1x1x128xf32, #tpu.memory_space<vmem>>, %arg12: memref<1x1x128xf32, #tpu.memory_space<vmem>>, %arg13: memref<1x1x128xf32, #tpu.memory_space<vmem>>, %arg14: memref<1x128x512xbf16, #tpu.memory_space<vmem>>, %arg15: memref<1x1x512xf32, #tpu.memory_space<vmem>>, %arg16: memref<1x512x128xbf16, #tpu.memory_space<vmem>>, %arg17: memref<1x1x128xf32, #tpu.memory_space<vmem>>, %arg18: memref<1x128xf32, #tpu.memory_space<vmem>>, %arg19: memref<1x128xf32, #tpu.memory_space<vmem>>, %arg20: memref<128x128xbf16, #tpu.memory_space<vmem>>, %arg21: memref<4x128xf32, #tpu.memory_space<vmem>>, %arg22: memref<1x1x128xf32, #tpu.memory_space<vmem>>, %arg23: memref<1x1x4xf32, #tpu.memory_space<vmem>>) attributes {dimension_semantics = [#tpu.dimension_semantics<parallel>], iteration_bounds = array<i64: 2>, scalar_prefetch = 0 : i64, scratch_operands = 0 : i64, tpu.core_type = #tpu.core_type<tc>, window_params = [{transform_indices = @transform_0, window_bounds = array<i64: 1, 5, 192>}, {pipeline_mode = #tpu.pipeline_mode<synchronous>, transform_indices = @transform_1, window_bounds = array<i64: 192, 128>}, {pipeline_mode = #tpu.pipeline_mode<synchronous>, transform_indices = @transform_2, window_bounds = array<i64: 5, 128>}, {pipeline_mode = #tpu.pipeline_mode<synchronous>, transform_indices = @transform_3, window_bounds = array<i64: 1, 128>}, {pipeline_mode = #tpu.pipeline_mode<synchronous>, transform_indices = @transform_4, window_bounds = array<i64: 1, 128>}, {pipeline_mode = #tpu.pipeline_mode<synchronous>, transform_indices = @transform_5, window_bounds = array<i64: 1, 1, 128>}, {pipeline_mode = #tpu.pipeline_mode<synchronous>, transform_indices = @transform_6, window_bounds = array<i64: 1, 1, 128>}, {pipeline_mode = #tpu.pipeline_mode<synchronous>, transform_indices = @transform_7, window_bounds = array<i64: 1, 128, 384>}, {pipeline_mode = #tpu.pipeline_mode<synchronous>, transform_indices = @transform_8, window_bounds = array<i64: 1, 1, 384>}, {pipeline_mode = #tpu.pipeline_mode<synchronous>, transform_indices = @transform_9, window_bounds = array<i64: 1, 128, 128>}, {pipeline_mode = #tpu.pipeline_mode<synchronous>, transform_indices = @transform_10, window_bounds = array<i64: 1, 1, 128>}, {pipeline_mode = #tpu.pipeline_mode<synchronous>, transform_indices = @transform_11, window_bounds = array<i64: 1, 1, 128>}, {pipeline_mode = #tpu.pipeline_mode<synchronous>, transform_indices = @transform_12, window_bounds = array<i64: 1, 1, 128>}, {pipeline_mode = #tpu.pipeline_mode<synchronous>, transform_indices = @transform_13, window_bounds = array<i64: 1, 128, 512>}, {pipeline_mode = #tpu.pipeline_mode<synchronous>, transform_indices = @transform_14, window_bounds = array<i64: 1, 1, 512>}, {pipeline_mode = #tpu.pipeline_mode<synchronous>, transform_indices = @transform_15, window_bounds = array<i64: 1, 512, 128>}, {pipeline_mode = #tpu.pipeline_mode<synchronous>, transform_indices = @transform_16, window_bounds = array<i64: 1, 1, 128>}, {pipeline_mode = #tpu.pipeline_mode<synchronous>, transform_indices = @transform_17, window_bounds = array<i64: 1, 128>}, {pipeline_mode = #tpu.pipeline_mode<synchronous>, transform_indices = @transform_18, window_bounds = array<i64: 1, 128>}, {pipeline_mode = #tpu.pipeline_mode<synchronous>, transform_indices = @transform_19, window_bounds = array<i64: 128, 128>}, {pipeline_mode = #tpu.pipeline_mode<synchronous>, transform_indices = @transform_20, window_bounds = array<i64: 4, 128>}, {transform_indices = @transform_21, window_bounds = array<i64: 1, 1, 128>}, {transform_indices = @transform_22, window_bounds = array<i64: 1, 1, 4>}]} {
    %c0 = arith.constant 0 : index
    %c0_0 = arith.constant 0 : index
    %c0_1 = arith.constant 0 : index
    %0 = vector.load %arg1[%c0, %c0_0, %c0_1] : memref<1x5x192xf32, #tpu.memory_space<vmem>>, vector<1x5x192xf32>
    %1 = vector.shape_cast %0 : vector<1x5x192xf32> to vector<5x192xf32>
    %2 = arith.truncf %1 : vector<5x192xf32> to vector<5x192xbf16>
    %c0_2 = arith.constant 0 : index
    %c0_3 = arith.constant 0 : index
    %3 = vector.load %arg2[%c0_2, %c0_3] : memref<192x128xbf16, #tpu.memory_space<vmem>>, vector<192x128xbf16>
    %cst = arith.constant dense<0.000000e+00> : vector<5x128xf32>
    %4 = tpu.matmul %2, %3, %cst {dimension_numbers = #tpu.dot_dimension_numbers<[1], [0], [0], [1], [0, 0, 1, 1], [], []>} : vector<5x192xbf16>, vector<192x128xbf16>, vector<5x128xf32> -> vector<5x128xf32>
    %c0_4 = arith.constant 0 : index
    %c0_5 = arith.constant 0 : index
    %5 = vector.load %arg3[%c0_4, %c0_5] : memref<5x128xf32, #tpu.memory_space<vmem>>, vector<5x128xf32>
    %6 = arith.addf %4, %5 : vector<5x128xf32>
    %c0_6 = arith.constant 0 : index
    %c0_7 = arith.constant 0 : index
    %7 = vector.load %arg4[%c0_6, %c0_7] : memref<1x128xf32, #tpu.memory_space<vmem>>, vector<1x128xf32>
    %c0_8 = arith.constant 0 : index
    %c0_9 = arith.constant 0 : index
    %8 = vector.load %arg5[%c0_8, %c0_9] : memref<1x128xf32, #tpu.memory_space<vmem>>, vector<1x128xf32>
    %cst_10 = arith.constant dense<0.000000e+00> : vector<5xf32>
    %9 = vector.multi_reduction <add>, %6, %cst_10 [1] : vector<5x128xf32> to vector<5xf32>
    %10 = vector.shape_cast %9 : vector<5xf32> to vector<5x1xf32>
    %cst_11 = arith.constant 1.280000e+02 : f32
    %11 = vector.broadcast %cst_11 : f32 to vector<5x1xf32>
    %12 = arith.divf %10, %11 : vector<5x1xf32>
    %13 = vector.broadcast %12 : vector<5x1xf32> to vector<5x128xf32>
    %14 = arith.subf %6, %13 : vector<5x128xf32>
    %15 = arith.mulf %14, %14 : vector<5x128xf32>
    %cst_12 = arith.constant dense<0.000000e+00> : vector<5xf32>
    %16 = vector.multi_reduction <add>, %15, %cst_12 [1] : vector<5x128xf32> to vector<5xf32>
    %17 = vector.shape_cast %16 : vector<5xf32> to vector<5x1xf32>
    %cst_13 = arith.constant 1.280000e+02 : f32
    %18 = vector.broadcast %cst_13 : f32 to vector<5x1xf32>
    %19 = arith.divf %17, %18 : vector<5x1xf32>
    %20 = vector.broadcast %12 : vector<5x1xf32> to vector<5x128xf32>
    %21 = arith.subf %6, %20 : vector<5x128xf32>
    %cst_14 = arith.constant 9.99999974E-6 : f32
    %22 = vector.broadcast %cst_14 : f32 to vector<5x1xf32>
    %23 = arith.addf %19, %22 : vector<5x1xf32>
    %24 = math.rsqrt %23 : vector<5x1xf32>
    %25 = vector.broadcast %24 : vector<5x1xf32> to vector<5x128xf32>
    %26 = arith.mulf %21, %25 : vector<5x128xf32>
    %27 = vector.broadcast %7 : vector<1x128xf32> to vector<5x128xf32>
    %28 = arith.mulf %26, %27 : vector<5x128xf32>
    %29 = vector.broadcast %8 : vector<1x128xf32> to vector<5x128xf32>
    %30 = arith.addf %28, %29 : vector<5x128xf32>
    %c0_15 = arith.constant 0 : index
    %c0_16 = arith.constant 0 : index
    %c0_17 = arith.constant 0 : index
    %31 = vector.load %arg6[%c0_15, %c0_16, %c0_17] : memref<1x1x128xf32, #tpu.memory_space<vmem>>, vector<1x1x128xf32>
    %32 = vector.shape_cast %31 : vector<1x1x128xf32> to vector<1x128xf32>
    %c0_18 = arith.constant 0 : index
    %c0_19 = arith.constant 0 : index
    %c0_20 = arith.constant 0 : index
    %33 = vector.load %arg7[%c0_18, %c0_19, %c0_20] : memref<1x1x128xf32, #tpu.memory_space<vmem>>, vector<1x1x128xf32>
    %34 = vector.shape_cast %33 : vector<1x1x128xf32> to vector<1x128xf32>
    %cst_21 = arith.constant dense<0.000000e+00> : vector<5xf32>
    %35 = vector.multi_reduction <add>, %30, %cst_21 [1] : vector<5x128xf32> to vector<5xf32>
    %36 = vector.shape_cast %35 : vector<5xf32> to vector<5x1xf32>
    %cst_22 = arith.constant 1.280000e+02 : f32
    %37 = vector.broadcast %cst_22 : f32 to vector<5x1xf32>
    %38 = arith.divf %36, %37 : vector<5x1xf32>
    %39 = vector.broadcast %38 : vector<5x1xf32> to vector<5x128xf32>
    %40 = arith.subf %30, %39 : vector<5x128xf32>
    %41 = arith.mulf %40, %40 : vector<5x128xf32>
    %cst_23 = arith.constant dense<0.000000e+00> : vector<5xf32>
    %42 = vector.multi_reduction <add>, %41, %cst_23 [1] : vector<5x128xf32> to vector<5xf32>
    %43 = vector.shape_cast %42 : vector<5xf32> to vector<5x1xf32>
    %cst_24 = arith.constant 1.280000e+02 : f32
    %44 = vector.broadcast %cst_24 : f32 to vector<5x1xf32>
    %45 = arith.divf %43, %44 : vector<5x1xf32>
    %46 = vector.broadcast %38 : vector<5x1xf32> to vector<5x128xf32>
    %47 = arith.subf %30, %46 : vector<5x128xf32>
    %cst_25 = arith.constant 9.99999974E-6 : f32
    %48 = vector.broadcast %cst_25 : f32 to vector<5x1xf32>
    %49 = arith.addf %45, %48 : vector<5x1xf32>
    %50 = math.rsqrt %49 : vector<5x1xf32>
    %51 = vector.broadcast %50 : vector<5x1xf32> to vector<5x128xf32>
    %52 = arith.mulf %47, %51 : vector<5x128xf32>
    %53 = vector.broadcast %32 : vector<1x128xf32> to vector<5x128xf32>
    %54 = arith.mulf %52, %53 : vector<5x128xf32>
    %55 = vector.broadcast %34 : vector<1x128xf32> to vector<5x128xf32>
    %56 = arith.addf %54, %55 : vector<5x128xf32>
    %57 = arith.truncf %56 : vector<5x128xf32> to vector<5x128xbf16>
    %c0_26 = arith.constant 0 : index
    %c0_27 = arith.constant 0 : index
    %c0_28 = arith.constant 0 : index
    %58 = vector.load %arg8[%c0_26, %c0_27, %c0_28] : memref<1x128x384xbf16, #tpu.memory_space<vmem>>, vector<1x128x384xbf16>
    %59 = vector.shape_cast %58 : vector<1x128x384xbf16> to vector<128x384xbf16>
    %cst_29 = arith.constant dense<0.000000e+00> : vector<5x384xf32>
    %60 = tpu.matmul %57, %59, %cst_29 {dimension_numbers = #tpu.dot_dimension_numbers<[1], [0], [0], [1], [0, 0, 1, 1], [], []>} : vector<5x128xbf16>, vector<128x384xbf16>, vector<5x384xf32> -> vector<5x384xf32>
    %c0_30 = arith.constant 0 : index
    %c0_31 = arith.constant 0 : index
    %c0_32 = arith.constant 0 : index
    %61 = vector.load %arg9[%c0_30, %c0_31, %c0_32] : memref<1x1x384xf32, #tpu.memory_space<vmem>>, vector<1x1x384xf32>
    %62 = vector.shape_cast %61 : vector<1x1x384xf32> to vector<1x384xf32>
    %63 = vector.broadcast %62 : vector<1x384xf32> to vector<5x384xf32>
    %64 = arith.addf %60, %63 : vector<5x384xf32>
    %c0_33 = arith.constant 0 : index
    %c0_34 = arith.constant 0 : index
    %c0_35 = arith.constant 0 : index
    %65 = vector.load %arg10[%c0_33, %c0_34, %c0_35] : memref<1x128x128xbf16, #tpu.memory_space<vmem>>, vector<1x128x128xbf16>
    %66 = vector.shape_cast %65 : vector<1x128x128xbf16> to vector<128x128xbf16>
    %cst_36 = arith.constant 0.000000e+00 : f32
    %67 = vector.broadcast %cst_36 : f32 to vector<5x128xf32>
    %68 = vector.extract_strided_slice %64 {offsets = [0, 0], sizes = [5, 64], strides = [1, 1]} : vector<5x384xf32> to vector<5x64xf32>
    %69 = vector.extract_strided_slice %64 {offsets = [0, 128], sizes = [5, 64], strides = [1, 1]} : vector<5x384xf32> to vector<5x64xf32>
    %70 = vector.extract_strided_slice %64 {offsets = [0, 256], sizes = [5, 64], strides = [1, 1]} : vector<5x384xf32> to vector<5x64xf32>
    %71 = arith.truncf %68 : vector<5x64xf32> to vector<5x64xbf16>
    %72 = arith.truncf %69 : vector<5x64xf32> to vector<5x64xbf16>
    %cst_37 = arith.constant dense<0.000000e+00> : vector<5x5xf32>
    %73 = tpu.matmul %71, %72, %cst_37 {dimension_numbers = #tpu.dot_dimension_numbers<[1], [1], [0], [0], [0, 0, 1, 0], [], []>} : vector<5x64xbf16>, vector<5x64xbf16>, vector<5x5xf32> -> vector<5x5xf32>
    %cst_38 = arith.constant dense<0xFF800000> : vector<5xf32>
    %74 = vector.multi_reduction <maximumf>, %73, %cst_38 [1] : vector<5x5xf32> to vector<5xf32>
    %75 = vector.shape_cast %74 : vector<5xf32> to vector<5x1xf32>
    %76 = vector.broadcast %75 : vector<5x1xf32> to vector<5x5xf32>
    %77 = arith.subf %73, %76 : vector<5x5xf32>
    %78 = math.exp %77 : vector<5x5xf32>
    %cst_39 = arith.constant dense<0.000000e+00> : vector<5xf32>
    %79 = vector.multi_reduction <add>, %78, %cst_39 [1] : vector<5x5xf32> to vector<5xf32>
    %80 = vector.shape_cast %79 : vector<5xf32> to vector<5x1xf32>
    %81 = tpu.reciprocal %80 {approx = true} : vector<5x1xf32> -> vector<5x1xf32>
    %82 = vector.broadcast %81 : vector<5x1xf32> to vector<5x5xf32>
    %83 = arith.mulf %78, %82 : vector<5x5xf32>
    %84 = arith.truncf %83 : vector<5x5xf32> to vector<5x5xbf16>
    %85 = arith.truncf %70 : vector<5x64xf32> to vector<5x64xbf16>
    %cst_40 = arith.constant dense<0.000000e+00> : vector<5x64xf32>
    %86 = tpu.matmul %84, %85, %cst_40 {dimension_numbers = #tpu.dot_dimension_numbers<[1], [0], [0], [1], [0, 0, 1, 1], [], []>} : vector<5x5xbf16>, vector<5x64xbf16>, vector<5x64xf32> -> vector<5x64xf32>
    %87 = arith.truncf %86 : vector<5x64xf32> to vector<5x64xbf16>
    %88 = vector.extract_strided_slice %66 {offsets = [0, 0], sizes = [64, 128], strides = [1, 1]} : vector<128x128xbf16> to vector<64x128xbf16>
    %cst_41 = arith.constant dense<0.000000e+00> : vector<5x128xf32>
    %89 = tpu.matmul %87, %88, %cst_41 {dimension_numbers = #tpu.dot_dimension_numbers<[1], [0], [0], [1], [0, 0, 1, 1], [], []>} : vector<5x64xbf16>, vector<64x128xbf16>, vector<5x128xf32> -> vector<5x128xf32>
    %90 = arith.addf %67, %89 : vector<5x128xf32>
    %91 = vector.extract_strided_slice %64 {offsets = [0, 64], sizes = [5, 64], strides = [1, 1]} : vector<5x384xf32> to vector<5x64xf32>
    %92 = vector.extract_strided_slice %64 {offsets = [0, 192], sizes = [5, 64], strides = [1, 1]} : vector<5x384xf32> to vector<5x64xf32>
    %93 = vector.extract_strided_slice %64 {offsets = [0, 320], sizes = [5, 64], strides = [1, 1]} : vector<5x384xf32> to vector<5x64xf32>
    %94 = arith.truncf %91 : vector<5x64xf32> to vector<5x64xbf16>
    %95 = arith.truncf %92 : vector<5x64xf32> to vector<5x64xbf16>
    %cst_42 = arith.constant dense<0.000000e+00> : vector<5x5xf32>
    %96 = tpu.matmul %94, %95, %cst_42 {dimension_numbers = #tpu.dot_dimension_numbers<[1], [1], [0], [0], [0, 0, 1, 0], [], []>} : vector<5x64xbf16>, vector<5x64xbf16>, vector<5x5xf32> -> vector<5x5xf32>
    %cst_43 = arith.constant dense<0xFF800000> : vector<5xf32>
    %97 = vector.multi_reduction <maximumf>, %96, %cst_43 [1] : vector<5x5xf32> to vector<5xf32>
    %98 = vector.shape_cast %97 : vector<5xf32> to vector<5x1xf32>
    %99 = vector.broadcast %98 : vector<5x1xf32> to vector<5x5xf32>
    %100 = arith.subf %96, %99 : vector<5x5xf32>
    %101 = math.exp %100 : vector<5x5xf32>
    %cst_44 = arith.constant dense<0.000000e+00> : vector<5xf32>
    %102 = vector.multi_reduction <add>, %101, %cst_44 [1] : vector<5x5xf32> to vector<5xf32>
    %103 = vector.shape_cast %102 : vector<5xf32> to vector<5x1xf32>
    %104 = tpu.reciprocal %103 {approx = true} : vector<5x1xf32> -> vector<5x1xf32>
    %105 = vector.broadcast %104 : vector<5x1xf32> to vector<5x5xf32>
    %106 = arith.mulf %101, %105 : vector<5x5xf32>
    %107 = arith.truncf %106 : vector<5x5xf32> to vector<5x5xbf16>
    %108 = arith.truncf %93 : vector<5x64xf32> to vector<5x64xbf16>
    %cst_45 = arith.constant dense<0.000000e+00> : vector<5x64xf32>
    %109 = tpu.matmul %107, %108, %cst_45 {dimension_numbers = #tpu.dot_dimension_numbers<[1], [0], [0], [1], [0, 0, 1, 1], [], []>} : vector<5x5xbf16>, vector<5x64xbf16>, vector<5x64xf32> -> vector<5x64xf32>
    %110 = arith.truncf %109 : vector<5x64xf32> to vector<5x64xbf16>
    %111 = vector.extract_strided_slice %66 {offsets = [64, 0], sizes = [64, 128], strides = [1, 1]} : vector<128x128xbf16> to vector<64x128xbf16>
    %cst_46 = arith.constant dense<0.000000e+00> : vector<5x128xf32>
    %112 = tpu.matmul %110, %111, %cst_46 {dimension_numbers = #tpu.dot_dimension_numbers<[1], [0], [0], [1], [0, 0, 1, 1], [], []>} : vector<5x64xbf16>, vector<64x128xbf16>, vector<5x128xf32> -> vector<5x128xf32>
    %113 = arith.addf %90, %112 : vector<5x128xf32>
    %114 = arith.addf %30, %113 : vector<5x128xf32>
    %c0_47 = arith.constant 0 : index
    %c0_48 = arith.constant 0 : index
    %c0_49 = arith.constant 0 : index
    %115 = vector.load %arg11[%c0_47, %c0_48, %c0_49] : memref<1x1x128xf32, #tpu.memory_space<vmem>>, vector<1x1x128xf32>
    %116 = vector.shape_cast %115 : vector<1x1x128xf32> to vector<1x128xf32>
    %117 = vector.broadcast %116 : vector<1x128xf32> to vector<5x128xf32>
    %118 = arith.addf %114, %117 : vector<5x128xf32>
    %c0_50 = arith.constant 0 : index
    %c0_51 = arith.constant 0 : index
    %c0_52 = arith.constant 0 : index
    %119 = vector.load %arg12[%c0_50, %c0_51, %c0_52] : memref<1x1x128xf32, #tpu.memory_space<vmem>>, vector<1x1x128xf32>
    %120 = vector.shape_cast %119 : vector<1x1x128xf32> to vector<1x128xf32>
    %c0_53 = arith.constant 0 : index
    %c0_54 = arith.constant 0 : index
    %c0_55 = arith.constant 0 : index
    %121 = vector.load %arg13[%c0_53, %c0_54, %c0_55] : memref<1x1x128xf32, #tpu.memory_space<vmem>>, vector<1x1x128xf32>
    %122 = vector.shape_cast %121 : vector<1x1x128xf32> to vector<1x128xf32>
    %cst_56 = arith.constant dense<0.000000e+00> : vector<5xf32>
    %123 = vector.multi_reduction <add>, %118, %cst_56 [1] : vector<5x128xf32> to vector<5xf32>
    %124 = vector.shape_cast %123 : vector<5xf32> to vector<5x1xf32>
    %cst_57 = arith.constant 1.280000e+02 : f32
    %125 = vector.broadcast %cst_57 : f32 to vector<5x1xf32>
    %126 = arith.divf %124, %125 : vector<5x1xf32>
    %127 = vector.broadcast %126 : vector<5x1xf32> to vector<5x128xf32>
    %128 = arith.subf %118, %127 : vector<5x128xf32>
    %129 = arith.mulf %128, %128 : vector<5x128xf32>
    %cst_58 = arith.constant dense<0.000000e+00> : vector<5xf32>
    %130 = vector.multi_reduction <add>, %129, %cst_58 [1] : vector<5x128xf32> to vector<5xf32>
    %131 = vector.shape_cast %130 : vector<5xf32> to vector<5x1xf32>
    %cst_59 = arith.constant 1.280000e+02 : f32
    %132 = vector.broadcast %cst_59 : f32 to vector<5x1xf32>
    %133 = arith.divf %131, %132 : vector<5x1xf32>
    %134 = vector.broadcast %126 : vector<5x1xf32> to vector<5x128xf32>
    %135 = arith.subf %118, %134 : vector<5x128xf32>
    %cst_60 = arith.constant 9.99999974E-6 : f32
    %136 = vector.broadcast %cst_60 : f32 to vector<5x1xf32>
    %137 = arith.addf %133, %136 : vector<5x1xf32>
    %138 = math.rsqrt %137 : vector<5x1xf32>
    %139 = vector.broadcast %138 : vector<5x1xf32> to vector<5x128xf32>
    %140 = arith.mulf %135, %139 : vector<5x128xf32>
    %141 = vector.broadcast %120 : vector<1x128xf32> to vector<5x128xf32>
    %142 = arith.mulf %140, %141 : vector<5x128xf32>
    %143 = vector.broadcast %122 : vector<1x128xf32> to vector<5x128xf32>
    %144 = arith.addf %142, %143 : vector<5x128xf32>
    %145 = arith.truncf %144 : vector<5x128xf32> to vector<5x128xbf16>
    %c0_61 = arith.constant 0 : index
    %c0_62 = arith.constant 0 : index
    %c0_63 = arith.constant 0 : index
    %146 = vector.load %arg14[%c0_61, %c0_62, %c0_63] : memref<1x128x512xbf16, #tpu.memory_space<vmem>>, vector<1x128x512xbf16>
    %147 = vector.shape_cast %146 : vector<1x128x512xbf16> to vector<128x512xbf16>
    %cst_64 = arith.constant dense<0.000000e+00> : vector<5x512xf32>
    %148 = tpu.matmul %145, %147, %cst_64 {dimension_numbers = #tpu.dot_dimension_numbers<[1], [0], [0], [1], [0, 0, 1, 1], [], []>} : vector<5x128xbf16>, vector<128x512xbf16>, vector<5x512xf32> -> vector<5x512xf32>
    %c0_65 = arith.constant 0 : index
    %c0_66 = arith.constant 0 : index
    %c0_67 = arith.constant 0 : index
    %149 = vector.load %arg15[%c0_65, %c0_66, %c0_67] : memref<1x1x512xf32, #tpu.memory_space<vmem>>, vector<1x1x512xf32>
    %150 = vector.shape_cast %149 : vector<1x1x512xf32> to vector<1x512xf32>
    %151 = vector.broadcast %150 : vector<1x512xf32> to vector<5x512xf32>
    %152 = arith.addf %148, %151 : vector<5x512xf32>
    %cst_68 = arith.constant 1.702000e+00 : f32
    %153 = vector.broadcast %cst_68 : f32 to vector<5x512xf32>
    %154 = arith.mulf %153, %152 : vector<5x512xf32>
    %155 = arith.negf %154 : vector<5x512xf32>
    %156 = math.exp %155 : vector<5x512xf32>
    %cst_69 = arith.constant 1.000000e+00 : f32
    %157 = vector.broadcast %cst_69 : f32 to vector<5x512xf32>
    %158 = arith.addf %157, %156 : vector<5x512xf32>
    %159 = arith.divf %157, %158 : vector<5x512xf32>
    %160 = arith.mulf %152, %159 : vector<5x512xf32>
    %161 = arith.truncf %160 : vector<5x512xf32> to vector<5x512xbf16>
    %c0_70 = arith.constant 0 : index
    %c0_71 = arith.constant 0 : index
    %c0_72 = arith.constant 0 : index
    %162 = vector.load %arg16[%c0_70, %c0_71, %c0_72] : memref<1x512x128xbf16, #tpu.memory_space<vmem>>, vector<1x512x128xbf16>
    %163 = vector.shape_cast %162 : vector<1x512x128xbf16> to vector<512x128xbf16>
    %cst_73 = arith.constant dense<0.000000e+00> : vector<5x128xf32>
    %164 = tpu.matmul %161, %163, %cst_73 {dimension_numbers = #tpu.dot_dimension_numbers<[1], [0], [0], [1], [0, 0, 1, 1], [], []>} : vector<5x512xbf16>, vector<512x128xbf16>, vector<5x128xf32> -> vector<5x128xf32>
    %c0_74 = arith.constant 0 : index
    %c0_75 = arith.constant 0 : index
    %c0_76 = arith.constant 0 : index
    %165 = vector.load %arg17[%c0_74, %c0_75, %c0_76] : memref<1x1x128xf32, #tpu.memory_space<vmem>>, vector<1x1x128xf32>
    %166 = vector.shape_cast %165 : vector<1x1x128xf32> to vector<1x128xf32>
    %167 = vector.broadcast %166 : vector<1x128xf32> to vector<5x128xf32>
    %168 = arith.addf %164, %167 : vector<5x128xf32>
    %169 = arith.addf %118, %168 : vector<5x128xf32>
    %170 = vector.extract_strided_slice %169 {offsets = [0, 0], sizes = [1, 128], strides = [1, 1]} : vector<5x128xf32> to vector<1x128xf32>
    %c0_77 = arith.constant 0 : index
    %c0_78 = arith.constant 0 : index
    %171 = vector.load %arg18[%c0_77, %c0_78] : memref<1x128xf32, #tpu.memory_space<vmem>>, vector<1x128xf32>
    %c0_79 = arith.constant 0 : index
    %c0_80 = arith.constant 0 : index
    %172 = vector.load %arg19[%c0_79, %c0_80] : memref<1x128xf32, #tpu.memory_space<vmem>>, vector<1x128xf32>
    %cst_81 = arith.constant dense<0.000000e+00> : vector<1xf32>
    %173 = vector.multi_reduction <add>, %170, %cst_81 [1] : vector<1x128xf32> to vector<1xf32>
    %174 = vector.shape_cast %173 : vector<1xf32> to vector<1x1xf32>
    %cst_82 = arith.constant 1.280000e+02 : f32
    %175 = vector.broadcast %cst_82 : f32 to vector<1x1xf32>
    %176 = arith.divf %174, %175 : vector<1x1xf32>
    %177 = vector.broadcast %176 : vector<1x1xf32> to vector<1x128xf32>
    %178 = arith.subf %170, %177 : vector<1x128xf32>
    %179 = arith.mulf %178, %178 : vector<1x128xf32>
    %cst_83 = arith.constant dense<0.000000e+00> : vector<1xf32>
    %180 = vector.multi_reduction <add>, %179, %cst_83 [1] : vector<1x128xf32> to vector<1xf32>
    %181 = vector.shape_cast %180 : vector<1xf32> to vector<1x1xf32>
    %cst_84 = arith.constant 1.280000e+02 : f32
    %182 = vector.broadcast %cst_84 : f32 to vector<1x1xf32>
    %183 = arith.divf %181, %182 : vector<1x1xf32>
    %184 = vector.broadcast %176 : vector<1x1xf32> to vector<1x128xf32>
    %185 = arith.subf %170, %184 : vector<1x128xf32>
    %cst_85 = arith.constant 9.99999974E-6 : f32
    %186 = vector.broadcast %cst_85 : f32 to vector<1x1xf32>
    %187 = arith.addf %183, %186 : vector<1x1xf32>
    %188 = math.rsqrt %187 : vector<1x1xf32>
    %189 = vector.broadcast %188 : vector<1x1xf32> to vector<1x128xf32>
    %190 = arith.mulf %185, %189 : vector<1x128xf32>
    %191 = arith.mulf %190, %171 : vector<1x128xf32>
    %192 = arith.addf %191, %172 : vector<1x128xf32>
    %193 = arith.truncf %192 : vector<1x128xf32> to vector<1x128xbf16>
    %c0_86 = arith.constant 0 : index
    %c0_87 = arith.constant 0 : index
    %194 = vector.load %arg20[%c0_86, %c0_87] : memref<128x128xbf16, #tpu.memory_space<vmem>>, vector<128x128xbf16>
    %cst_88 = arith.constant dense<0.000000e+00> : vector<1x128xf32>
    %195 = tpu.matmul %193, %194, %cst_88 {dimension_numbers = #tpu.dot_dimension_numbers<[1], [0], [0], [1], [0, 0, 1, 1], [], []>} : vector<1x128xbf16>, vector<128x128xbf16>, vector<1x128xf32> -> vector<1x128xf32>
    %196 = arith.mulf %195, %195 : vector<1x128xf32>
    %cst_89 = arith.constant dense<0.000000e+00> : vector<1xf32>
    %197 = vector.multi_reduction <add>, %196, %cst_89 [1] : vector<1x128xf32> to vector<1xf32>
    %198 = vector.shape_cast %197 : vector<1xf32> to vector<1x1xf32>
    %cst_90 = arith.constant 9.99999996E-13 : f32
    %199 = vector.broadcast %cst_90 : f32 to vector<1x1xf32>
    %200 = arith.maximumf %198, %199 : vector<1x1xf32>
    %201 = math.rsqrt %200 : vector<1x1xf32>
    %202 = vector.broadcast %201 : vector<1x1xf32> to vector<1x128xf32>
    %203 = arith.mulf %195, %202 : vector<1x128xf32>
    %c0_91 = arith.constant 0 : index
    %c0_92 = arith.constant 0 : index
    %c0_93 = arith.constant 0 : index
    %204 = vector.load %arg22[%c0_91, %c0_92, %c0_93] : memref<1x1x128xf32, #tpu.memory_space<vmem>>, vector<1x1x128xf32>
    %205 = vector.shape_cast %204 : vector<1x1x128xf32> to vector<1x128xf32>
    %206 = vector.shape_cast %203 : vector<1x128xf32> to vector<1x1x128xf32>
    tpu.vector_store %arg22[%c0_91, %c0_92, %c0_93], %206 {strides = array<i32>} : memref<1x1x128xf32, #tpu.memory_space<vmem>>, vector<1x1x128xf32>,
    %c0_94 = arith.constant 0 : index
    %c0_95 = arith.constant 0 : index
    %207 = vector.load %arg21[%c0_94, %c0_95] : memref<4x128xf32, #tpu.memory_space<vmem>>, vector<4x128xf32>
    %208 = arith.mulf %207, %207 : vector<4x128xf32>
    %cst_96 = arith.constant dense<0.000000e+00> : vector<4xf32>
    %209 = vector.multi_reduction <add>, %208, %cst_96 [1] : vector<4x128xf32> to vector<4xf32>
    %210 = vector.shape_cast %209 : vector<4xf32> to vector<4x1xf32>
    %cst_97 = arith.constant 9.99999996E-13 : f32
    %211 = vector.broadcast %cst_97 : f32 to vector<4x1xf32>
    %212 = arith.maximumf %210, %211 : vector<4x1xf32>
    %213 = math.rsqrt %212 : vector<4x1xf32>
    %214 = vector.broadcast %213 : vector<4x1xf32> to vector<4x128xf32>
    %215 = arith.mulf %207, %214 : vector<4x128xf32>
    %cst_98 = arith.constant dense<0.000000e+00> : vector<1x4xf32>
    %216 = tpu.matmul %203, %215, %cst_98 {dimension_numbers = #tpu.dot_dimension_numbers<[1], [1], [0], [0], [0, 0, 1, 0], [], []>} : vector<1x128xf32>, vector<4x128xf32>, vector<1x4xf32> -> vector<1x4xf32>
    %c0_99 = arith.constant 0 : index
    %c0_100 = arith.constant 0 : index
    %c0_101 = arith.constant 0 : index
    %217 = vector.load %arg23[%c0_99, %c0_100, %c0_101] : memref<1x1x4xf32, #tpu.memory_space<vmem>>, vector<1x1x4xf32>
    %218 = vector.shape_cast %217 : vector<1x1x4xf32> to vector<1x4xf32>
    %219 = vector.shape_cast %216 : vector<1x4xf32> to vector<1x1x4xf32>
    tpu.vector_store %arg23[%c0_99, %c0_100, %c0_101], %219 {strides = array<i32>} : memref<1x1x4xf32, #tpu.memory_space<vmem>>, vector<1x1x4xf32>,
    return
  }
  func.func @transform_0(%arg0: i32) -> (i32, i32, i32) {
    %c0_i32 = arith.constant 0 : i32
    %c0_i32_0 = arith.constant 0 : i32
    %c0_i32_1 = arith.constant 0 : i32
    return %arg0, %c0_i32, %c0_i32_0 : i32, i32, i32
  }
  func.func @transform_1(%arg0: i32) -> (i32, i32) {
    %c0_i32 = arith.constant 0 : i32
    %c0_i32_0 = arith.constant 0 : i32
    %c0_i32_1 = arith.constant 0 : i32
    return %c0_i32, %c0_i32_0 : i32, i32
  }
  func.func @transform_2(%arg0: i32) -> (i32, i32) {
    %c0_i32 = arith.constant 0 : i32
    %c0_i32_0 = arith.constant 0 : i32
    %c0_i32_1 = arith.constant 0 : i32
    return %c0_i32, %c0_i32_0 : i32, i32
  }
  func.func @transform_3(%arg0: i32) -> (i32, i32) {
    %c0_i32 = arith.constant 0 : i32
    %c0_i32_0 = arith.constant 0 : i32
    %c0_i32_1 = arith.constant 0 : i32
    return %c0_i32, %c0_i32_0 : i32, i32
  }
  func.func @transform_4(%arg0: i32) -> (i32, i32) {
    %c0_i32 = arith.constant 0 : i32
    %c0_i32_0 = arith.constant 0 : i32
    %c0_i32_1 = arith.constant 0 : i32
    return %c0_i32, %c0_i32_0 : i32, i32
  }
  func.func @transform_5(%arg0: i32) -> (i32, i32, i32) {
    %c0_i32 = arith.constant 0 : i32
    %c0_i32_0 = arith.constant 0 : i32
    %c0_i32_1 = arith.constant 0 : i32
    %c0_i32_2 = arith.constant 0 : i32
    return %c0_i32, %c0_i32_0, %c0_i32_1 : i32, i32, i32
  }
  func.func @transform_6(%arg0: i32) -> (i32, i32, i32) {
    %c0_i32 = arith.constant 0 : i32
    %c0_i32_0 = arith.constant 0 : i32
    %c0_i32_1 = arith.constant 0 : i32
    %c0_i32_2 = arith.constant 0 : i32
    return %c0_i32, %c0_i32_0, %c0_i32_1 : i32, i32, i32
  }
  func.func @transform_7(%arg0: i32) -> (i32, i32, i32) {
    %c0_i32 = arith.constant 0 : i32
    %c0_i32_0 = arith.constant 0 : i32
    %c0_i32_1 = arith.constant 0 : i32
    %c0_i32_2 = arith.constant 0 : i32
    return %c0_i32, %c0_i32_0, %c0_i32_1 : i32, i32, i32
  }
  func.func @transform_8(%arg0: i32) -> (i32, i32, i32) {
    %c0_i32 = arith.constant 0 : i32
    %c0_i32_0 = arith.constant 0 : i32
    %c0_i32_1 = arith.constant 0 : i32
    %c0_i32_2 = arith.constant 0 : i32
    return %c0_i32, %c0_i32_0, %c0_i32_1 : i32, i32, i32
  }
  func.func @transform_9(%arg0: i32) -> (i32, i32, i32) {
    %c0_i32 = arith.constant 0 : i32
    %c0_i32_0 = arith.constant 0 : i32
    %c0_i32_1 = arith.constant 0 : i32
    %c0_i32_2 = arith.constant 0 : i32
    return %c0_i32, %c0_i32_0, %c0_i32_1 : i32, i32, i32
  }
  func.func @transform_10(%arg0: i32) -> (i32, i32, i32) {
    %c0_i32 = arith.constant 0 : i32
    %c0_i32_0 = arith.constant 0 : i32
    %c0_i32_1 = arith.constant 0 : i32
    %c0_i32_2 = arith.constant 0 : i32
    return %c0_i32, %c0_i32_0, %c0_i32_1 : i32, i32, i32
  }
  func.func @transform_11(%arg0: i32) -> (i32, i32, i32) {
    %c0_i32 = arith.constant 0 : i32
    %c0_i32_0 = arith.constant 0 : i32
    %c0_i32_1 = arith.constant 0 : i32
    %c0_i32_2 = arith.constant 0 : i32
    return %c0_i32, %c0_i32_0, %c0_i32_1 : i32, i32, i32
  }
  func.func @transform_12(%arg0: i32) -> (i32, i32, i32) {
    %c0_i32 = arith.constant 0 : i32
    %c0_i32_0 = arith.constant 0 : i32
    %c0_i32_1 = arith.constant 0 : i32
    %c0_i32_2 = arith.constant 0 : i32
    return %c0_i32, %c0_i32_0, %c0_i32_1 : i32, i32, i32
  }
  func.func @transform_13(%arg0: i32) -> (i32, i32, i32) {
    %c0_i32 = arith.constant 0 : i32
    %c0_i32_0 = arith.constant 0 : i32
    %c0_i32_1 = arith.constant 0 : i32
    %c0_i32_2 = arith.constant 0 : i32
    return %c0_i32, %c0_i32_0, %c0_i32_1 : i32, i32, i32
  }
  func.func @transform_14(%arg0: i32) -> (i32, i32, i32) {
    %c0_i32 = arith.constant 0 : i32
    %c0_i32_0 = arith.constant 0 : i32
    %c0_i32_1 = arith.constant 0 : i32
    %c0_i32_2 = arith.constant 0 : i32
    return %c0_i32, %c0_i32_0, %c0_i32_1 : i32, i32, i32
  }
  func.func @transform_15(%arg0: i32) -> (i32, i32, i32) {
    %c0_i32 = arith.constant 0 : i32
    %c0_i32_0 = arith.constant 0 : i32
    %c0_i32_1 = arith.constant 0 : i32
    %c0_i32_2 = arith.constant 0 : i32
    return %c0_i32, %c0_i32_0, %c0_i32_1 : i32, i32, i32
  }
  func.func @transform_16(%arg0: i32) -> (i32, i32, i32) {
    %c0_i32 = arith.constant 0 : i32
    %c0_i32_0 = arith.constant 0 : i32
    %c0_i32_1 = arith.constant 0 : i32
    %c0_i32_2 = arith.constant 0 : i32
    return %c0_i32, %c0_i32_0, %c0_i32_1 : i32, i32, i32
  }
  func.func @transform_17(%arg0: i32) -> (i32, i32) {
    %c0_i32 = arith.constant 0 : i32
    %c0_i32_0 = arith.constant 0 : i32
    %c0_i32_1 = arith.constant 0 : i32
    return %c0_i32, %c0_i32_0 : i32, i32
  }
  func.func @transform_18(%arg0: i32) -> (i32, i32) {
    %c0_i32 = arith.constant 0 : i32
    %c0_i32_0 = arith.constant 0 : i32
    %c0_i32_1 = arith.constant 0 : i32
    return %c0_i32, %c0_i32_0 : i32, i32
  }
  func.func @transform_19(%arg0: i32) -> (i32, i32) {
    %c0_i32 = arith.constant 0 : i32
    %c0_i32_0 = arith.constant 0 : i32
    %c0_i32_1 = arith.constant 0 : i32
    return %c0_i32, %c0_i32_0 : i32, i32
  }
  func.func @transform_20(%arg0: i32) -> (i32, i32) {
    %c0_i32 = arith.constant 0 : i32
    %c0_i32_0 = arith.constant 0 : i32
    %c0_i32_1 = arith.constant 0 : i32
    return %c0_i32, %c0_i32_0 : i32, i32
  }
  func.func @transform_21(%arg0: i32) -> (i32, i32, i32) {
    %c0_i32 = arith.constant 0 : i32
    %c0_i32_0 = arith.constant 0 : i32
    %c0_i32_1 = arith.constant 0 : i32
    return %arg0, %c0_i32, %c0_i32_0 : i32, i32, i32
  }
  func.func @transform_22(%arg0: i32) -> (i32, i32, i32) {
    %c0_i32 = arith.constant 0 : i32
    %c0_i32_0 = arith.constant 0 : i32
    %c0_i32_1 = arith.constant 0 : i32
    return %arg0, %c0_i32, %c0_i32_0 : i32, i32, i32
  }
}

module attributes {stable_mosaic.version = 11 : i64} {
  func.func @_tail_kernel(%arg0: i32, %arg1: memref<1xf32, #tpu.memory_space<smem>>, %arg2: memref<2x128xf32, #tpu.memory_space<vmem>>, %arg3: memref<6x128xf32, #tpu.memory_space<vmem>>, %arg4: memref<4x128xf32, #tpu.memory_space<vmem>>, %arg5: memref<2x3xf32, #tpu.memory_space<vmem>>, %arg6: memref<1x1xf32, #tpu.memory_space<vmem>>) attributes {dimension_semantics = [#tpu.dimension_semantics<arbitrary>], iteration_bounds = array<i64: 1>, scalar_prefetch = 0 : i64, scratch_operands = 0 : i64, tpu.core_type = #tpu.core_type<tc>, window_params = [{transform_indices = @transform_0, window_bounds = array<i64: 1>}, {pipeline_mode = #tpu.pipeline_mode<synchronous>, transform_indices = @transform_1, window_bounds = array<i64: 2, 128>}, {pipeline_mode = #tpu.pipeline_mode<synchronous>, transform_indices = @transform_2, window_bounds = array<i64: 6, 128>}, {pipeline_mode = #tpu.pipeline_mode<synchronous>, transform_indices = @transform_3, window_bounds = array<i64: 4, 128>}, {pipeline_mode = #tpu.pipeline_mode<synchronous>, transform_indices = @transform_4, window_bounds = array<i64: 2, 3>}, {pipeline_mode = #tpu.pipeline_mode<synchronous>, transform_indices = @transform_5, window_bounds = array<i64: 1, 1>}]} {
    %c0 = arith.constant 0 : index
    %0 = memref.load %arg1[%c0] : memref<1xf32, #tpu.memory_space<smem>>
    %c0_0 = arith.constant 0 : index
    %c0_1 = arith.constant 0 : index
    %1 = vector.load %arg2[%c0_0, %c0_1] : memref<2x128xf32, #tpu.memory_space<vmem>>, vector<2x128xf32>
    %c0_2 = arith.constant 0 : index
    %c0_3 = arith.constant 0 : index
    %2 = vector.load %arg3[%c0_2, %c0_3] : memref<6x128xf32, #tpu.memory_space<vmem>>, vector<6x128xf32>
    %cst = arith.constant dense<0.000000e+00> : vector<2x6xf32>
    %3 = tpu.matmul %1, %2, %cst {dimension_numbers = #tpu.dot_dimension_numbers<[1], [1], [0], [0], [0, 0, 1, 0], [], []>} : vector<2x128xf32>, vector<6x128xf32>, vector<2x6xf32> -> vector<2x6xf32>
    %4 = vector.extract_strided_slice %3 {offsets = [0, 0], sizes = [1, 3], strides = [1, 1]} : vector<2x6xf32> to vector<1x3xf32>
    %5 = vector.broadcast %0 : f32 to vector<1x3xf32>
    %6 = arith.mulf %4, %5 : vector<1x3xf32>
    %c0_4 = arith.constant 0 : index
    %c0_5 = arith.constant 0 : index
    %7 = vector.load %arg5[%c0_4, %c0_5] : memref<2x3xf32, #tpu.memory_space<vmem>>, vector<1x3xf32>
    tpu.vector_store %arg5[%c0_4, %c0_5], %6 {strides = array<i32>} : memref<2x3xf32, #tpu.memory_space<vmem>>, vector<1x3xf32>,
    %8 = vector.extract_strided_slice %3 {offsets = [1, 3], sizes = [1, 3], strides = [1, 1]} : vector<2x6xf32> to vector<1x3xf32>
    %9 = vector.broadcast %0 : f32 to vector<1x3xf32>
    %10 = arith.mulf %8, %9 : vector<1x3xf32>
    %c1 = arith.constant 1 : index
    %c0_6 = arith.constant 0 : index
    %11 = vector.load %arg5[%c1, %c0_6] : memref<2x3xf32, #tpu.memory_space<vmem>>, vector<1x3xf32>
    tpu.vector_store %arg5[%c1, %c0_6], %10 {strides = array<i32>} : memref<2x3xf32, #tpu.memory_space<vmem>>, vector<1x3xf32>,
    %c0_7 = arith.constant 0 : index
    %c0_8 = arith.constant 0 : index
    %12 = vector.load %arg4[%c0_7, %c0_8] : memref<4x128xf32, #tpu.memory_space<vmem>>, vector<4x128xf32>
    %cst_9 = arith.constant dense<0.000000e+00> : vector<4x4xf32>
    %13 = tpu.matmul %12, %12, %cst_9 {dimension_numbers = #tpu.dot_dimension_numbers<[1], [1], [0], [0], [0, 0, 1, 0], [], []>} : vector<4x128xf32>, vector<4x128xf32>, vector<4x4xf32> -> vector<4x4xf32>
    %14 = tpu.iota {dimensions = array<i32: 0>} : vector<4x4xi32>
    %15 = tpu.iota {dimensions = array<i32: 1>} : vector<4x4xi32>
    %16 = arith.cmpi eq, %14, %15 : vector<4x4xi32>
    %17 = math.absf %13 : vector<4x4xf32>
    %cst_10 = arith.constant 0.000000e+00 : f32
    %18 = vector.broadcast %cst_10 : f32 to vector<4x4xf32>
    %19 = arith.select %16, %18, %17 : vector<4x4xi1>, vector<4x4xf32>
    %cst_11 = arith.constant dense<0.000000e+00> : vector<4xf32>
    %20 = vector.multi_reduction <add>, %19, %cst_11 [1] : vector<4x4xf32> to vector<4xf32>
    %21 = vector.shape_cast %20 : vector<4xf32> to vector<4x1xf32>
    %cst_12 = arith.constant dense<0.000000e+00> : vector<1xf32>
    %22 = vector.multi_reduction <add>, %21, %cst_12 [0] : vector<4x1xf32> to vector<1xf32>
    %23 = vector.shape_cast %22 : vector<1xf32> to vector<1x1xf32>
    %cst_13 = arith.constant 0.0833333358 : f32
    %24 = vector.broadcast %cst_13 : f32 to vector<1x1xf32>
    %25 = arith.mulf %23, %24 : vector<1x1xf32>
    %c0_14 = arith.constant 0 : index
    %c0_15 = arith.constant 0 : index
    %26 = vector.load %arg6[%c0_14, %c0_15] : memref<1x1xf32, #tpu.memory_space<vmem>>, vector<1x1xf32>
    tpu.vector_store %arg6[%c0_14, %c0_15], %25 {strides = array<i32>} : memref<1x1xf32, #tpu.memory_space<vmem>>, vector<1x1xf32>,
    return
  }
  func.func @transform_0(%arg0: i32) -> i32 {
    %c0_i32 = arith.constant 0 : i32
    %c0_i32_0 = arith.constant 0 : i32
    return %c0_i32 : i32
  }
  func.func @transform_1(%arg0: i32) -> (i32, i32) {
    %c0_i32 = arith.constant 0 : i32
    %c0_i32_0 = arith.constant 0 : i32
    %c0_i32_1 = arith.constant 0 : i32
    return %c0_i32, %c0_i32_0 : i32, i32
  }
  func.func @transform_2(%arg0: i32) -> (i32, i32) {
    %c0_i32 = arith.constant 0 : i32
    %c0_i32_0 = arith.constant 0 : i32
    %c0_i32_1 = arith.constant 0 : i32
    return %c0_i32, %c0_i32_0 : i32, i32
  }
  func.func @transform_3(%arg0: i32) -> (i32, i32) {
    %c0_i32 = arith.constant 0 : i32
    %c0_i32_0 = arith.constant 0 : i32
    %c0_i32_1 = arith.constant 0 : i32
    return %c0_i32, %c0_i32_0 : i32, i32
  }
  func.func @transform_4(%arg0: i32) -> (i32, i32) {
    %c0_i32 = arith.constant 0 : i32
    %c0_i32_0 = arith.constant 0 : i32
    %c0_i32_1 = arith.constant 0 : i32
    return %c0_i32, %c0_i32_0 : i32, i32
  }
  func.func @transform_5(%arg0: i32) -> (i32, i32) {
    %c0_i32 = arith.constant 0 : i32
    %c0_i32_0 = arith.constant 0 : i32
    %c0_i32_1 = arith.constant 0 : i32
    return %c0_i32, %c0_i32_0 : i32, i32
  }
}

module attributes {stable_mosaic.version = 11 : i64} {
  func.func @_text_tower_kernel(%arg0: i32, %arg1: memref<10xi32, #tpu.memory_space<smem>>, %arg2: memref<1x16x128xf32, #tpu.memory_space<vmem>>, %arg3: memref<16x128xf32, #tpu.memory_space<vmem>>, %arg4: memref<1x1x128xf32, #tpu.memory_space<vmem>>, %arg5: memref<1x1x128xf32, #tpu.memory_space<vmem>>, %arg6: memref<1x128x384xbf16, #tpu.memory_space<vmem>>, %arg7: memref<1x1x384xf32, #tpu.memory_space<vmem>>, %arg8: memref<1x128x128xbf16, #tpu.memory_space<vmem>>, %arg9: memref<1x1x128xf32, #tpu.memory_space<vmem>>, %arg10: memref<1x1x128xf32, #tpu.memory_space<vmem>>, %arg11: memref<1x1x128xf32, #tpu.memory_space<vmem>>, %arg12: memref<1x128x512xbf16, #tpu.memory_space<vmem>>, %arg13: memref<1x1x512xf32, #tpu.memory_space<vmem>>, %arg14: memref<1x512x128xbf16, #tpu.memory_space<vmem>>, %arg15: memref<1x1x128xf32, #tpu.memory_space<vmem>>, %arg16: memref<1x128xf32, #tpu.memory_space<vmem>>, %arg17: memref<1x128xf32, #tpu.memory_space<vmem>>, %arg18: memref<128x128xbf16, #tpu.memory_space<vmem>>, %arg19: memref<1x1x128xf32, #tpu.memory_space<vmem>>) attributes {dimension_semantics = [#tpu.dimension_semantics<parallel>], iteration_bounds = array<i64: 10>, scalar_prefetch = 1 : i64, scratch_operands = 0 : i64, tpu.core_type = #tpu.core_type<tc>, window_params = [{transform_indices = @transform_0, window_bounds = array<i64: 1, 16, 128>}, {pipeline_mode = #tpu.pipeline_mode<synchronous>, transform_indices = @transform_1, window_bounds = array<i64: 16, 128>}, {pipeline_mode = #tpu.pipeline_mode<synchronous>, transform_indices = @transform_2, window_bounds = array<i64: 1, 1, 128>}, {pipeline_mode = #tpu.pipeline_mode<synchronous>, transform_indices = @transform_3, window_bounds = array<i64: 1, 1, 128>}, {pipeline_mode = #tpu.pipeline_mode<synchronous>, transform_indices = @transform_4, window_bounds = array<i64: 1, 128, 384>}, {pipeline_mode = #tpu.pipeline_mode<synchronous>, transform_indices = @transform_5, window_bounds = array<i64: 1, 1, 384>}, {pipeline_mode = #tpu.pipeline_mode<synchronous>, transform_indices = @transform_6, window_bounds = array<i64: 1, 128, 128>}, {pipeline_mode = #tpu.pipeline_mode<synchronous>, transform_indices = @transform_7, window_bounds = array<i64: 1, 1, 128>}, {pipeline_mode = #tpu.pipeline_mode<synchronous>, transform_indices = @transform_8, window_bounds = array<i64: 1, 1, 128>}, {pipeline_mode = #tpu.pipeline_mode<synchronous>, transform_indices = @transform_9, window_bounds = array<i64: 1, 1, 128>}, {pipeline_mode = #tpu.pipeline_mode<synchronous>, transform_indices = @transform_10, window_bounds = array<i64: 1, 128, 512>}, {pipeline_mode = #tpu.pipeline_mode<synchronous>, transform_indices = @transform_11, window_bounds = array<i64: 1, 1, 512>}, {pipeline_mode = #tpu.pipeline_mode<synchronous>, transform_indices = @transform_12, window_bounds = array<i64: 1, 512, 128>}, {pipeline_mode = #tpu.pipeline_mode<synchronous>, transform_indices = @transform_13, window_bounds = array<i64: 1, 1, 128>}, {pipeline_mode = #tpu.pipeline_mode<synchronous>, transform_indices = @transform_14, window_bounds = array<i64: 1, 128>}, {pipeline_mode = #tpu.pipeline_mode<synchronous>, transform_indices = @transform_15, window_bounds = array<i64: 1, 128>}, {pipeline_mode = #tpu.pipeline_mode<synchronous>, transform_indices = @transform_16, window_bounds = array<i64: 128, 128>}, {transform_indices = @transform_17, window_bounds = array<i64: 1, 1, 128>}]} {
    %c0 = arith.constant 0 : index
    %c0_0 = arith.constant 0 : index
    %c0_1 = arith.constant 0 : index
    %0 = vector.load %arg2[%c0, %c0_0, %c0_1] : memref<1x16x128xf32, #tpu.memory_space<vmem>>, vector<1x16x128xf32>
    %1 = vector.shape_cast %0 : vector<1x16x128xf32> to vector<16x128xf32>
    %c0_2 = arith.constant 0 : index
    %c0_3 = arith.constant 0 : index
    %2 = vector.load %arg3[%c0_2, %c0_3] : memref<16x128xf32, #tpu.memory_space<vmem>>, vector<16x128xf32>
    %3 = arith.addf %1, %2 : vector<16x128xf32>
    %4 = tpu.iota {dimensions = array<i32: 0>} : vector<16x16xi32>
    %5 = tpu.iota {dimensions = array<i32: 1>} : vector<16x16xi32>
    %6 = arith.cmpi sgt, %5, %4 : vector<16x16xi32>
    %cst = arith.constant -1.000000e+09 : f32
    %cst_4 = arith.constant 0.000000e+00 : f32
    %7 = vector.broadcast %cst : f32 to vector<16x16xf32>
    %8 = vector.broadcast %cst_4 : f32 to vector<16x16xf32>
    %9 = arith.select %6, %7, %8 : vector<16x16xi1>, vector<16x16xf32>
    %c0_5 = arith.constant 0 : index
    %c0_6 = arith.constant 0 : index
    %c0_7 = arith.constant 0 : index
    %10 = vector.load %arg4[%c0_5, %c0_6, %c0_7] : memref<1x1x128xf32, #tpu.memory_space<vmem>>, vector<1x1x128xf32>
    %11 = vector.shape_cast %10 : vector<1x1x128xf32> to vector<1x128xf32>
    %c0_8 = arith.constant 0 : index
    %c0_9 = arith.constant 0 : index
    %c0_10 = arith.constant 0 : index
    %12 = vector.load %arg5[%c0_8, %c0_9, %c0_10] : memref<1x1x128xf32, #tpu.memory_space<vmem>>, vector<1x1x128xf32>
    %13 = vector.shape_cast %12 : vector<1x1x128xf32> to vector<1x128xf32>
    %cst_11 = arith.constant dense<0.000000e+00> : vector<16xf32>
    %14 = vector.multi_reduction <add>, %3, %cst_11 [1] : vector<16x128xf32> to vector<16xf32>
    %15 = vector.shape_cast %14 : vector<16xf32> to vector<16x1xf32>
    %cst_12 = arith.constant 1.280000e+02 : f32
    %16 = vector.broadcast %cst_12 : f32 to vector<16x1xf32>
    %17 = arith.divf %15, %16 : vector<16x1xf32>
    %18 = vector.broadcast %17 : vector<16x1xf32> to vector<16x128xf32>
    %19 = arith.subf %3, %18 : vector<16x128xf32>
    %20 = arith.mulf %19, %19 : vector<16x128xf32>
    %cst_13 = arith.constant dense<0.000000e+00> : vector<16xf32>
    %21 = vector.multi_reduction <add>, %20, %cst_13 [1] : vector<16x128xf32> to vector<16xf32>
    %22 = vector.shape_cast %21 : vector<16xf32> to vector<16x1xf32>
    %cst_14 = arith.constant 1.280000e+02 : f32
    %23 = vector.broadcast %cst_14 : f32 to vector<16x1xf32>
    %24 = arith.divf %22, %23 : vector<16x1xf32>
    %25 = vector.broadcast %17 : vector<16x1xf32> to vector<16x128xf32>
    %26 = arith.subf %3, %25 : vector<16x128xf32>
    %cst_15 = arith.constant 9.99999974E-6 : f32
    %27 = vector.broadcast %cst_15 : f32 to vector<16x1xf32>
    %28 = arith.addf %24, %27 : vector<16x1xf32>
    %29 = math.rsqrt %28 : vector<16x1xf32>
    %30 = vector.broadcast %29 : vector<16x1xf32> to vector<16x128xf32>
    %31 = arith.mulf %26, %30 : vector<16x128xf32>
    %32 = vector.broadcast %11 : vector<1x128xf32> to vector<16x128xf32>
    %33 = arith.mulf %31, %32 : vector<16x128xf32>
    %34 = vector.broadcast %13 : vector<1x128xf32> to vector<16x128xf32>
    %35 = arith.addf %33, %34 : vector<16x128xf32>
    %36 = arith.truncf %35 : vector<16x128xf32> to vector<16x128xbf16>
    %c0_16 = arith.constant 0 : index
    %c0_17 = arith.constant 0 : index
    %c0_18 = arith.constant 0 : index
    %37 = vector.load %arg6[%c0_16, %c0_17, %c0_18] : memref<1x128x384xbf16, #tpu.memory_space<vmem>>, vector<1x128x384xbf16>
    %38 = vector.shape_cast %37 : vector<1x128x384xbf16> to vector<128x384xbf16>
    %cst_19 = arith.constant dense<0.000000e+00> : vector<16x384xf32>
    %39 = tpu.matmul %36, %38, %cst_19 {dimension_numbers = #tpu.dot_dimension_numbers<[1], [0], [0], [1], [0, 0, 1, 1], [], []>} : vector<16x128xbf16>, vector<128x384xbf16>, vector<16x384xf32> -> vector<16x384xf32>
    %c0_20 = arith.constant 0 : index
    %c0_21 = arith.constant 0 : index
    %c0_22 = arith.constant 0 : index
    %40 = vector.load %arg7[%c0_20, %c0_21, %c0_22] : memref<1x1x384xf32, #tpu.memory_space<vmem>>, vector<1x1x384xf32>
    %41 = vector.shape_cast %40 : vector<1x1x384xf32> to vector<1x384xf32>
    %42 = vector.broadcast %41 : vector<1x384xf32> to vector<16x384xf32>
    %43 = arith.addf %39, %42 : vector<16x384xf32>
    %c0_23 = arith.constant 0 : index
    %c0_24 = arith.constant 0 : index
    %c0_25 = arith.constant 0 : index
    %44 = vector.load %arg8[%c0_23, %c0_24, %c0_25] : memref<1x128x128xbf16, #tpu.memory_space<vmem>>, vector<1x128x128xbf16>
    %45 = vector.shape_cast %44 : vector<1x128x128xbf16> to vector<128x128xbf16>
    %cst_26 = arith.constant 0.000000e+00 : f32
    %46 = vector.broadcast %cst_26 : f32 to vector<16x128xf32>
    %47 = vector.extract_strided_slice %43 {offsets = [0, 0], sizes = [16, 64], strides = [1, 1]} : vector<16x384xf32> to vector<16x64xf32>
    %48 = vector.extract_strided_slice %43 {offsets = [0, 128], sizes = [16, 64], strides = [1, 1]} : vector<16x384xf32> to vector<16x64xf32>
    %49 = vector.extract_strided_slice %43 {offsets = [0, 256], sizes = [16, 64], strides = [1, 1]} : vector<16x384xf32> to vector<16x64xf32>
    %50 = arith.truncf %47 : vector<16x64xf32> to vector<16x64xbf16>
    %51 = arith.truncf %48 : vector<16x64xf32> to vector<16x64xbf16>
    %cst_27 = arith.constant dense<0.000000e+00> : vector<16x16xf32>
    %52 = tpu.matmul %50, %51, %cst_27 {dimension_numbers = #tpu.dot_dimension_numbers<[1], [1], [0], [0], [0, 0, 1, 0], [], []>} : vector<16x64xbf16>, vector<16x64xbf16>, vector<16x16xf32> -> vector<16x16xf32>
    %53 = arith.addf %52, %9 : vector<16x16xf32>
    %cst_28 = arith.constant dense<0xFF800000> : vector<16xf32>
    %54 = vector.multi_reduction <maximumf>, %53, %cst_28 [1] : vector<16x16xf32> to vector<16xf32>
    %55 = vector.shape_cast %54 : vector<16xf32> to vector<16x1xf32>
    %56 = vector.broadcast %55 : vector<16x1xf32> to vector<16x16xf32>
    %57 = arith.subf %53, %56 : vector<16x16xf32>
    %58 = math.exp %57 : vector<16x16xf32>
    %cst_29 = arith.constant dense<0.000000e+00> : vector<16xf32>
    %59 = vector.multi_reduction <add>, %58, %cst_29 [1] : vector<16x16xf32> to vector<16xf32>
    %60 = vector.shape_cast %59 : vector<16xf32> to vector<16x1xf32>
    %61 = tpu.reciprocal %60 {approx = true} : vector<16x1xf32> -> vector<16x1xf32>
    %62 = vector.broadcast %61 : vector<16x1xf32> to vector<16x16xf32>
    %63 = arith.mulf %58, %62 : vector<16x16xf32>
    %64 = arith.truncf %63 : vector<16x16xf32> to vector<16x16xbf16>
    %65 = arith.truncf %49 : vector<16x64xf32> to vector<16x64xbf16>
    %cst_30 = arith.constant dense<0.000000e+00> : vector<16x64xf32>
    %66 = tpu.matmul %64, %65, %cst_30 {dimension_numbers = #tpu.dot_dimension_numbers<[1], [0], [0], [1], [0, 0, 1, 1], [], []>} : vector<16x16xbf16>, vector<16x64xbf16>, vector<16x64xf32> -> vector<16x64xf32>
    %67 = arith.truncf %66 : vector<16x64xf32> to vector<16x64xbf16>
    %68 = vector.extract_strided_slice %45 {offsets = [0, 0], sizes = [64, 128], strides = [1, 1]} : vector<128x128xbf16> to vector<64x128xbf16>
    %cst_31 = arith.constant dense<0.000000e+00> : vector<16x128xf32>
    %69 = tpu.matmul %67, %68, %cst_31 {dimension_numbers = #tpu.dot_dimension_numbers<[1], [0], [0], [1], [0, 0, 1, 1], [], []>} : vector<16x64xbf16>, vector<64x128xbf16>, vector<16x128xf32> -> vector<16x128xf32>
    %70 = arith.addf %46, %69 : vector<16x128xf32>
    %71 = vector.extract_strided_slice %43 {offsets = [0, 64], sizes = [16, 64], strides = [1, 1]} : vector<16x384xf32> to vector<16x64xf32>
    %72 = vector.extract_strided_slice %43 {offsets = [0, 192], sizes = [16, 64], strides = [1, 1]} : vector<16x384xf32> to vector<16x64xf32>
    %73 = vector.extract_strided_slice %43 {offsets = [0, 320], sizes = [16, 64], strides = [1, 1]} : vector<16x384xf32> to vector<16x64xf32>
    %74 = arith.truncf %71 : vector<16x64xf32> to vector<16x64xbf16>
    %75 = arith.truncf %72 : vector<16x64xf32> to vector<16x64xbf16>
    %cst_32 = arith.constant dense<0.000000e+00> : vector<16x16xf32>
    %76 = tpu.matmul %74, %75, %cst_32 {dimension_numbers = #tpu.dot_dimension_numbers<[1], [1], [0], [0], [0, 0, 1, 0], [], []>} : vector<16x64xbf16>, vector<16x64xbf16>, vector<16x16xf32> -> vector<16x16xf32>
    %77 = arith.addf %76, %9 : vector<16x16xf32>
    %cst_33 = arith.constant dense<0xFF800000> : vector<16xf32>
    %78 = vector.multi_reduction <maximumf>, %77, %cst_33 [1] : vector<16x16xf32> to vector<16xf32>
    %79 = vector.shape_cast %78 : vector<16xf32> to vector<16x1xf32>
    %80 = vector.broadcast %79 : vector<16x1xf32> to vector<16x16xf32>
    %81 = arith.subf %77, %80 : vector<16x16xf32>
    %82 = math.exp %81 : vector<16x16xf32>
    %cst_34 = arith.constant dense<0.000000e+00> : vector<16xf32>
    %83 = vector.multi_reduction <add>, %82, %cst_34 [1] : vector<16x16xf32> to vector<16xf32>
    %84 = vector.shape_cast %83 : vector<16xf32> to vector<16x1xf32>
    %85 = tpu.reciprocal %84 {approx = true} : vector<16x1xf32> -> vector<16x1xf32>
    %86 = vector.broadcast %85 : vector<16x1xf32> to vector<16x16xf32>
    %87 = arith.mulf %82, %86 : vector<16x16xf32>
    %88 = arith.truncf %87 : vector<16x16xf32> to vector<16x16xbf16>
    %89 = arith.truncf %73 : vector<16x64xf32> to vector<16x64xbf16>
    %cst_35 = arith.constant dense<0.000000e+00> : vector<16x64xf32>
    %90 = tpu.matmul %88, %89, %cst_35 {dimension_numbers = #tpu.dot_dimension_numbers<[1], [0], [0], [1], [0, 0, 1, 1], [], []>} : vector<16x16xbf16>, vector<16x64xbf16>, vector<16x64xf32> -> vector<16x64xf32>
    %91 = arith.truncf %90 : vector<16x64xf32> to vector<16x64xbf16>
    %92 = vector.extract_strided_slice %45 {offsets = [64, 0], sizes = [64, 128], strides = [1, 1]} : vector<128x128xbf16> to vector<64x128xbf16>
    %cst_36 = arith.constant dense<0.000000e+00> : vector<16x128xf32>
    %93 = tpu.matmul %91, %92, %cst_36 {dimension_numbers = #tpu.dot_dimension_numbers<[1], [0], [0], [1], [0, 0, 1, 1], [], []>} : vector<16x64xbf16>, vector<64x128xbf16>, vector<16x128xf32> -> vector<16x128xf32>
    %94 = arith.addf %70, %93 : vector<16x128xf32>
    %95 = arith.addf %3, %94 : vector<16x128xf32>
    %c0_37 = arith.constant 0 : index
    %c0_38 = arith.constant 0 : index
    %c0_39 = arith.constant 0 : index
    %96 = vector.load %arg9[%c0_37, %c0_38, %c0_39] : memref<1x1x128xf32, #tpu.memory_space<vmem>>, vector<1x1x128xf32>
    %97 = vector.shape_cast %96 : vector<1x1x128xf32> to vector<1x128xf32>
    %98 = vector.broadcast %97 : vector<1x128xf32> to vector<16x128xf32>
    %99 = arith.addf %95, %98 : vector<16x128xf32>
    %c0_40 = arith.constant 0 : index
    %c0_41 = arith.constant 0 : index
    %c0_42 = arith.constant 0 : index
    %100 = vector.load %arg10[%c0_40, %c0_41, %c0_42] : memref<1x1x128xf32, #tpu.memory_space<vmem>>, vector<1x1x128xf32>
    %101 = vector.shape_cast %100 : vector<1x1x128xf32> to vector<1x128xf32>
    %c0_43 = arith.constant 0 : index
    %c0_44 = arith.constant 0 : index
    %c0_45 = arith.constant 0 : index
    %102 = vector.load %arg11[%c0_43, %c0_44, %c0_45] : memref<1x1x128xf32, #tpu.memory_space<vmem>>, vector<1x1x128xf32>
    %103 = vector.shape_cast %102 : vector<1x1x128xf32> to vector<1x128xf32>
    %cst_46 = arith.constant dense<0.000000e+00> : vector<16xf32>
    %104 = vector.multi_reduction <add>, %99, %cst_46 [1] : vector<16x128xf32> to vector<16xf32>
    %105 = vector.shape_cast %104 : vector<16xf32> to vector<16x1xf32>
    %cst_47 = arith.constant 1.280000e+02 : f32
    %106 = vector.broadcast %cst_47 : f32 to vector<16x1xf32>
    %107 = arith.divf %105, %106 : vector<16x1xf32>
    %108 = vector.broadcast %107 : vector<16x1xf32> to vector<16x128xf32>
    %109 = arith.subf %99, %108 : vector<16x128xf32>
    %110 = arith.mulf %109, %109 : vector<16x128xf32>
    %cst_48 = arith.constant dense<0.000000e+00> : vector<16xf32>
    %111 = vector.multi_reduction <add>, %110, %cst_48 [1] : vector<16x128xf32> to vector<16xf32>
    %112 = vector.shape_cast %111 : vector<16xf32> to vector<16x1xf32>
    %cst_49 = arith.constant 1.280000e+02 : f32
    %113 = vector.broadcast %cst_49 : f32 to vector<16x1xf32>
    %114 = arith.divf %112, %113 : vector<16x1xf32>
    %115 = vector.broadcast %107 : vector<16x1xf32> to vector<16x128xf32>
    %116 = arith.subf %99, %115 : vector<16x128xf32>
    %cst_50 = arith.constant 9.99999974E-6 : f32
    %117 = vector.broadcast %cst_50 : f32 to vector<16x1xf32>
    %118 = arith.addf %114, %117 : vector<16x1xf32>
    %119 = math.rsqrt %118 : vector<16x1xf32>
    %120 = vector.broadcast %119 : vector<16x1xf32> to vector<16x128xf32>
    %121 = arith.mulf %116, %120 : vector<16x128xf32>
    %122 = vector.broadcast %101 : vector<1x128xf32> to vector<16x128xf32>
    %123 = arith.mulf %121, %122 : vector<16x128xf32>
    %124 = vector.broadcast %103 : vector<1x128xf32> to vector<16x128xf32>
    %125 = arith.addf %123, %124 : vector<16x128xf32>
    %126 = arith.truncf %125 : vector<16x128xf32> to vector<16x128xbf16>
    %c0_51 = arith.constant 0 : index
    %c0_52 = arith.constant 0 : index
    %c0_53 = arith.constant 0 : index
    %127 = vector.load %arg12[%c0_51, %c0_52, %c0_53] : memref<1x128x512xbf16, #tpu.memory_space<vmem>>, vector<1x128x512xbf16>
    %128 = vector.shape_cast %127 : vector<1x128x512xbf16> to vector<128x512xbf16>
    %cst_54 = arith.constant dense<0.000000e+00> : vector<16x512xf32>
    %129 = tpu.matmul %126, %128, %cst_54 {dimension_numbers = #tpu.dot_dimension_numbers<[1], [0], [0], [1], [0, 0, 1, 1], [], []>} : vector<16x128xbf16>, vector<128x512xbf16>, vector<16x512xf32> -> vector<16x512xf32>
    %c0_55 = arith.constant 0 : index
    %c0_56 = arith.constant 0 : index
    %c0_57 = arith.constant 0 : index
    %130 = vector.load %arg13[%c0_55, %c0_56, %c0_57] : memref<1x1x512xf32, #tpu.memory_space<vmem>>, vector<1x1x512xf32>
    %131 = vector.shape_cast %130 : vector<1x1x512xf32> to vector<1x512xf32>
    %132 = vector.broadcast %131 : vector<1x512xf32> to vector<16x512xf32>
    %133 = arith.addf %129, %132 : vector<16x512xf32>
    %cst_58 = arith.constant 1.702000e+00 : f32
    %134 = vector.broadcast %cst_58 : f32 to vector<16x512xf32>
    %135 = arith.mulf %134, %133 : vector<16x512xf32>
    %136 = arith.negf %135 : vector<16x512xf32>
    %137 = math.exp %136 : vector<16x512xf32>
    %cst_59 = arith.constant 1.000000e+00 : f32
    %138 = vector.broadcast %cst_59 : f32 to vector<16x512xf32>
    %139 = arith.addf %138, %137 : vector<16x512xf32>
    %140 = arith.divf %138, %139 : vector<16x512xf32>
    %141 = arith.mulf %133, %140 : vector<16x512xf32>
    %142 = arith.truncf %141 : vector<16x512xf32> to vector<16x512xbf16>
    %c0_60 = arith.constant 0 : index
    %c0_61 = arith.constant 0 : index
    %c0_62 = arith.constant 0 : index
    %143 = vector.load %arg14[%c0_60, %c0_61, %c0_62] : memref<1x512x128xbf16, #tpu.memory_space<vmem>>, vector<1x512x128xbf16>
    %144 = vector.shape_cast %143 : vector<1x512x128xbf16> to vector<512x128xbf16>
    %cst_63 = arith.constant dense<0.000000e+00> : vector<16x128xf32>
    %145 = tpu.matmul %142, %144, %cst_63 {dimension_numbers = #tpu.dot_dimension_numbers<[1], [0], [0], [1], [0, 0, 1, 1], [], []>} : vector<16x512xbf16>, vector<512x128xbf16>, vector<16x128xf32> -> vector<16x128xf32>
    %c0_64 = arith.constant 0 : index
    %c0_65 = arith.constant 0 : index
    %c0_66 = arith.constant 0 : index
    %146 = vector.load %arg15[%c0_64, %c0_65, %c0_66] : memref<1x1x128xf32, #tpu.memory_space<vmem>>, vector<1x1x128xf32>
    %147 = vector.shape_cast %146 : vector<1x1x128xf32> to vector<1x128xf32>
    %148 = vector.broadcast %147 : vector<1x128xf32> to vector<16x128xf32>
    %149 = arith.addf %145, %148 : vector<16x128xf32>
    %150 = arith.addf %99, %149 : vector<16x128xf32>
    %151 = arith.index_cast %arg0 : i32 to index
    %152 = memref.load %arg1[%151] : memref<10xi32, #tpu.memory_space<smem>>
    %153 = tpu.iota {dimensions = array<i32: 1>} : vector<1x16xi32>
    %154 = vector.broadcast %152 : i32 to vector<1x16xi32>
    %155 = arith.cmpi eq, %153, %154 : vector<1x16xi32>
    %156 = arith.extui %155 : vector<1x16xi1> to vector<1x16xi32>
    %157 = arith.sitofp %156 : vector<1x16xi32> to vector<1x16xf32>
    %cst_67 = arith.constant dense<0.000000e+00> : vector<1x128xf32>
    %158 = tpu.matmul %157, %150, %cst_67 {dimension_numbers = #tpu.dot_dimension_numbers<[1], [0], [0], [1], [0, 0, 1, 1], [], []>} : vector<1x16xf32>, vector<16x128xf32>, vector<1x128xf32> -> vector<1x128xf32>
    %c0_68 = arith.constant 0 : index
    %c0_69 = arith.constant 0 : index
    %159 = vector.load %arg16[%c0_68, %c0_69] : memref<1x128xf32, #tpu.memory_space<vmem>>, vector<1x128xf32>
    %c0_70 = arith.constant 0 : index
    %c0_71 = arith.constant 0 : index
    %160 = vector.load %arg17[%c0_70, %c0_71] : memref<1x128xf32, #tpu.memory_space<vmem>>, vector<1x128xf32>
    %cst_72 = arith.constant dense<0.000000e+00> : vector<1xf32>
    %161 = vector.multi_reduction <add>, %158, %cst_72 [1] : vector<1x128xf32> to vector<1xf32>
    %162 = vector.shape_cast %161 : vector<1xf32> to vector<1x1xf32>
    %cst_73 = arith.constant 1.280000e+02 : f32
    %163 = vector.broadcast %cst_73 : f32 to vector<1x1xf32>
    %164 = arith.divf %162, %163 : vector<1x1xf32>
    %165 = vector.broadcast %164 : vector<1x1xf32> to vector<1x128xf32>
    %166 = arith.subf %158, %165 : vector<1x128xf32>
    %167 = arith.mulf %166, %166 : vector<1x128xf32>
    %cst_74 = arith.constant dense<0.000000e+00> : vector<1xf32>
    %168 = vector.multi_reduction <add>, %167, %cst_74 [1] : vector<1x128xf32> to vector<1xf32>
    %169 = vector.shape_cast %168 : vector<1xf32> to vector<1x1xf32>
    %cst_75 = arith.constant 1.280000e+02 : f32
    %170 = vector.broadcast %cst_75 : f32 to vector<1x1xf32>
    %171 = arith.divf %169, %170 : vector<1x1xf32>
    %172 = vector.broadcast %164 : vector<1x1xf32> to vector<1x128xf32>
    %173 = arith.subf %158, %172 : vector<1x128xf32>
    %cst_76 = arith.constant 9.99999974E-6 : f32
    %174 = vector.broadcast %cst_76 : f32 to vector<1x1xf32>
    %175 = arith.addf %171, %174 : vector<1x1xf32>
    %176 = math.rsqrt %175 : vector<1x1xf32>
    %177 = vector.broadcast %176 : vector<1x1xf32> to vector<1x128xf32>
    %178 = arith.mulf %173, %177 : vector<1x128xf32>
    %179 = arith.mulf %178, %159 : vector<1x128xf32>
    %180 = arith.addf %179, %160 : vector<1x128xf32>
    %181 = arith.truncf %180 : vector<1x128xf32> to vector<1x128xbf16>
    %c0_77 = arith.constant 0 : index
    %c0_78 = arith.constant 0 : index
    %182 = vector.load %arg18[%c0_77, %c0_78] : memref<128x128xbf16, #tpu.memory_space<vmem>>, vector<128x128xbf16>
    %cst_79 = arith.constant dense<0.000000e+00> : vector<1x128xf32>
    %183 = tpu.matmul %181, %182, %cst_79 {dimension_numbers = #tpu.dot_dimension_numbers<[1], [0], [0], [1], [0, 0, 1, 1], [], []>} : vector<1x128xbf16>, vector<128x128xbf16>, vector<1x128xf32> -> vector<1x128xf32>
    %184 = arith.mulf %183, %183 : vector<1x128xf32>
    %cst_80 = arith.constant dense<0.000000e+00> : vector<1xf32>
    %185 = vector.multi_reduction <add>, %184, %cst_80 [1] : vector<1x128xf32> to vector<1xf32>
    %186 = vector.shape_cast %185 : vector<1xf32> to vector<1x1xf32>
    %cst_81 = arith.constant 9.99999996E-13 : f32
    %187 = vector.broadcast %cst_81 : f32 to vector<1x1xf32>
    %188 = arith.maximumf %186, %187 : vector<1x1xf32>
    %189 = math.rsqrt %188 : vector<1x1xf32>
    %190 = vector.broadcast %189 : vector<1x1xf32> to vector<1x128xf32>
    %191 = arith.mulf %183, %190 : vector<1x128xf32>
    %c0_82 = arith.constant 0 : index
    %c0_83 = arith.constant 0 : index
    %c0_84 = arith.constant 0 : index
    %192 = vector.load %arg19[%c0_82, %c0_83, %c0_84] : memref<1x1x128xf32, #tpu.memory_space<vmem>>, vector<1x1x128xf32>
    %193 = vector.shape_cast %192 : vector<1x1x128xf32> to vector<1x128xf32>
    %194 = vector.shape_cast %191 : vector<1x128xf32> to vector<1x1x128xf32>
    tpu.vector_store %arg19[%c0_82, %c0_83, %c0_84], %194 {strides = array<i32>} : memref<1x1x128xf32, #tpu.memory_space<vmem>>, vector<1x1x128xf32>,
    return
  }
  func.func @transform_0(%arg0: i32, %arg1: memref<10xi32, #tpu.memory_space<smem>>) -> (i32, i32, i32) {
    %c0_i32 = arith.constant 0 : i32
    %c0_i32_0 = arith.constant 0 : i32
    %c0_i32_1 = arith.constant 0 : i32
    return %arg0, %c0_i32, %c0_i32_0 : i32, i32, i32
  }
  func.func @transform_1(%arg0: i32, %arg1: memref<10xi32, #tpu.memory_space<smem>>) -> (i32, i32) {
    %c0_i32 = arith.constant 0 : i32
    %c0_i32_0 = arith.constant 0 : i32
    %c0_i32_1 = arith.constant 0 : i32
    return %c0_i32, %c0_i32_0 : i32, i32
  }
  func.func @transform_2(%arg0: i32, %arg1: memref<10xi32, #tpu.memory_space<smem>>) -> (i32, i32, i32) {
    %c0_i32 = arith.constant 0 : i32
    %c0_i32_0 = arith.constant 0 : i32
    %c0_i32_1 = arith.constant 0 : i32
    %c0_i32_2 = arith.constant 0 : i32
    return %c0_i32, %c0_i32_0, %c0_i32_1 : i32, i32, i32
  }
  func.func @transform_3(%arg0: i32, %arg1: memref<10xi32, #tpu.memory_space<smem>>) -> (i32, i32, i32) {
    %c0_i32 = arith.constant 0 : i32
    %c0_i32_0 = arith.constant 0 : i32
    %c0_i32_1 = arith.constant 0 : i32
    %c0_i32_2 = arith.constant 0 : i32
    return %c0_i32, %c0_i32_0, %c0_i32_1 : i32, i32, i32
  }
  func.func @transform_4(%arg0: i32, %arg1: memref<10xi32, #tpu.memory_space<smem>>) -> (i32, i32, i32) {
    %c0_i32 = arith.constant 0 : i32
    %c0_i32_0 = arith.constant 0 : i32
    %c0_i32_1 = arith.constant 0 : i32
    %c0_i32_2 = arith.constant 0 : i32
    return %c0_i32, %c0_i32_0, %c0_i32_1 : i32, i32, i32
  }
  func.func @transform_5(%arg0: i32, %arg1: memref<10xi32, #tpu.memory_space<smem>>) -> (i32, i32, i32) {
    %c0_i32 = arith.constant 0 : i32
    %c0_i32_0 = arith.constant 0 : i32
    %c0_i32_1 = arith.constant 0 : i32
    %c0_i32_2 = arith.constant 0 : i32
    return %c0_i32, %c0_i32_0, %c0_i32_1 : i32, i32, i32
  }
  func.func @transform_6(%arg0: i32, %arg1: memref<10xi32, #tpu.memory_space<smem>>) -> (i32, i32, i32) {
    %c0_i32 = arith.constant 0 : i32
    %c0_i32_0 = arith.constant 0 : i32
    %c0_i32_1 = arith.constant 0 : i32
    %c0_i32_2 = arith.constant 0 : i32
    return %c0_i32, %c0_i32_0, %c0_i32_1 : i32, i32, i32
  }
  func.func @transform_7(%arg0: i32, %arg1: memref<10xi32, #tpu.memory_space<smem>>) -> (i32, i32, i32) {
    %c0_i32 = arith.constant 0 : i32
    %c0_i32_0 = arith.constant 0 : i32
    %c0_i32_1 = arith.constant 0 : i32
    %c0_i32_2 = arith.constant 0 : i32
    return %c0_i32, %c0_i32_0, %c0_i32_1 : i32, i32, i32
  }
  func.func @transform_8(%arg0: i32, %arg1: memref<10xi32, #tpu.memory_space<smem>>) -> (i32, i32, i32) {
    %c0_i32 = arith.constant 0 : i32
    %c0_i32_0 = arith.constant 0 : i32
    %c0_i32_1 = arith.constant 0 : i32
    %c0_i32_2 = arith.constant 0 : i32
    return %c0_i32, %c0_i32_0, %c0_i32_1 : i32, i32, i32
  }
  func.func @transform_9(%arg0: i32, %arg1: memref<10xi32, #tpu.memory_space<smem>>) -> (i32, i32, i32) {
    %c0_i32 = arith.constant 0 : i32
    %c0_i32_0 = arith.constant 0 : i32
    %c0_i32_1 = arith.constant 0 : i32
    %c0_i32_2 = arith.constant 0 : i32
    return %c0_i32, %c0_i32_0, %c0_i32_1 : i32, i32, i32
  }
  func.func @transform_10(%arg0: i32, %arg1: memref<10xi32, #tpu.memory_space<smem>>) -> (i32, i32, i32) {
    %c0_i32 = arith.constant 0 : i32
    %c0_i32_0 = arith.constant 0 : i32
    %c0_i32_1 = arith.constant 0 : i32
    %c0_i32_2 = arith.constant 0 : i32
    return %c0_i32, %c0_i32_0, %c0_i32_1 : i32, i32, i32
  }
  func.func @transform_11(%arg0: i32, %arg1: memref<10xi32, #tpu.memory_space<smem>>) -> (i32, i32, i32) {
    %c0_i32 = arith.constant 0 : i32
    %c0_i32_0 = arith.constant 0 : i32
    %c0_i32_1 = arith.constant 0 : i32
    %c0_i32_2 = arith.constant 0 : i32
    return %c0_i32, %c0_i32_0, %c0_i32_1 : i32, i32, i32
  }
  func.func @transform_12(%arg0: i32, %arg1: memref<10xi32, #tpu.memory_space<smem>>) -> (i32, i32, i32) {
    %c0_i32 = arith.constant 0 : i32
    %c0_i32_0 = arith.constant 0 : i32
    %c0_i32_1 = arith.constant 0 : i32
    %c0_i32_2 = arith.constant 0 : i32
    return %c0_i32, %c0_i32_0, %c0_i32_1 : i32, i32, i32
  }
  func.func @transform_13(%arg0: i32, %arg1: memref<10xi32, #tpu.memory_space<smem>>) -> (i32, i32, i32) {
    %c0_i32 = arith.constant 0 : i32
    %c0_i32_0 = arith.constant 0 : i32
    %c0_i32_1 = arith.constant 0 : i32
    %c0_i32_2 = arith.constant 0 : i32
    return %c0_i32, %c0_i32_0, %c0_i32_1 : i32, i32, i32
  }
  func.func @transform_14(%arg0: i32, %arg1: memref<10xi32, #tpu.memory_space<smem>>) -> (i32, i32) {
    %c0_i32 = arith.constant 0 : i32
    %c0_i32_0 = arith.constant 0 : i32
    %c0_i32_1 = arith.constant 0 : i32
    return %c0_i32, %c0_i32_0 : i32, i32
  }
  func.func @transform_15(%arg0: i32, %arg1: memref<10xi32, #tpu.memory_space<smem>>) -> (i32, i32) {
    %c0_i32 = arith.constant 0 : i32
    %c0_i32_0 = arith.constant 0 : i32
    %c0_i32_1 = arith.constant 0 : i32
    return %c0_i32, %c0_i32_0 : i32, i32
  }
  func.func @transform_16(%arg0: i32, %arg1: memref<10xi32, #tpu.memory_space<smem>>) -> (i32, i32) {
    %c0_i32 = arith.constant 0 : i32
    %c0_i32_0 = arith.constant 0 : i32
    %c0_i32_1 = arith.constant 0 : i32
    return %c0_i32, %c0_i32_0 : i32, i32
  }
  func.func @transform_17(%arg0: i32, %arg1: memref<10xi32, #tpu.memory_space<smem>>) -> (i32, i32, i32) {
    %c0_i32 = arith.constant 0 : i32
    %c0_i32_0 = arith.constant 0 : i32
    %c0_i32_1 = arith.constant 0 : i32
    return %arg0, %c0_i32, %c0_i32_0 : i32, i32, i32
  }
}

</mosaic_0001>

<bundles_post_ra>
// kernel: clip_forward.5
= control target key start
LH: loop header
LB: loop body
LE: loop exit
PB: predicated region body
PF: predicated region fallthrough
CT: control target
= control target key end

     0   :  { %12 = vsyncpa [#allocation4], 0  ;;  %s236_s0 = inlined_call_operand.<no memory space> [shape: f32[1], index: 0, kind: input, shape index: {}]   ;;  %s237_s1 = inlined_call_operand.vmem [shape: f32[2,128], index: 1, kind: input, shape index: {}]   ;;  %s238_s2 = inlined_call_operand.vmem [shape: f32[6,128], index: 2, kind: input, shape index: {}]   ;;  %s239_s3 = inlined_call_operand.vmem [shape: f32[4,128], index: 3, kind: input, shape index: {}]   ;;  %s240_s4 = inlined_call_operand.hbm [shape: f32[2,3], index: 4, kind: output, shape index: {0}]   ;;  %s241_s5 = inlined_call_operand.hbm [shape: f32[1,1], index: 5, kind: output, shape index: {1}]  }
   0x1   :  { %v55_v0 = vld [vmem:[%s239_s3] sm:$0xf] }
   0x2   :  { %v24_v1 = vld [vmem:[%s238_s2] sm:$0x3f]  ;;  %71 = vmatpush.xpose.msra.mxu1 %v55_v0 }
   0x3   :  { %40 = vmatpush.xpose.msra.mxu0 %v24_v1  ;;  %v23_v2 = vld [vmem:[%s237_s1] sm:$0x3] }
   0x4   :  { %13 = vsyncpa [#allocation6], 0  ;;  %v76_v3 = vlaneseq  ;;  %v45_v6 = vstv %s236_s0  ;;  %vm47_vm1 = vcmask 16384   ;;  %vm83_vm2 = vcmask 27648   ;;  %s185_s1 = smov 125   ;;  %s186_s0 = smov [#allocation5]  }
   0x5   :  { %72 = vmatmul.f32.vlgmr.msra.gmra.mxu1 %v55_v0  ;;  %vm87_vm3 = vcmask 1043456   ;;  %s114_s2 = sshll.u32 %s186_s0, 4  ;;  %s116_s27 = sshll.u32 %s241_s5, 4  ;;  %vm96_vm4 = vcmask 0   ;;  %vm53_vm5 = vcmask 17409   ;;  %s115_s2 = int_to_ptr.vmem [resolvable:$true] %s114_s2  ;;  %s117_s27 = int_to_ptr.hbm [resolvable:$true] %s116_s27 }
   0x6   :  { %41 = vmatmul.f32.vlgmr.msra.gmra.mxu0 %v23_v2  ;;  %v77_v4 = vshrl.u32 %v76_v3, 7  ;;  %v79_v5 = vand.u32 127, %v76_v3  ;;  %s187_s28 = smov [#allocation3]   ;;  %s105_s7 = sshll.u32 %s240_s4, 4  ;;  %s106_s7 = int_to_ptr.hbm [resolvable:$true] %s105_s7 }
   0x7   :  { %s103_s29 = sshll.u32 %s187_s28, 4  ;;  %s104_s29 = int_to_ptr.vmem [resolvable:$true] %s103_s29 }
   0x8   :  { %vm80_vm0 = vcmp.eq.s32.totalorder %v77_v4, %v79_v5 }
  0x82   :  { %v73_v7 = vpop.f32.mrf.mxu1 }
  0x83   :  { %v42_v8 = vpop.f32.mrf.mxu0  ;;  %v81_v9 = vand.u32 2147483647, %v73_v7 }
  0x84   :  { %v46_v10 = vmul.f32 %v45_v6, %v42_v8 }
  0x85   :  { %v82_v11 = vsel %vm80_vm0, 0.0, %v81_v9 }
  0x86   :  { %48 = vst.msk [vmem:[#allocation3] sm:$0x1] %vm47_vm1, %v46_v10  ;;  %v84_v12 = vsel %vm83_vm2, %v82_v11, 0.0 }
  0x87   :  { %85 = vadd.xlane.f32.xlu0 %v84_v12 }
  0x9b   :  { %50 = vrot.lane.b32.xlu0 %v46_v10, %s185_s1 }
  0xfa   :  { %v86_v13 = vpop.xlane.xlu0 %85 }
  0xfb   :  { %v88_v14 = vsel %vm87_vm3, %v86_v13, 0.0 }
  0xfc   :  { %v89_v15 = vrot.slane %v88_v14, 4 }
  0xfe   :  { %v90_v16 = vadd.f32 %v89_v15, %v88_v14 }
 0x100   :  { %v91_v17 = vrot.slane %v90_v16, 2 }
 0x102   :  { %v92_v18 = vadd.f32 %v91_v17, %v90_v16 }
 0x104   :  { %v93_v19 = vrot.slane %v92_v18, 1 }
 0x106   :  { %v94_v20 = vadd.f32 %v93_v19, %v92_v18 }
 0x108   :  { %v95_v21 = vmul.f32 0.083333336, %v94_v20 }
 0x10a   :  { %97 = vst.msk [vmem:[#allocation5] sm:$0x1] %vm96_vm4, %v95_v21 }
 0x10b   :  { %119 = dma.vmem_to_hbm [thread:$0]  %s115_s2, 16, %s117_s27, [#allocation6]  }
 0x10d   :  { %v51_v22 = vpop.permute.xlu0 %50 }
 0x10e   :  { %54 = vst.msk [vmem:[#allocation3] sm:$0x2] %vm53_vm5, %v51_v22 }
 0x10f   :  { %108 = dma.vmem_to_hbm [thread:$0]  %s104_s29, 32, %s106_s7, [#allocation4]  }
 0x110   :  { %181 = dma.done.wait [#allocation4], 32  }
 0x111   :  { %182 = vsyncadd [#allocation4], 4294967264 }
 0x112   :  { %183 = dma.done.wait [#allocation6], 16  }
 0x113   :  { %184 = vsyncadd [#allocation6], 4294967280 }
 0x114   :  { %128 = vsyncpa [#allocation4], 1 }
 0x115   :  { %129 = vsyncpa [#allocation6], 1 }

// kernel: clip_forward.3
= control target key start
LH: loop header
LB: loop body
LE: loop exit
PB: predicated region body
PF: predicated region fallthrough
CT: control target
= control target key end

     0   :  { %s3856_s0 = inlined_call_operand.vmem [shape: f32[2,5,192], index: 0, kind: input, shape index: {}]   ;;  %s3857_s1 = inlined_call_operand.hbm [shape: bf16[192,128], index: 1, kind: input, shape index: {}]   ;;  %s3858_s2 = inlined_call_operand.vmem [shape: f32[5,128], index: 2, kind: input, shape index: {}]   ;;  %s3859_s3 = inlined_call_operand.vmem [shape: f32[1,128], index: 3, kind: input, shape index: {}]   ;;  %s3860_s4 = inlined_call_operand.vmem [shape: f32[1,128], index: 4, kind: input, shape index: {}]   ;;  %s3861_s5 = inlined_call_operand.vmem [shape: f32[1,1,128], index: 5, kind: input, shape index: {}]   ;;  %s3862_s6 = inlined_call_operand.vmem [shape: f32[1,1,128], index: 6, kind: input, shape index: {}]   ;;  %s3863_s7 = inlined_call_operand.vmem [shape: bf16[1,128,384], index: 7, kind: input, shape index: {}]   ;;  %s3864_s8 = inlined_call_operand.vmem [shape: f32[1,1,384], index: 8, kind: input, shape index: {}]   ;;  %s3865_s9 = inlined_call_operand.hbm [shape: bf16[1,128,128], index: 9, kind: input, shape index: {}]   ;;  %s3866_s10 = inlined_call_operand.vmem [shape: f32[1,1,128], index: 10, kind: input, shape index: {}]   ;;  %s3867_s11 = inlined_call_operand.vmem [shape: f32[1,1,128], index: 11, kind: input, shape index: {}]   ;;  %s3868_s12 = inlined_call_operand.vmem [shape: f32[1,1,128], index: 12, kind: input, shape index: {}]   ;;  %s3869_s13 = inlined_call_operand.vmem [shape: bf16[1,128,512], index: 13, kind: input, shape index: {}]   ;;  %s3870_s14 = inlined_call_operand.vmem [shape: f32[1,1,512], index: 14, kind: input, shape index: {}]   ;;  %s3871_s15 = inlined_call_operand.vmem [shape: bf16[1,512,128], index: 15, kind: input, shape index: {}]   ;;  %s3872_s16 = inlined_call_operand.vmem [shape: f32[1,1,128], index: 16, kind: input, shape index: {}]   ;;  %s3873_s17 = inlined_call_operand.vmem [shape: f32[1,128], index: 17, kind: input, shape index: {}]   ;;  %s3874_s18 = inlined_call_operand.vmem [shape: f32[1,128], index: 18, kind: input, shape index: {}]   ;;  %s3875_s19 = inlined_call_operand.hbm [shape: bf16[128,128], index: 19, kind: input, shape index: {}]   ;;  %s3876_s20 = inlined_call_operand.vmem [shape: f32[4,128], index: 20, kind: input, shape index: {}]   ;;  %s3877_s21 = inlined_call_operand.vmem [shape: f32[2,1,128], index: 21, kind: output, shape index: {0}]   ;;  %s3878_s22 = inlined_call_operand.vmem [shape: f32[2,1,4], index: 22, kind: output, shape index: {1}]  }
   0x1   :  { %3880 = sst [smem:[#allocation10_spill]] %s3856_s0 }
   0x2   :  { %3881 = sst [smem:[#allocation11_spill]] %s3857_s1 }
   0x3   :  { %3882 = sst [smem:[#allocation12_spill]] %s3858_s2 }
   0x4   :  { %3883 = sst [smem:[#allocation13_spill]] %s3859_s3 }
   0x5   :  { %3884 = sst [smem:[#allocation14_spill]] %s3860_s4 }
   0x6   :  { %3885 = sst [smem:[#allocation15_spill]] %s3861_s5 }
   0x7   :  { %3886 = sst [smem:[#allocation16_spill]] %s3862_s6 }
   0x8   :  { %3887 = sst [smem:[#allocation17_spill]] %s3865_s9 }
   0x9   :  { %28 = vsyncpa [#allocation3], 0 }
   0xa   :  { %29 = vsyncpa [#allocation5], 0  ;;  %s3252_s3 = smov 0  }
   0xb LB: > { %3888 = sst [smem:[#allocation9_spill]] %s3127_s3  ;;  %s3258_s28 = sadd.s32 4294967295, %s3127_s3   ;;  %s3127_s3 = sphi %s3252_s3, %s35_s3  }
   0xc   : > { %p2328_p0 = scmp.ge.s32.totalorder %s3127_s3, 1  ;;  %p538_p1 = scmp.lt.s32.totalorder %s3127_s3, 3 }
   0xd   : > { %p2955_p2 = scmp.eq.s32.totalorder %s3258_s28, 0  ;;  %s3889_s9 = sld [smem:[#allocation17_spill]] }
   0xe   : > { %p3266_p3 = pnand %p2328_p0, %p538_p1  ;;  %s3891_s5 = sld [smem:[#allocation11_spill]] }
   0xf   : > { %s3129_s6 = smov [#allocation4]   ;;  %s3130_s26 = smov [#allocation2]  }
  0x10   : > { %p2945_p4 = pneg %p3266_p3  ;;  %s586_s25 = sshll.u32 %s3129_s6, 4  ;;  %s587_s25 = int_to_ptr.vmem [resolvable:$true] %s586_s25 }
  0x11   : > { %s551_s2 = sshll.u32 %s3130_s26, 4  ;;  %s625_s30 = sshll.u32 %s3875_s19, 4  ;;  %s552_s2 = int_to_ptr.vmem [resolvable:$true] %s551_s2  ;;  %s626_s30 = int_to_ptr.hbm [resolvable:$true] %s625_s30 }
  0x12   : > { %p2946_p5 = pnand %p2955_p2, %p2945_p4  ;;  %s3132_s3 = smov 4  }
  0x13   : > { %s584_s4 = sshll.u32 %s3889_s9, 4  ;;  %s3131_s9 = smov 64   ;;  %s585_s4 = int_to_ptr.hbm [resolvable:$true] %s584_s4 }
  0x14   : > { %s549_s24 = sshll.u32 %s3891_s5, 4  ;;  %s3133_s23 = smov [#allocation6]   ;;  %s550_s24 = int_to_ptr.hbm [resolvable:$true] %s549_s24 }
  0x15   : > { %2951 = dma.hbm_to_vmem [thread:$0]  (!%p2946_p5), %s585_s4, 1024, %s587_s25, [#allocation5], %s3131_s9, %s3131_s9, %s3132_s3  }
  0x16   : > { %2948 = dma.hbm_to_vmem [thread:$0]  (!%p2946_p5), %s550_s24, 1536, %s552_s2, [#allocation3], %s3131_s9, %s3131_s9, %s3132_s3  }
  0x17   : > { %s627_s1 = sshll.u32 %s3133_s23, 4  ;;  %654 = sbr.rel (%p3266_p3) target bundleno = 2864 (0xb30), region = 104  ;;  %s628_s1 = int_to_ptr.vmem [resolvable:$true] %s627_s1 }
  0x18   : > { %2954 = dma.hbm_to_vmem [thread:$0]  (!%p2946_p5), %s626_s30, 1024, %s628_s1, [#allocation5], %s3131_s9, %s3131_s9, %s3132_s3  }
  0x1c   : > { %3118 = dma.done.wait (%p2955_p2), [#allocation3], 1536  }
  0x1d   : > { %3120 = vsyncadd (%p2955_p2), [#allocation3], 4294965760 }
  0x1e   : > { %3122 = dma.done.wait (%p2955_p2), [#allocation5], 2048  }
  0x1f   : > { %3124 = vsyncadd (%p2955_p2), [#allocation5], 4294965248  ;;  %p728_p6 = scmp.lt.s32.totalorder %s3258_s28, 1  ;;  %v2824_v0 = vld [vmem:[#allocation2 + $0x38] sm:$0xff]  ;;  %v2823_v2 = vld [vmem:[#allocation2 + $0x30] sm:$0xff]  ;;  %s3892_s0 = sld [smem:[#allocation10_spill]] }
  0x20   : > { %v2828_v1 = vld [vmem:[#allocation2 + $0x58] sm:$0xff]  ;;  %845 = vmatpush.bf16.msra.mxu0 %v2824_v0  ;;  %v2827_v3 = vld [vmem:[#allocation2 + $0x50] sm:$0xff]  ;;  %v2822_v4 = vld [vmem:[#allocation2 + $0x28] sm:$0xff]  ;;  %vm841_vm0 = vcmask 523264   ;;  %s3893_s25 = sld [smem:[#allocation12_spill]]  ;;  %vm873_vm1 = vcmask 1044480  }
  0x21   : > { %s3900_s28 = smov (!%p728_p6, %s3258_s28), 1  ;;  %862 = vmatpush.bf16.msra.mxu1 %v2828_v1  ;;  %v2826_v5 = vld [vmem:[#allocation2 + $0x48] sm:$0xff]  ;;  %v2821_v6 = vld [vmem:[#allocation2 + $0x20] sm:$0xff]  ;;  %v2820_v9 = vld [vmem:[#allocation2 + $0x18] sm:$0xff]  ;;  %v3134_v24 = vmov 128.0   ;;  %s3894_s27 = sld [smem:[#allocation13_spill]] }
  0x22   : > { %s2816_s9 = sshll.u32 %s3900_s28, 4  ;;  %v2825_v7 = vld [vmem:[#allocation2 + $0x40] sm:$0xff]  ;;  %v2819_v11 = vld [vmem:[#allocation2 + $0x10] sm:$0xff]  ;;  %v2818_v12 = vld [vmem:[#allocation2 + $0x8] sm:$0xff]  ;;  %2985 = vrcp.f32 %v3134_v24  ;;  %s3895_s23 = sld [smem:[#allocation14_spill]]  ;;  %vm1206_vm9 = vcmask 1041408  }
  0x23   : > { %v2817_v13 = vld [vmem:[#allocation2] sm:$0xff]  ;;  %v2474_v52 = vld [vmem:[%s3863_s7 + $0xa8] sm:$0xf]  ;;  %v2851_v53 = vld [vmem:[%s3863_s7 + $0xb0] sm:$0xf0]  ;;  %vm1207_vm10 = vcmask 1042432   ;;  %s735_s1 = scalar_lea.vmem %s3877_s21, %s3900_s28  ;;  %s738_s4 = scalar_lea.vmem %s3878_s22, %s3900_s28 }
  0x24   : > { %846 = vmatpush.bf16.msra.mxu0 %v2823_v2  ;;  %v2850_v54 = vld [vmem:[%s3863_s7 + $0xac] sm:$0xf]  ;;  %v2475_v55 = vor.u32 %v2851_v53, %v2474_v52  ;;  %v2476_v56 = vld [vmem:[%s3863_s7 + $0xb4] sm:$0xf0]  ;;  %v2482_v57 = vld [vmem:[%s3863_s7 + $0xb0] sm:$0xf] }
  0x25   : > { %863 = vmatpush.bf16.msra.mxu1 %v2827_v3  ;;  %s732_s5 = scalar_lea.vmem %s3892_s0, %s2816_s9  ;;  %v2852_v58 = vld [vmem:[%s3863_s7 + $0xb8] sm:$0xf0]  ;;  %v2479_v59 = vor.u32 %v2850_v54, %v2476_v56  ;;  %v2462_v2 = vld [vmem:[%s3863_s7 + $0x90] sm:$0xf]  ;;  %v2404_v53 = vld [vmem:[%s3863_s7 + $0x24] sm:$0xf0] }
  0x26   : > { %v741_v8 = vld [vmem:[%s732_s5 + $0x8] sm:$0x1f]  ;;  %v740_v14 = vld [vmem:[%s732_s5] sm:$0x1f]  ;;  %v2483_v60 = vor.u32 %v2852_v58, %v2482_v57  ;;  %1112 = vmatpush.bf16.msra.mxu2 %v2475_v55  ;;  %v2848_v3 = vld [vmem:[%s3863_s7 + $0x98] sm:$0xf0] }
  0x27   : > { %v743_v10 = vpack.c.bf16 %v741_v8, %v741_v8  ;;  %v742_v15 = vpack.c.bf16 %v740_v14, %v740_v14  ;;  %v768_v18 = vld [vmem:[%s3893_s25] sm:$0x1f]  ;;  %1125 = vmatpush.bf16.msra.mxu3 %v2479_v59  ;;  %v2440_v24 = vld [vmem:[%s3863_s7 + $0x6c] sm:$0xf0]  ;;  %v2834_v55 = vld [vmem:[%s3863_s7 + $0x28] sm:$0xf0] }
  0x28   : > { %847 = vmatpush.bf16.msra.mxu0 %v2822_v4  ;;  %v2986_v25 = vpop.eup %2985  ;;  %v2977_v45 = vld [vmem:[%s3894_s27] ss:$0 sm:$0xff]  ;;  %v2847_v4 = vld [vmem:[%s3863_s7 + $0x94] sm:$0xf]  ;;  %v2849_v8 = vld [vmem:[%s3863_s7 + $0xa0] sm:$0xf0] }
  0x29   : > { %864 = vmatpush.bf16.msra.mxu1 %v2826_v5  ;;  %v878_v26 = vmul.f32 128.0, %v2986_v25  ;;  %vm882_vm2 = vweird.f32 %v2986_v25  ;;  %v2978_v48 = vld [vmem:[%s3895_s23] ss:$0 sm:$0xff]  ;;  %v2463_v5 = vor.u32 %v2848_v3, %v2462_v2  ;;  %v2830_v59 = vld [vmem:[%s3863_s7 + $0x8] sm:$0xf0]  ;;  %s3896_s25 = sld [smem:[#allocation15_spill]] }
  0x2a   : > { %v2410_v54 = vld [vmem:[%s3863_s7 + $0x20] sm:$0xf]  ;;  %s3897_s27 = sld [smem:[#allocation16_spill]]  ;;  %s3136_s23 = smov 64   ;;  %vm1188_vm11 = vcmask 36864   ;;  %vm1202_vm12 = vcmask 39936  }
  0x2b   : > { %v879_v27 = vsub.f32 1.0, %v878_v26  ;;  %1113 = vmatpush.bf16.msra.mxu2 %v2463_v5  ;;  %v2843_v26 = vld [vmem:[%s3863_s7 + $0x70] sm:$0xf0]  ;;  %v2411_v57 = vor.u32 %v2834_v55, %v2410_v54  ;;  %v2390_v58 = vld [vmem:[%s3863_s7] sm:$0xf] }
  0x2c   : > { %848 = vmatpush.bf16.msra.mxu0 %v2821_v6  ;;  %v2464_v6 = vld [vmem:[%s3863_s7 + $0x9c] sm:$0xf0] }
  0x2d   : > { %865 = vmatpush.bf16.msra.mxu1 %v2825_v7  ;;  %v880_v28 = vmul.f32 %v2986_v25, %v879_v27  ;;  %v2470_v7 = vld [vmem:[%s3863_s7 + $0x98] sm:$0xf] }
  0x2f   : > { %v881_v29 = vadd.f32 %v2986_v25, %v880_v28 }
  0x30   : > { %849 = vmatpush.bf16.msra.mxu0 %v2820_v9  ;;  %2387 = vmatmul.msk.bf16.vlgmr.msra.gmra.mxu1 %vm841_vm0, %v743_v10  ;;  %v2467_v9 = vor.u32 %v2847_v4, %v2464_v6  ;;  %v2471_v10 = vor.u32 %v2849_v8, %v2470_v7 }
  0x31   : > { %v3303_v30 = vsel %vm882_vm2, %v2986_v25, %v881_v29  ;;  %1138 = vmatpush.bf16.msrb.mxu1 %v2483_v60  ;;  %v2446_v25 = vld [vmem:[%s3863_s7 + $0x68] sm:$0xf]  ;;  %v2829_v60 = vld [vmem:[%s3863_s7 + $0x4] sm:$0xf] }
  0x32   : > { %1126 = vmatpush.bf16.msra.mxu3 %v2467_v9  ;;  %v2447_v28 = vor.u32 %v2843_v26, %v2446_v25  ;;  %v2426_v29 = vld [vmem:[%s3863_s7 + $0x48] sm:$0xf] }
  0x34   : > { %850 = vmatpush.bf16.msra.mxu0 %v2819_v11  ;;  %v2450_v11 = vld [vmem:[%s3863_s7 + $0x78] sm:$0xf] }
  0x35   : > { %1139 = vmatpush.bf16.msrb.mxu1 %v2471_v10 }
  0x38   : > { %851 = vmatpush.bf16.msra.mxu0 %v2818_v12  ;;  %v2845_v12 = vld [vmem:[%s3863_s7 + $0x80] sm:$0xf0] }
  0x39   : > { %v2451_v14 = vor.u32 %v2845_v12, %v2450_v11 }
  0x3b   : > { %1114 = vmatpush.bf16.msra.mxu2 %v2451_v14 }
  0x3c   : > { %852 = vmatpush.bf16.msra.mxu0 %v2817_v13  ;;  %v2844_v13 = vld [vmem:[%s3863_s7 + $0x7c] sm:$0xf] }
  0x3f   : > { %853 = vmatmul.bf16.vlgmr.msra.gmra.mxu0 %v742_v15  ;;  %v2452_v15 = vld [vmem:[%s3863_s7 + $0x84] sm:$0xf0] }
  0xad   : > { %v867_v16 = vpop.f32.mrf.mxu1 }
  0xb5   : > { %v869_v17 = vpop.f32.mrf.mxu1 }
  0xb6   : > { %v2846_v17 = vld [vmem:[%s3863_s7 + $0x88] sm:$0xf0] }
  0xbc   : > { %v854_v19 = vpop.f32.mrf.mxu0 }
  0xbd   : > { %v855_v20 = vadd.f32 %v854_v19, %v768_v18  ;;  %v2455_v18 = vor.u32 %v2844_v13, %v2452_v15  ;;  %v2979_v13 = vld [vmem:[%s3896_s25] ss:$0 sm:$0xff] }
  0xbf   : > { %v868_v21 = vadd.f32 %v867_v16, %v855_v20  ;;  %v2458_v16 = vld [vmem:[%s3863_s7 + $0x80] sm:$0xf]  ;;  %1127 = vmatpush.bf16.msra.mxu3 %v2455_v18 }
  0xc0   : > { %v2459_v19 = vor.u32 %v2846_v17, %v2458_v16  ;;  %v2438_v20 = vld [vmem:[%s3863_s7 + $0x60] sm:$0xf] }
  0xc1   : > { %v874_v22 = vsel %vm873_vm1, %v868_v21, 0.0  ;;  %v2980_v16 = vld [vmem:[%s3897_s27] ss:$0 sm:$0xff] }
  0xc2   : > { %875 = vadd.xlane.f32.xlu0 %v874_v22  ;;  %1140 = vmatpush.bf16.msrb.mxu1 %v2459_v19  ;;  %v2841_v22 = vld [vmem:[%s3863_s7 + $0x64] sm:$0xf] }
  0xc3   : > { %v2443_v27 = vor.u32 %v2841_v22, %v2440_v24  ;;  %v3135_v22 = vmov 65535  }
  0xc4   : > { %v856_v23 = vpop.f32.mrf.mxu0 }
  0xc5   : > { %1128 = vmatpush.bf16.msra.mxu3 %v2443_v27 }
  0xc6   : > { %1141 = vmatpush.bf16.msrb.mxu1 %v2447_v28 }
 0x135   : > { %v876_v31 = vpop.xlane.xlu0 %875 }
 0x136   : > { %v884_v32 = vmul.f32 %v3303_v30, %v876_v31  ;;  %v2839_v31 = vld [vmem:[%s3863_s7 + $0x50] sm:$0xf0] }
 0x138   : > { %v885_v33 = vsub.f32 %v868_v21, %v884_v32  ;;  %v2842_v21 = vld [vmem:[%s3863_s7 + $0x68] sm:$0xf0] }
 0x139   : > { %v2439_v23 = vor.u32 %v2842_v21, %v2438_v20  ;;  %v2838_v32 = vld [vmem:[%s3863_s7 + $0x4c] sm:$0xf]  ;;  %v976_v20 = vld [vmem:[%s3864_s8] sm:$0x7] }
 0x13a   : > { %v886_v34 = vmul.f32 %v885_v33, %v885_v33  ;;  %v980_v21 = vperm.slane %v976_v20, 2  ;;  %v979_v25 = vperm.slane %v976_v20, 1 }
 0x13b   : > { %1115 = vmatpush.bf16.msra.mxu2 %v2439_v23  ;;  %v1208_v23 = vsel %vm1206_vm9, 4294967295, %v3135_v22 }
 0x13c   : > { %v887_v35 = vsel %vm873_vm1, %v886_v34, 0.0  ;;  %v2428_v34 = vld [vmem:[%s3863_s7 + $0x54] sm:$0xf0]  ;;  %v1209_v26 = vsel %vm1207_vm10, %v1208_v23, 0 }
 0x13d   : > { %888 = vadd.xlane.f32.xlu0 %v887_v35  ;;  %v2434_v35 = vld [vmem:[%s3863_s7 + $0x50] sm:$0xf] }
 0x1b0   : > { %v889_v36 = vpop.xlane.xlu0 %888 }
 0x1b1   : > { %v890_v37 = vmul.f32 %v889_v36, %v3303_v30  ;;  %v2840_v36 = vld [vmem:[%s3863_s7 + $0x58] sm:$0xf0] }
 0x1b3   : > { %v891_v38 = vadd.f32 1e-05, %v890_v37  ;;  %v2431_v37 = vor.u32 %v2838_v32, %v2428_v34 }
 0x1b5   : > { %2987 = vrsqrt.f32 %v891_v38  ;;  %vm898_vm4 = vweird.f32 %v891_v38  ;;  %1129 = vmatpush.bf16.msra.mxu3 %v2431_v37 }
 0x1bb   : > { %v2988_v39 = vpop.eup %2987 }
 0x1bc   : > { %v893_v40 = vmul.f32 %v2988_v39, %v891_v38  ;;  %vm899_vm3 = vweird.f32 %v2988_v39  ;;  %v2435_v38 = vor.u32 %v2840_v36, %v2434_v35 }
 0x1bd   : > { %vm900_vm5 = vmor %vm898_vm4, %vm899_vm3 }
 0x1be   : > { %v894_v41 = vmul.f32 %v2988_v39, %v893_v40  ;;  %1142 = vmatpush.bf16.msrb.mxu1 %v2435_v38  ;;  %v2836_v40 = vld [vmem:[%s3863_s7 + $0x38] sm:$0xf0] }
 0x1c0   : > { %v895_v42 = vmul.f32 0.5, %v894_v41  ;;  %v2835_v41 = vld [vmem:[%s3863_s7 + $0x34] sm:$0xf] }
 0x1c2   : > { %v896_v43 = vsub.f32 1.5, %v895_v42 }
 0x1c4   : > { %v897_v44 = vmul.f32 %v2988_v39, %v896_v43  ;;  %v2416_v43 = vld [vmem:[%s3863_s7 + $0x3c] sm:$0xf0] }
 0x1c6   : > { %v901_v46 = vsel %vm900_vm5, %v2988_v39, %v897_v44  ;;  %v2414_v39 = vld [vmem:[%s3863_s7 + $0x30] sm:$0xf]  ;;  %v2422_v44 = vld [vmem:[%s3863_s7 + $0x38] sm:$0xf] }
 0x1c7   : > { %v902_v47 = vmul.f32 %v901_v46, %v885_v33  ;;  %v2427_v33 = vor.u32 %v2839_v31, %v2426_v29  ;;  %v2415_v42 = vor.u32 %v2836_v40, %v2414_v39  ;;  %v2419_v46 = vor.u32 %v2835_v41, %v2416_v43 }
 0x1c9   : > { %v906_v49 = vmul.f32 %v2977_v45, %v902_v47  ;;  %1116 = vmatpush.bf16.msra.mxu2 %v2427_v33  ;;  %v2837_v45 = vld [vmem:[%s3863_s7 + $0x40] sm:$0xf0]  ;;  %1130 = vmatpush.bf16.msra.mxu3 %v2419_v46  ;;  %v978_v33 = vperm.slane %v976_v20, 0 }
 0x1ca   : > { %v2423_v47 = vor.u32 %v2837_v45, %v2422_v44 }
 0x1cb   : > { %v3314_v50 = vadd.f32 %v2978_v48, %v906_v49  ;;  %v2402_v48 = vld [vmem:[%s3863_s7 + $0x18] sm:$0xf]  ;;  %v2833_v49 = vld [vmem:[%s3863_s7 + $0x20] sm:$0xf0] }
 0x1cc   : > { %1143 = vmatpush.bf16.msrb.mxu1 %v2423_v47  ;;  %v2403_v52 = vor.u32 %v2833_v49, %v2402_v48 }
 0x1cd   : > { %v913_v51 = vsel %vm873_vm1, %v3314_v50, 0.0  ;;  %1117 = vmatpush.bf16.msra.mxu2 %v2415_v42 }
 0x1ce   : > { %914 = vadd.xlane.f32.xlu1 %v913_v51  ;;  %v2832_v51 = vld [vmem:[%s3863_s7 + $0x1c] sm:$0xf] }
 0x1cf   : > { %v2407_v56 = vor.u32 %v2832_v51, %v2404_v53 }
 0x1d0   : > { %1144 = vmatpush.bf16.msrb.mxu1 %v2411_v57 }
 0x1d1   : > { %1118 = vmatpush.bf16.msra.mxu2 %v2403_v52  ;;  %1131 = vmatpush.bf16.msra.mxu3 %v2407_v56 }
 0x241   : > { %v915_v61 = vpop.xlane.xlu1 %914 }
 0x242   : > { %v916_v62 = vmul.f32 %v915_v61, %v3303_v30  ;;  %v2391_v61 = vor.u32 %v2830_v59, %v2390_v58 }
 0x244   : > { %v3338_v63 = vsub.f32 %v3314_v50, %v916_v62  ;;  %v2392_v62 = vld [vmem:[%s3863_s7 + $0xc] sm:$0xf0]  ;;  %1119 = vmatpush.bf16.msra.mxu2 %v2391_v61 }
 0x245   : > { %v2395_v2 = vor.u32 %v2829_v60, %v2392_v62 }
 0x246   : > { %v918_v0 = vmul.f32 %v3338_v63, %v3338_v63 }
 0x247   : > { %1132 = vmatpush.bf16.msra.mxu3 %v2395_v2 }
 0x248   : > { %v919_v1 = vsel %vm873_vm1, %v918_v0, 0.0  ;;  %v2398_v0 = vld [vmem:[%s3863_s7 + $0x8] sm:$0xf] }
 0x249   : > { %920 = vadd.xlane.f32.xlu1 %v919_v1  ;;  %v2831_v1 = vld [vmem:[%s3863_s7 + $0x10] sm:$0xf0] }
 0x24a   : > { %v2399_v3 = vor.u32 %v2831_v1, %v2398_v0 }
 0x24c   : > { %1145 = vmatpush.bf16.msrb.mxu1 %v2399_v3 }
 0x2bc   : > { %v921_v4 = vpop.xlane.xlu1 %920 }
 0x2bd   : > { %v922_v5 = vmul.f32 %v921_v4, %v3303_v30  ;;  %v2856_v4 = vld [vmem:[#allocation4 + $0x18] sm:$0xff] }
 0x2bf   : > { %v923_v6 = vadd.f32 1e-05, %v922_v5  ;;  %v2855_v5 = vld [vmem:[#allocation4 + $0x10] sm:$0xff] }
 0x2c1   : > { %2989 = vrsqrt.f32 %v923_v6  ;;  %vm930_vm7 = vweird.f32 %v923_v6 }
 0x2c7   : > { %v2990_v7 = vpop.eup %2989 }
 0x2c8   : > { %v925_v8 = vmul.f32 %v2990_v7, %v923_v6  ;;  %vm931_vm6 = vweird.f32 %v2990_v7  ;;  %v2854_v6 = vld [vmem:[#allocation4 + $0x8] sm:$0xff] }
 0x2c9   : > { %vm932_vm8 = vmor %vm930_vm7, %vm931_vm6 }
 0x2ca   : > { %v926_v9 = vmul.f32 %v2990_v7, %v925_v8 }
 0x2cc   : > { %v927_v10 = vmul.f32 0.5, %v926_v9 }
 0x2ce   : > { %v928_v11 = vsub.f32 1.5, %v927_v10 }
 0x2d0   : > { %v929_v12 = vmul.f32 %v2990_v7, %v928_v11  ;;  %v2853_v11 = vld [vmem:[#allocation4] sm:$0xff] }
 0x2d2   : > { %v933_v14 = vsel %vm932_vm8, %v2990_v7, %v929_v12  ;;  %v2860_v12 = vld [vmem:[#allocation4 + $0x38] sm:$0xff] }
 0x2d3   : > { %v934_v15 = vmul.f32 %v933_v14, %v3338_v63  ;;  %1318 = vmatpush.bf16.msra.mxu1 %v2860_v12  ;;  %v2858_v14 = vld [vmem:[#allocation4 + $0x28] sm:$0xff] }
 0x2d5   : > { %v938_v17 = vmul.f32 %v2979_v13, %v934_v15  ;;  %v2859_v13 = vld [vmem:[#allocation4 + $0x30] sm:$0xff] }
 0x2d7   : > { %v942_v18 = vadd.f32 %v2980_v16, %v938_v17  ;;  %1319 = vmatpush.bf16.msra.mxu1 %v2859_v13  ;;  %v2590_v13 = vld [vmem:[%s3869_s13 + $0x90] sm:$0xf0] }
 0x2d9   : > { %v943_v19 = vpack.c.bf16 %v942_v18, %v942_v18  ;;  %v2857_v18 = vld [vmem:[#allocation4 + $0x20] sm:$0xff] }
 0x2db   : > { %1120 = vmatmul.bf16.vlgmr.msra.gmra.mxu2 %v943_v19  ;;  %1133 = vmatmul.bf16.vlgmr.msra.gmra.mxu3 %v943_v19 }
 0x2dc   : > { %1146 = vmatmul.bf16.vlgmr.msrb.gmra.mxu1 %v943_v19 }
 0x2dd   : > { %1320 = vmatpush.bf16.msra.mxu1 %v2858_v14  ;;  %v2596_v14 = vld [vmem:[%s3869_s13 + $0x88] sm:$0xf] }
 0x2e1   : > { %1321 = vmatpush.bf16.msra.mxu1 %v2857_v18  ;;  %v2878_v18 = vld [vmem:[%s3869_s13 + $0x8c] sm:$0xf] }
 0x359   : > { %v1147_v63 = vpop.f32.mrf.mxu1 }
 0x35a   : > { %v1148_v24 = vadd.f32 %v1147_v63, %v980_v21 }
 0x35c   : > { %v1201_v27 = vpack.c.bf16 %v1148_v24, %v1148_v24 }
 0x35e   : > { %v1121_v28 = vpop.f32.mrf.mxu2  ;;  %v1134_v29 = vpop.f32.mrf.mxu3  ;;  %v1211_v31 = vand.u32 %v1209_v26, %v1201_v27 }
 0x35f   : > { %v1135_v32 = vadd.f32 %v1134_v29, %v979_v25  ;;  %v1122_v37 = vadd.f32 %v1121_v28, %v978_v33  ;;  %v2981_v25 = vld [vmem:[%s3866_s10] ss:$0 sm:$0xff]  ;;  %v2889_v33 = vld [vmem:[%s3869_s13 + $0xe4] sm:$0xf] }
 0x360   : > { %1220 = vmatpush.bf16.msrb.mxu2 %v1211_v31  ;;  %v2636_v31 = vld [vmem:[%s3869_s13 + $0xe0] sm:$0xf] }
 0x361   : > { %v1168_v34 = vpack.c.bf16 %v1135_v32, %v1135_v32  ;;  %v1149_v35 = vpop.f32.mrf.mxu1  ;;  %v1167_v40 = vpack.c.bf16 %v1122_v37, %v1122_v37  ;;  %v2891_v32 = vld [vmem:[%s3869_s13 + $0xec] sm:$0xf0] }
 0x362   : > { %v2644_v35 = vld [vmem:[%s3869_s13 + $0xe8] sm:$0xf] }
 0x363   : > { %1231 = vrot.lane.b32.xlu2 %v1168_v34, %s3136_s23  ;;  %v1173_v36 = vsel %vm841_vm0, %v1168_v34, 0  ;;  %v2638_v34 = vld [vmem:[%s3869_s13 + $0xf0] sm:$0xf0] }
 0x364   : > { %1182 = vmatpush.bf16.xpose.msrb.mxu0 %v1173_v36  ;;  %1358 = vmatpush.bf16.msra.mxu2 %v2856_v4  ;;  %v2892_v36 = vld [vmem:[%s3869_s13 + $0xf4] sm:$0xf0]  ;;  %v2641_v37 = vor.u32 %v2889_v33, %v2638_v34  ;;  %v2871_v34 = vld [vmem:[%s3869_s13 + $0x4c] sm:$0xf0] }
 0x366   : > { %v1123_v38 = vpop.f32.mrf.mxu2  ;;  %v1136_v39 = vpop.f32.mrf.mxu3 }
 0x367   : > { %v2645_v38 = vor.u32 %v2892_v36, %v2644_v35  ;;  %v2890_v39 = vld [vmem:[%s3869_s13 + $0xec] sm:$0xf]  ;;  %v2869_v35 = vld [vmem:[%s3869_s13 + $0x44] sm:$0xf] }
 0x368   : > { %1359 = vmatpush.bf16.msra.mxu2 %v2855_v5 }
 0x369   : > { %1634 = vmatpush.bf16.msrb.mxu1 %v2645_v38  ;;  %v2564_v38 = vld [vmem:[%s3869_s13 + $0x48] sm:$0xf] }
 0x36b   : > { %1228 = vrot.lane.b32.xlu2 %v1167_v40, %s3136_s23  ;;  %2484 = vmatmul.msk.bf16.vlgmr.msrb.gmra.mxu0 %vm841_vm0, %v1167_v40  ;;  %v2646_v40 = vld [vmem:[%s3869_s13 + $0xf8] sm:$0xf0] }
 0x36c   : > { %1360 = vmatpush.bf16.msra.mxu2 %v2854_v6  ;;  %v2882_v6 = vld [vmem:[%s3869_s13 + $0xac] sm:$0xf] }
 0x370   : > { %1361 = vmatpush.bf16.msra.mxu2 %v2853_v11  ;;  %v2877_v11 = vld [vmem:[%s3869_s13 + $0x84] sm:$0xf] }
 0x3bd   : > { %v1232_v41 = vpop.permute.xlu2 %1231 }
 0x3be   : > { %v1237_v42 = vsel %vm841_vm0, %v1232_v41, 0  ;;  %v2649_v41 = vor.u32 %v2890_v39, %v2646_v40  ;;  %v2872_v39 = vld [vmem:[%s3869_s13 + $0x54] sm:$0xf0] }
 0x3bf   : > { %1246 = vmatpush.bf16.xpose.msrb.mxu3 %v1237_v42 }
 0x3c5   : > { %v1229_v43 = vpop.permute.xlu2 %1228 }
 0x3c6   : > { %2486 = vmatmul.msk.bf16.vlgmr.msrb.gmra.mxu3 %vm841_vm0, %v1229_v43 }
 0x3e8   : > { %v1184_v44 = vpop.f32.mrf.mxu0 }
 0x3e9   : > { %v1189_v45 = vsel %vm1188_vm11, %v1184_v44, -inf }
 0x3ea   : > { %1190 = vmax.xlane.f32.xlu0 %v1189_v45 }
 0x3f0   : > { %v1186_v46 = vpop.f32.mrf.mxu0 }
 0x449   : > { %v1248_v47 = vpop.f32.mrf.mxu3 }
 0x44a   : > { %v1252_v48 = vsel %vm1188_vm11, %v1248_v47, -inf }
 0x44b   : > { %1253 = vmax.xlane.f32.xlu1 %v1252_v48  ;;  %v2887_v48 = vld [vmem:[%s3869_s13 + $0xcc] sm:$0xf0] }
 0x451   : > { %v1250_v49 = vpop.f32.mrf.mxu3 }
 0x452   : > { %v2885_v49 = vld [vmem:[%s3869_s13 + $0xc4] sm:$0xf] }
 0x45d   : > { %v1191_v51 = vpop.xlane.xlu0 %1190 }
 0x45e   : > { %v1192_v52 = vsub.f32 %v1184_v44, %v1191_v51 }
 0x460   : > { %v1193_v53 = vmul.f32 1.442695, %v1192_v52  ;;  %v2622_v52 = vld [vmem:[%s3869_s13 + $0xd0] sm:$0xf0] }
 0x462   : > { %2991 = vpow2.f32 %v1193_v53  ;;  %v2628_v53 = vld [vmem:[%s3869_s13 + $0xc8] sm:$0xf] }
 0x464   : > { %1265 = vrot.lane.b32.xlu1 %v1201_v27, %s3136_s23 }
 0x468   : > { %v2992_v54 = vpop.eup %2991 }
 0x469   : > { %v1195_v55 = vsel %vm1188_vm11, %v2992_v54, 0.0 }
 0x46a   : > { %1196 = vadd.xlane.f32.xlu2 %v1195_v55  ;;  %v2625_v55 = vor.u32 %v2885_v49, %v2622_v52  ;;  %v2548_v52 = vld [vmem:[%s3869_s13 + $0x28] sm:$0xf] }
 0x4be   : > { %v1254_v56 = vpop.xlane.xlu1 %1253 }
 0x4bf   : > { %v1255_v57 = vsub.f32 %v1248_v47, %v1254_v56  ;;  %v2620_v47 = vld [vmem:[%s3869_s13 + $0xc0] sm:$0xf] }
 0x4c0   : > { %v2621_v51 = vor.u32 %v2887_v48, %v2620_v47  ;;  %v2867_v47 = vld [vmem:[%s3869_s13 + $0x2c] sm:$0xf0]  ;;  %v2865_v48 = vld [vmem:[%s3869_s13 + $0x24] sm:$0xf] }
 0x4c1   : > { %v1256_v58 = vmul.f32 1.442695, %v1255_v57  ;;  %v2886_v57 = vld [vmem:[%s3869_s13 + $0xcc] sm:$0xf] }
 0x4c3   : > { %2993 = vpow2.f32 %v1256_v58  ;;  %v2630_v58 = vld [vmem:[%s3869_s13 + $0xd8] sm:$0xf0] }
 0x4c9   : > { %v2994_v59 = vpop.eup %2993 }
 0x4ca   : > { %v1258_v60 = vsel %vm1188_vm11, %v2994_v59, 0.0 }
 0x4cb   : > { %1259 = vadd.xlane.f32.xlu0 %v1258_v60  ;;  %v2604_v60 = vld [vmem:[%s3869_s13 + $0xa0] sm:$0xf] }
 0x4d6   : > { %v1266_v61 = vpop.permute.xlu1 %1265 }
 0x4d7   : > { %v1271_v62 = vand.u32 %v1266_v61, %v1209_v26  ;;  %v2883_v61 = vld [vmem:[%s3869_s13 + $0xac] sm:$0xf0] }
 0x4d9   : > { %1280 = vmatpush.bf16.msra.mxu0 %v1271_v62  ;;  %v2881_v62 = vld [vmem:[%s3869_s13 + $0xa4] sm:$0xf] }
 0x4dd   : > { %v1197_v0 = vpop.xlane.xlu2 %1196  ;;  %1621 = vmatpush.bf16.msrb.mxu0 %v2641_v37  ;;  %v2558_v37 = vld [vmem:[%s3869_s13 + $0x50] sm:$0xf0] }
 0x4de   : > { %2995 = vrcp.f32 %v1197_v0  ;;  %v2605_v0 = vor.u32 %v2883_v61, %v2604_v60  ;;  %v2561_v40 = vor.u32 %v2869_v35, %v2558_v37  ;;  %v2863_v60 = vld [vmem:[%s3869_s13 + $0xc] sm:$0xf0]  ;;  %v2861_v61 = vld [vmem:[%s3869_s13 + $0x4] sm:$0xf]  ;;  %v2898_v35 = vld [vmem:[%s3871_s15 + $0x28] sm:$0xff] }
 0x4df   : > { %v2904_v37 = vld [vmem:[%s3871_s15 + $0x58] sm:$0xff] }
 0x4e1   : > { %1622 = vmatpush.bf16.msrb.mxu0 %v2625_v55 }
 0x4e4   : > { %v2996_v1 = vpop.eup %2995 }
 0x4e5   : > { %v1199_v2 = vmul.f32 %v2996_v1, %v2992_v54  ;;  %v2888_v54 = vld [vmem:[%s3869_s13 + $0xd4] sm:$0xf0]  ;;  %v2606_v1 = vld [vmem:[%s3869_s13 + $0xb0] sm:$0xf0] }
 0x4e6   : > { %v2629_v56 = vor.u32 %v2888_v54, %v2628_v53  ;;  %v2609_v4 = vor.u32 %v2881_v62, %v2606_v1  ;;  %v2868_v53 = vld [vmem:[%s3869_s13 + $0x34] sm:$0xf0]  ;;  %v2526_v62 = vld [vmem:[%s3869_s13 + $0x10] sm:$0xf0] }
 0x4e7   : > { %v1200_v3 = vpack.c.bf16 %v1199_v2, %v1199_v2  ;;  %v2612_v2 = vld [vmem:[%s3869_s13 + $0xa8] sm:$0xf]  ;;  %v2549_v55 = vor.u32 %v2868_v53, %v2548_v52  ;;  %v2529_v1 = vor.u32 %v2861_v61, %v2526_v62  ;;  %v2909_v61 = vld [vmem:[%s3871_s15 + $0x80] sm:$0xff] }
 0x4e8   : > { %1635 = vmatpush.bf16.msrb.mxu1 %v2629_v56  ;;  %1623 = vmatpush.bf16.msrb.mxu0 %v2609_v4  ;;  %v2866_v56 = vld [vmem:[%s3869_s13 + $0x2c] sm:$0xf] }
 0x4e9   : > { %2485 = vmatmul.msk.bf16.vlgmr.msrb.gmra.mxu2 %vm1202_vm12, %v1200_v3  ;;  %v2884_v3 = vld [vmem:[%s3869_s13 + $0xb4] sm:$0xf0]  ;;  %v2862_v4 = vld [vmem:[%s3869_s13 + $0xc] sm:$0xf] }
 0x4ea   : > { %1647 = vmatpush.bf16.msrb.mxu2 %v2649_v41  ;;  %v2613_v5 = vor.u32 %v2884_v3, %v2612_v2  ;;  %v2565_v41 = vor.u32 %v2872_v39, %v2564_v38  ;;  %v2532_v2 = vld [vmem:[%s3869_s13 + $0x8] sm:$0xf]  ;;  %v2864_v3 = vld [vmem:[%s3869_s13 + $0x14] sm:$0xf0]  ;;  %v2897_v39 = vld [vmem:[%s3871_s15 + $0x20] sm:$0xff] }
 0x4eb   : > { %v2912_v38 = vld [vmem:[%s3871_s15 + $0x98] sm:$0xff] }
 0x4ec   : > { %1636 = vmatpush.bf16.msrb.mxu1 %v2613_v5  ;;  %v2533_v5 = vor.u32 %v2864_v3, %v2532_v2  ;;  %v2894_v2 = vld [vmem:[%s3871_s15 + $0x8] sm:$0xff] }
 0x4ed   : > { %v2918_v3 = vld [vmem:[%s3871_s15 + $0xc8] sm:$0xff] }
 0x53e   : > { %v1260_v7 = vpop.xlane.xlu0 %1259 }
 0x53f   : > { %2997 = vrcp.f32 %v1260_v7  ;;  %v2614_v7 = vld [vmem:[%s3869_s13 + $0xb8] sm:$0xf0] }
 0x545   : > { %v2998_v8 = vpop.eup %2997 }
 0x546   : > { %v1262_v9 = vmul.f32 %v2998_v8, %v2994_v59  ;;  %v2633_v59 = vor.u32 %v2886_v57, %v2630_v58  ;;  %v2617_v8 = vor.u32 %v2882_v6, %v2614_v7  ;;  %v2550_v57 = vld [vmem:[%s3869_s13 + $0x38] sm:$0xf0]  ;;  %v2524_v58 = vld [vmem:[%s3869_s13] sm:$0xf] }
 0x547   : > { %v2534_v6 = vld [vmem:[%s3869_s13 + $0x18] sm:$0xf0] }
 0x548   : > { %v1263_v10 = vpack.c.bf16 %v1262_v9, %v1262_v9  ;;  %1648 = vmatpush.bf16.msrb.mxu2 %v2633_v59  ;;  %v2588_v9 = vld [vmem:[%s3869_s13 + $0x80] sm:$0xf]  ;;  %v2553_v59 = vor.u32 %v2866_v56, %v2550_v57  ;;  %v2537_v7 = vor.u32 %v2862_v4, %v2534_v6  ;;  %v2919_v56 = vld [vmem:[%s3871_s15 + $0xd0] sm:$0xff] }
 0x54a   : > { %2487 = vmatmul.msk.bf16.vlgmr.msra.gmra.mxu0 %vm1202_vm12, %v1263_v10  ;;  %v2879_v10 = vld [vmem:[%s3869_s13 + $0x8c] sm:$0xf0] }
 0x54b   : > { %v2589_v12 = vor.u32 %v2879_v10, %v2588_v9 }
 0x54c   : > { %1649 = vmatpush.bf16.msrb.mxu2 %v2617_v8 }
 0x56c   : > { %v1222_v15 = vpop.f32.mrf.mxu2 }
 0x56d   : > { %v1226_v16 = vpack.c.bf16 %v1222_v15, %v1222_v15  ;;  %v2880_v15 = vld [vmem:[%s3869_s13 + $0x94] sm:$0xf0] }
 0x56f   : > { %2521 = vmatmul.msk.bf16.vlgmr.msra.gmra.mxu2 %vm841_vm0, %v1226_v16  ;;  %v2593_v16 = vor.u32 %v2877_v11, %v2590_v13 }
 0x571   : > { %1624 = vmatpush.bf16.msrb.mxu0 %v2593_v16 }
 0x574   : > { %v1224_v17 = vpop.f32.mrf.mxu2 }
 0x575   : > { %v2597_v17 = vor.u32 %v2880_v15, %v2596_v14 }
 0x577   : > { %1637 = vmatpush.bf16.msrb.mxu1 %v2597_v17  ;;  %v2982_v17 = vld [vmem:[%s3867_s11] ss:$0 sm:$0xff] }
 0x5c7   : > { %v1282_v19 = vpop.f32.mrf.mxu0 }
 0x5c8   : > { %v1286_v20 = vpack.c.bf16 %v1282_v19, %v1282_v19  ;;  %v2598_v19 = vld [vmem:[%s3869_s13 + $0x98] sm:$0xf0] }
 0x5ca   : > { %2504 = vmatmul.msk.bf16.vlgmr.msra.gmra.mxu1 %vm841_vm0, %v1286_v20  ;;  %v2601_v20 = vor.u32 %v2878_v18, %v2598_v19 }
 0x5cc   : > { %1650 = vmatpush.bf16.msrb.mxu2 %v2601_v20  ;;  %v2983_v20 = vld [vmem:[%s3868_s12] ss:$0 sm:$0xff] }
 0x5cf   : > { %v1284_v21 = vpop.f32.mrf.mxu0 }
 0x5d0   : > { %v2572_v21 = vld [vmem:[%s3869_s13 + $0x60] sm:$0xf] }
 0x5f2   : > { %v1363_v22 = vpop.f32.mrf.mxu2 }
 0x5fa   : > { %v1365_v23 = vpop.f32.mrf.mxu2 }
 0x5fb   : > { %v2873_v23 = vld [vmem:[%s3869_s13 + $0x64] sm:$0xf] }
 0x647   : > { %v1323_v63 = vpop.f32.mrf.mxu1 }
 0x648   : > { %v1364_v24 = vadd.f32 %v1363_v22, %v1323_v63  ;;  %v2875_v22 = vld [vmem:[%s3869_s13 + $0x6c] sm:$0xf0] }
 0x649   : > { %v2573_v63 = vor.u32 %v2875_v22, %v2572_v21 }
 0x64a   : > { %v1367_v26 = vadd.f32 %v1364_v24, %v3314_v50  ;;  %v2637_v50 = vor.u32 %v2891_v32, %v2636_v31  ;;  %v2574_v24 = vld [vmem:[%s3869_s13 + $0x70] sm:$0xf0]  ;;  %v2874_v31 = vld [vmem:[%s3869_s13 + $0x6c] sm:$0xf]  ;;  %v2582_v32 = vld [vmem:[%s3869_s13 + $0x78] sm:$0xf0] }
 0x64b   : > { %v2585_v33 = vor.u32 %v2874_v31, %v2582_v32  ;;  %v2914_v31 = vld [vmem:[%s3871_s15 + $0xa8] sm:$0xff]  ;;  %v2899_v32 = vld [vmem:[%s3871_s15 + $0x30] sm:$0xff] }
 0x64c   : > { %v3494_v27 = vadd.f32 %v2981_v25, %v1367_v26  ;;  %1608 = vmatpush.bf16.msra.mxu3 %v2637_v50  ;;  %v2580_v25 = vld [vmem:[%s3869_s13 + $0x68] sm:$0xf]  ;;  %v2876_v26 = vld [vmem:[%s3869_s13 + $0x74] sm:$0xf0]  ;;  %v2556_v50 = vld [vmem:[%s3869_s13 + $0x40] sm:$0xf] }
 0x64d   : > { %1651 = vmatpush.bf16.msrb.mxu2 %v2585_v33  ;;  %v2557_v36 = vor.u32 %v2871_v34, %v2556_v50  ;;  %v2923_v33 = vld [vmem:[%s3871_s15 + $0xf0] sm:$0xff]  ;;  %v2905_v50 = vld [vmem:[%s3871_s15 + $0x60] sm:$0xff] }
 0x64e   : > { %v1375_v28 = vsel %vm873_vm1, %v3494_v27, 0.0  ;;  %v2913_v34 = vld [vmem:[%s3871_s15 + $0xa0] sm:$0xff] }
 0x64f   : > { %1376 = vadd.xlane.f32.xlu0 %v1375_v28  ;;  %v1325_v29 = vpop.f32.mrf.mxu1  ;;  %v2577_v28 = vor.u32 %v2873_v23, %v2574_v24  ;;  %v2916_v24 = vld [vmem:[%s3871_s15 + $0xb8] sm:$0xff] }
 0x650   : > { %1609 = vmatpush.bf16.msra.mxu3 %v2621_v51  ;;  %v2581_v29 = vor.u32 %v2876_v26, %v2580_v25  ;;  %v2542_v51 = vld [vmem:[%s3869_s13 + $0x30] sm:$0xf0]  ;;  %v2900_v26 = vld [vmem:[%s3871_s15 + $0x38] sm:$0xff] }
 0x651   : > { %1625 = vmatpush.bf16.msrb.mxu0 %v2577_v28  ;;  %v2545_v54 = vor.u32 %v2865_v48, %v2542_v51  ;;  %v2915_v25 = vld [vmem:[%s3871_s15 + $0xb0] sm:$0xff]  ;;  %v2924_v28 = vld [vmem:[%s3871_s15 + $0xf8] sm:$0xff]  ;;  %v2910_v51 = vld [vmem:[%s3871_s15 + $0x88] sm:$0xff] }
 0x652   : > { %1638 = vmatpush.bf16.msrb.mxu1 %v2581_v29  ;;  %v2906_v29 = vld [vmem:[%s3871_s15 + $0x68] sm:$0xff] }
 0x654   : > { %1610 = vmatpush.bf16.msra.mxu3 %v2605_v0  ;;  %v2525_v0 = vor.u32 %v2863_v60, %v2524_v58  ;;  %v2901_v60 = vld [vmem:[%s3871_s15 + $0x40] sm:$0xff] }
 0x655   : > { %1626 = vmatpush.bf16.msrb.mxu0 %v2561_v40  ;;  %v2921_v40 = vld [vmem:[%s3871_s15 + $0xe0] sm:$0xff] }
 0x656   : > { %1639 = vmatpush.bf16.msrb.mxu1 %v2565_v41  ;;  %v1438_v41 = vld [vmem:[%s3870_s14] sm:$0xf] }
 0x657   : > { %v1442_v48 = vperm.slane %v1438_v41, 2 }
 0x658   : > { %1611 = vmatpush.bf16.msra.mxu3 %v2589_v12 }
 0x659   : > { %1627 = vmatpush.bf16.msrb.mxu0 %v2545_v54 }
 0x65a   : > { %1640 = vmatpush.bf16.msrb.mxu1 %v2549_v55  ;;  %v2895_v55 = vld [vmem:[%s3871_s15 + $0x10] sm:$0xff] }
 0x65c   : > { %1612 = vmatpush.bf16.msra.mxu3 %v2573_v63  ;;  %v2908_v63 = vld [vmem:[%s3871_s15 + $0x78] sm:$0xff] }
 0x65d   : > { %1628 = vmatpush.bf16.msrb.mxu0 %v2529_v1 }
 0x65e   : > { %1641 = vmatpush.bf16.msrb.mxu1 %v2533_v5 }
 0x660   : > { %1613 = vmatpush.bf16.msra.mxu3 %v2557_v36  ;;  %v2922_v36 = vld [vmem:[%s3871_s15 + $0xe8] sm:$0xff] }
 0x661   : > { %2021 = vmatpush.bf16.msra.mxu0 %v2908_v63 }
 0x662   : > { %2034 = vmatpush.bf16.msra.mxu1 %v2916_v24 }
 0x666   : > { %2035 = vmatpush.bf16.msra.mxu1 %v2915_v25 }
 0x66a   : > { %2036 = vmatpush.bf16.msra.mxu1 %v2914_v31 }
 0x66e   : > { %2037 = vmatpush.bf16.msra.mxu1 %v2913_v34 }
 0x672   : > { %2038 = vmatpush.bf16.msra.mxu1 %v2912_v38 }
 0x6c2   : > { %v1377_v42 = vpop.xlane.xlu0 %1376 }
 0x6c3   : > { %v1378_v43 = vmul.f32 %v1377_v42, %v3303_v30  ;;  %v2870_v42 = vld [vmem:[%s3869_s13 + $0x4c] sm:$0xf] }
 0x6c5   : > { %v3524_v44 = vsub.f32 %v3494_v27, %v1378_v43  ;;  %v2566_v43 = vld [vmem:[%s3869_s13 + $0x58] sm:$0xf0] }
 0x6c7   : > { %v1380_v45 = vmul.f32 %v3524_v44, %v3524_v44 }
 0x6c9   : > { %v1381_v46 = vsel %vm873_vm1, %v1380_v45, 0.0  ;;  %v2569_v45 = vor.u32 %v2870_v42, %v2566_v43  ;;  %v2903_v42 = vld [vmem:[%s3871_s15 + $0x50] sm:$0xff] }
 0x6ca   : > { %1382 = vadd.xlane.f32.xlu0 %v1381_v46  ;;  %v2540_v46 = vld [vmem:[%s3869_s13 + $0x20] sm:$0xf]  ;;  %v2911_v43 = vld [vmem:[%s3871_s15 + $0x90] sm:$0xff] }
 0x6cb   : > { %1652 = vmatpush.bf16.msrb.mxu2 %v2569_v45  ;;  %v2541_v49 = vor.u32 %v2867_v47, %v2540_v46  ;;  %v1441_v45 = vperm.slane %v1438_v41, 1  ;;  %2039 = vmatpush.bf16.msra.mxu1 %v2911_v43  ;;  %v2896_v46 = vld [vmem:[%s3871_s15 + $0x18] sm:$0xff] }
 0x6cc   : > { %v2920_v47 = vld [vmem:[%s3871_s15 + $0xd8] sm:$0xff] }
 0x6cd   : > { %1614 = vmatpush.bf16.msra.mxu3 %v2541_v49  ;;  %v2902_v49 = vld [vmem:[%s3871_s15 + $0x48] sm:$0xff] }
 0x6cf   : > { %1653 = vmatpush.bf16.msrb.mxu2 %v2553_v59  ;;  %2040 = vmatpush.bf16.msra.mxu1 %v2910_v51  ;;  %v1440_v59 = vperm.slane %v1438_v41, 0 }
 0x6d1   : > { %1615 = vmatpush.bf16.msra.mxu3 %v2525_v0  ;;  %v1443_v0 = vperm.slane %v1438_v41, 3 }
 0x6d3   : > { %1654 = vmatpush.bf16.msrb.mxu2 %v2537_v7  ;;  %2041 = vmatpush.bf16.msra.mxu1 %v2909_v61 }
 0x6d5   : > { %2008 = vmatpush.bf16.msrb.mxu3 %v2900_v26 }
 0x6d7   : > { %2047 = vmatpush.bf16.msra.mxu2 %v2924_v28 }
 0x6d9   : > { %2009 = vmatpush.bf16.msrb.mxu3 %v2899_v32 }
 0x6db   : > { %2048 = vmatpush.bf16.msra.mxu2 %v2923_v33 }
 0x6dd   : > { %2010 = vmatpush.bf16.msrb.mxu3 %v2898_v35 }
 0x6df   : > { %2049 = vmatpush.bf16.msra.mxu2 %v2922_v36 }
 0x6e1   : > { %2011 = vmatpush.bf16.msrb.mxu3 %v2897_v39 }
 0x6e3   : > { %2050 = vmatpush.bf16.msra.mxu2 %v2921_v40 }
 0x6e5   : > { %2012 = vmatpush.bf16.msrb.mxu3 %v2896_v46 }
 0x6e7   : > { %2051 = vmatpush.bf16.msra.mxu2 %v2920_v47 }
 0x6e9   : > { %2013 = vmatpush.bf16.msrb.mxu3 %v2895_v55 }
 0x6eb   : > { %2052 = vmatpush.bf16.msra.mxu2 %v2919_v56 }
 0x6ed   : > { %2014 = vmatpush.bf16.msrb.mxu3 %v2894_v2 }
 0x6ef   : > { %2053 = vmatpush.bf16.msra.mxu2 %v2918_v3 }
 0x73d   : > { %v1383_v8 = vpop.xlane.xlu0 %1382 }
 0x73e   : > { %v1384_v9 = vmul.f32 %v1383_v8, %v3303_v30 }
 0x740   : > { %v1385_v10 = vadd.f32 1e-05, %v1384_v9 }
 0x742   : > { %2999 = vrsqrt.f32 %v1385_v10  ;;  %vm1392_vm14 = vweird.f32 %v1385_v10 }
 0x748   : > { %v3000_v11 = vpop.eup %2999 }
 0x749   : > { %v1387_v12 = vmul.f32 %v3000_v11, %v1385_v10  ;;  %vm1393_vm13 = vweird.f32 %v3000_v11 }
 0x74a   : > { %vm1394_vm15 = vmor %vm1392_vm14, %vm1393_vm13 }
 0x74b   : > { %v1388_v13 = vmul.f32 %v3000_v11, %v1387_v12  ;;  %v2893_v12 = vld [vmem:[%s3871_s15] sm:$0xff] }
 0x74c   : > { %2015 = vmatpush.bf16.msrb.mxu3 %v2893_v12 }
 0x74d   : > { %v1389_v14 = vmul.f32 0.5, %v1388_v13  ;;  %v2917_v13 = vld [vmem:[%s3871_s15 + $0xc0] sm:$0xff] }
 0x74e   : > { %2054 = vmatpush.bf16.msra.mxu2 %v2917_v13 }
 0x74f   : > { %v1390_v15 = vsub.f32 1.5, %v1389_v14 }
 0x751   : > { %v1391_v16 = vmul.f32 %v3000_v11, %v1390_v15 }
 0x753   : > { %v1395_v18 = vsel %vm1394_vm15, %v3000_v11, %v1391_v16 }
 0x754   : > { %v1396_v19 = vmul.f32 %v1395_v18, %v3524_v44  ;;  %v2907_v44 = vld [vmem:[%s3871_s15 + $0x70] sm:$0xff] }
 0x755   : > { %2022 = vmatpush.bf16.msra.mxu0 %v2907_v44 }
 0x756   : > { %v1400_v21 = vmul.f32 %v2982_v17, %v1396_v19 }
 0x758   : > { %v1404_v22 = vadd.f32 %v2983_v20, %v1400_v21 }
 0x759   : > { %2023 = vmatpush.bf16.msra.mxu0 %v2906_v29 }
 0x75a   : > { %v1405_v23 = vpack.c.bf16 %v1404_v22, %v1404_v22 }
 0x75c   : > { %1616 = vmatmul.bf16.vlgmr.msra.gmra.mxu3 %v1405_v23  ;;  %1629 = vmatmul.bf16.vlgmr.msrb.gmra.mxu0 %v1405_v23 }
 0x75d   : > { %1642 = vmatmul.bf16.vlgmr.msrb.gmra.mxu1 %v1405_v23  ;;  %1655 = vmatmul.bf16.vlgmr.msrb.gmra.mxu2 %v1405_v23 }
 0x75e   : > { %2024 = vmatpush.bf16.msra.mxu0 %v2905_v50 }
 0x762   : > { %2025 = vmatpush.bf16.msra.mxu0 %v2904_v37 }
 0x766   : > { %2026 = vmatpush.bf16.msra.mxu0 %v2903_v42 }
 0x76a   : > { %2027 = vmatpush.bf16.msra.mxu0 %v2902_v49 }
 0x76e   : > { %2028 = vmatpush.bf16.msra.mxu0 %v2901_v60 }
 0x7d9   : > { %v1630_v52 = vpop.f32.mrf.mxu0 }
 0x7da   : > { %v3780_v53 = vadd.f32 %v1630_v52, %v1441_v45  ;;  %v1643_v54 = vpop.f32.mrf.mxu1 }
 0x7db   : > { %v3788_v57 = vadd.f32 %v1643_v54, %v1442_v48 }
 0x7dc   : > { %v2651_v58 = vmul.f32 -1.702, %v3780_v53 }
 0x7dd   : > { %v2652_v62 = vmul.f32 -1.702, %v3788_v57 }
 0x7de   : > { %v1670_v1 = vmul.f32 1.442695, %v2651_v58 }
 0x7df   : > { %v1672_v4 = vmul.f32 1.442695, %v2652_v62  ;;  %v1617_v5 = vpop.f32.mrf.mxu3 }
 0x7e0   : > { %3001 = vpow2.f32 %v1670_v1  ;;  %v3804_v6 = vadd.f32 %v1617_v5, %v1440_v59  ;;  %v1656_v7 = vpop.f32.mrf.mxu2 }
 0x7e1   : > { %3003 = vpow2.f32 %v1672_v4  ;;  %v3806_v8 = vadd.f32 %v1656_v7, %v1443_v0  ;;  %v1632_v9 = vpop.f32.mrf.mxu0 }
 0x7e2   : > { %v2650_v10 = vmul.f32 -1.702, %v3804_v6  ;;  %v1645_v11 = vpop.f32.mrf.mxu1 }
 0x7e3   : > { %v2653_v14 = vmul.f32 -1.702, %v3806_v8 }
 0x7e4   : > { %v1668_v15 = vmul.f32 1.442695, %v2650_v10 }
 0x7e5   : > { %v1674_v16 = vmul.f32 1.442695, %v2653_v14 }
 0x7e6   : > { %v3002_v17 = vpop.eup %3001  ;;  %3005 = vpow2.f32 %v1668_v15 }
 0x7e7   : > { %v3004_v18 = vpop.eup %3003  ;;  %v1677_v19 = vadd.f32 1.0, %v3002_v17  ;;  %3007 = vpow2.f32 %v1674_v16  ;;  %v1619_v20 = vpop.f32.mrf.mxu3 }
 0x7e8   : > { %v1678_v21 = vadd.f32 1.0, %v3004_v18  ;;  %v1658_v22 = vpop.f32.mrf.mxu2 }
 0x7e9   : > { %3009 = vrcp.f32 %v1677_v19  ;;  %v1704_v32 = vand.u32 2147483647, %v1677_v19  ;;  %v1706_v33 = vand.u32 2147483648, %v1677_v19  ;;  %vm1700_vm1 = vweird.f32 %v1677_v19 }
 0x7ea   : > { %3011 = vrcp.f32 %v1678_v21  ;;  %v1719_v34 = vand.u32 2147483647, %v1678_v21  ;;  %v1721_v35 = vand.u32 2147483648, %v1678_v21  ;;  %vm1715_vm2 = vweird.f32 %v1678_v21 }
 0x7eb   : > { %vm1705_vm4 = vcmp.eq.f32.partialorder %v1704_v32, 8.507059e+37  ;;  %v1707_v41 = vor.u32 1.1754944e-38, %v1706_v33 }
 0x7ec   : > { %v3006_v23 = vpop.eup %3005  ;;  %vm1720_vm6 = vcmp.eq.f32.partialorder %v1719_v34, 8.507059e+37  ;;  %v1722_v45 = vor.u32 1.1754944e-38, %v1721_v35  ;;  %v2930_v34 = vld [vmem:[#allocation6 + $0x28] sm:$0xff]  ;;  %v2929_v35 = vld [vmem:[#allocation6 + $0x20] sm:$0xff] }
 0x7ed   : > { %v3008_v63 = vpop.eup %3007  ;;  %v1676_v24 = vadd.f32 1.0, %v3006_v23 }
 0x7ee   : > { %v3816_v44 = vadd.f32 1.0, %v3008_v63 }
 0x7ef   : > { %v3010_v25 = vpop.eup %3009  ;;  %3013 = vrcp.f32 %v1676_v24  ;;  %v1689_v49 = vand.u32 2147483647, %v1676_v24  ;;  %v1691_v51 = vand.u32 2147483648, %v1676_v24  ;;  %vm1685_vm10 = vweird.f32 %v1676_v24 }
 0x7f0   : > { %v3012_v26 = vpop.eup %3011  ;;  %v1696_v28 = vmul.f32 %v3010_v25, %v1677_v19  ;;  %3015 = vrcp.f32 %v3816_v44  ;;  %vm1701_vm0 = vweird.f32 %v3010_v25  ;;  %v1736_v56 = vand.u32 2147483648, %v3816_v44  ;;  %v2984_v19 = vld [vmem:[%s3872_s16] ss:$0 sm:$0xff] }
 0x7f1   : > { %v1711_v29 = vmul.f32 %v3012_v26, %v1678_v21  ;;  %vm1716_vm3 = vweird.f32 %v3012_v26  ;;  %vm1702_vm5 = vmor %vm1700_vm1, %vm1701_vm0  ;;  %v1734_v0 = vand.u32 2147483647, %v3816_v44  ;;  %v1692_v4 = vor.u32 1.1754944e-38, %v1691_v51 }
 0x7f2   : > { %v1697_v31 = vsub.f32 1.0, %v1696_v28  ;;  %vm1717_vm7 = vmor %vm1715_vm2, %vm1716_vm3  ;;  %vm1730_vm12 = vweird.f32 %v3816_v44  ;;  %vm1690_vm13 = vcmp.eq.f32.partialorder %v1689_v49, 8.507059e+37  ;;  %vm2063_vm0 = vcmask 1040384  }
 0x7f3   : > { %v1712_v50 = vsub.f32 1.0, %v1711_v29  ;;  %vm1735_vm15 = vcmp.eq.f32.partialorder %v1734_v0, 8.507059e+37  ;;  %vm2185_vm1 = vcmask 1043456  }
 0x7f4   : > { %v1698_v36 = vmul.f32 %v3010_v25, %v1697_v31 }
 0x7f5   : > { %v3014_v37 = vpop.eup %3013  ;;  %v1713_v38 = vmul.f32 %v3012_v26, %v1712_v50  ;;  %v2931_v50 = vld [vmem:[#allocation6 + $0x30] sm:$0xff] }
 0x7f6   : > { %v3016_v39 = vpop.eup %3015  ;;  %v1699_v40 = vadd.f32 %v3010_v25, %v1698_v36  ;;  %v1681_v42 = vmul.f32 %v3014_v37, %v1676_v24  ;;  %vm1686_vm8 = vweird.f32 %v3014_v37  ;;  %v2927_v36 = vld [vmem:[#allocation6 + $0x10] sm:$0xff] }
 0x7f7   : > { %v1714_v43 = vadd.f32 %v3012_v26, %v1713_v38  ;;  %v1726_v46 = vmul.f32 %v3016_v39, %v3816_v44  ;;  %vm1731_vm9 = vweird.f32 %v3016_v39  ;;  %vm1687_vm11 = vmor %vm1685_vm10, %vm1686_vm8  ;;  %v2925_v38 = vld [vmem:[#allocation6] sm:$0xff] }
 0x7f8   : > { %v1703_v47 = vsel %vm1702_vm5, %v3010_v25, %v1699_v40  ;;  %v1682_v48 = vsub.f32 1.0, %v1681_v42  ;;  %vm1732_vm14 = vmor %vm1730_vm12, %vm1731_vm9 }
 0x7f9   : > { %v1708_v52 = vsel %vm1705_vm4, %v1707_v41, %v1703_v47  ;;  %v1718_v54 = vsel %vm1717_vm7, %v3012_v26, %v1714_v43  ;;  %v1727_v55 = vsub.f32 1.0, %v1726_v46  ;;  %v2932_v26 = vld [vmem:[#allocation6 + $0x38] sm:$0xff] }
 0x7fa   : > { %v1741_v58 = vmul.f32 %v1708_v52, %v3780_v53  ;;  %v1723_v59 = vsel %vm1720_vm6, %v1722_v45, %v1718_v54  ;;  %v1683_v60 = vmul.f32 %v3014_v37, %v1682_v48  ;;  %v1737_v53 = vor.u32 1.1754944e-38, %v1736_v56  ;;  %2153 = vmatpush.bf16.msra.mxu3 %v2932_v26 }
 0x7fb   : > { %v1742_v61 = vmul.f32 %v1723_v59, %v3788_v57  ;;  %v1728_v62 = vmul.f32 %v3016_v39, %v1727_v55  ;;  %v2061_v55 = vld [vmem:[%s3873_s17] sm:$0x1] }
 0x7fc   : > { %v1745_v1 = vpack.c.bf16 %v1741_v58, %v1741_v58  ;;  %v1684_v2 = vadd.f32 %v3014_v37, %v1683_v60 }
 0x7fd   : > { %v1746_v3 = vpack.c.bf16 %v1742_v61, %v1742_v61  ;;  %v1729_v5 = vadd.f32 %v3016_v39, %v1728_v62 }
 0x7fe   : > { %v1688_v7 = vsel %vm1687_vm11, %v3014_v37, %v1684_v2  ;;  %2029 = vmatmul.bf16.vlgmr.msra.gmra.mxu0 %v1745_v1  ;;  %2154 = vmatpush.bf16.msra.mxu3 %v2931_v50  ;;  %v2926_v37 = vld [vmem:[#allocation6 + $0x8] sm:$0xff]  ;;  %vm2221_vm11 = vcmask 24576  }
 0x7ff   : > { %v1693_v9 = vsel %vm1690_vm13, %v1692_v4, %v1688_v7  ;;  %v1733_v57 = vsel %vm1732_vm14, %v3016_v39, %v1729_v5  ;;  %2042 = vmatmul.bf16.vlgmr.msra.gmra.mxu1 %v1746_v3  ;;  %v2183_v39 = vld [vmem:[%s3876_s20] sm:$0xf] }
 0x800   : > { %v1740_v10 = vmul.f32 %v1693_v9, %v3804_v6  ;;  %v1738_v11 = vsel %vm1735_vm15, %v1737_v53, %v1733_v57  ;;  %v2184_v41 = vmul.f32 %v2183_v39, %v2183_v39 }
 0x801   : > { %v1743_v12 = vmul.f32 %v1738_v11, %v3806_v8 }
 0x802   : > { %v1744_v13 = vpack.c.bf16 %v1740_v10, %v1740_v10  ;;  %2155 = vmatpush.bf16.msra.mxu3 %v2930_v34  ;;  %v2186_v43 = vsel %vm2185_vm1, %v2184_v41, 0.0 }
 0x803   : > { %v1747_v14 = vpack.c.bf16 %v1743_v12, %v1743_v12 }
 0x804   : > { %2016 = vmatmul.bf16.vlgmr.msrb.gmra.mxu3 %v1744_v13 }
 0x805   : > { %2055 = vmatmul.bf16.vlgmr.msra.gmra.mxu2 %v1747_v14 }
 0x806   : > { %2156 = vmatpush.bf16.msra.mxu3 %v2929_v35 }
 0x87b   : > { %v2030_v15 = vpop.f32.mrf.mxu0 }
 0x87c   : > { %v2043_v16 = vpop.f32.mrf.mxu1 }
 0x883   : > { %v2032_v17 = vpop.f32.mrf.mxu0 }
 0x884   : > { %v2045_v18 = vpop.f32.mrf.mxu1 }
 0x887   : > { %v2017_v20 = vpop.f32.mrf.mxu3 }
 0x888   : > { %v2018_v21 = vadd.f32 %v2984_v19, %v2017_v20  ;;  %v2056_v22 = vpop.f32.mrf.mxu2 }
 0x88a   : > { %v2031_v23 = vadd.f32 %v2030_v15, %v2018_v21 }
 0x88c   : > { %v2044_v6 = vadd.f32 %v2043_v16, %v2031_v23 }
 0x88e   : > { %v2057_v63 = vadd.f32 %v2056_v22, %v2044_v6 }
 0x88f   : > { %v2019_v24 = vpop.f32.mrf.mxu3 }
 0x890   : > { %v2058_v8 = vpop.f32.mrf.mxu2  ;;  %v2060_v44 = vadd.f32 %v2057_v63, %v3494_v27  ;;  %v2928_v27 = vld [vmem:[#allocation6 + $0x18] sm:$0xff] }
 0x891   : > { %2157 = vmatpush.bf16.msra.mxu3 %v2928_v27 }
 0x892   : > { %v2064_v25 = vsel %vm2063_vm0, %v2060_v44, 0.0 }
 0x893   : > { %2065 = vadd.xlane.f32.xlu0 %v2064_v25 }
 0x895   : > { %2158 = vmatpush.bf16.msra.mxu3 %v2927_v36 }
 0x899   : > { %2159 = vmatpush.bf16.msra.mxu3 %v2926_v37 }
 0x89b   : > { %2187 = vadd.xlane.f32.xlu0 %v2186_v43 }
 0x89d   : > { %2160 = vmatpush.bf16.msra.mxu3 %v2925_v38 }
 0x906   : > { %v2066_v28 = vpop.xlane.xlu0 %2065 }
 0x907   : > { %v2067_v29 = vmul.f32 %v2066_v28, %v3303_v30 }
 0x909   : > { %v2068_v31 = vsub.f32 %v2060_v44, %v2067_v29 }
 0x90b   : > { %v2069_v32 = vmul.f32 %v2068_v31, %v2068_v31 }
 0x90d   : > { %v2070_v33 = vsel %vm2063_vm0, %v2069_v32, 0.0 }
 0x90e   : > { %2071 = vadd.xlane.f32.xlu1 %v2070_v33  ;;  %v2188_v2 = vpop.xlane.xlu0 %2187 }
 0x90f   : > { %v2189_v3 = vmax.f32 %v2188_v2, 1e-12 }
 0x911   : > { %vm2196_vm5 = vweird.f32 %v2189_v3 }
 0x981   : > { %v2072_v40 = vpop.xlane.xlu1 %2071 }
 0x982   : > { %v2073_v42 = vmul.f32 %v2072_v40, %v3303_v30  ;;  %v2062_v30 = vld [vmem:[%s3874_s18] sm:$0x1] }
 0x984   : > { %v2074_v45 = vadd.f32 1e-05, %v2073_v42 }
 0x986   : > { %3017 = vrsqrt.f32 %v2074_v45  ;;  %vm2081_vm3 = vweird.f32 %v2074_v45 }
 0x987   : > { %3019 = vrsqrt.f32 %v2189_v3 }
 0x98c   : > { %v3018_v46 = vpop.eup %3017 }
 0x98d   : > { %v2076_v47 = vmul.f32 %v3018_v46, %v2074_v45  ;;  %vm2082_vm2 = vweird.f32 %v3018_v46  ;;  %v3020_v4 = vpop.eup %3019 }
 0x98e   : > { %vm2083_vm4 = vmor %vm2081_vm3, %vm2082_vm2  ;;  %v2191_v5 = vmul.f32 %v3020_v4, %v2189_v3  ;;  %vm2197_vm6 = vweird.f32 %v3020_v4 }
 0x98f   : > { %v2077_v48 = vmul.f32 %v3018_v46, %v2076_v47  ;;  %vm2198_vm7 = vmor %vm2196_vm5, %vm2197_vm6 }
 0x990   : > { %v2192_v7 = vmul.f32 %v3020_v4, %v2191_v5 }
 0x991   : > { %v2078_v49 = vmul.f32 0.5, %v2077_v48 }
 0x992   : > { %v2193_v53 = vmul.f32 0.5, %v2192_v7 }
 0x993   : > { %v2079_v51 = vsub.f32 1.5, %v2078_v49 }
 0x994   : > { %v2194_v9 = vsub.f32 1.5, %v2193_v53 }
 0x995   : > { %v2080_v52 = vmul.f32 %v3018_v46, %v2079_v51 }
 0x996   : > { %v2195_v57 = vmul.f32 %v3020_v4, %v2194_v9 }
 0x997   : > { %v2084_v54 = vsel %vm2083_vm4, %v3018_v46, %v2080_v52 }
 0x998   : > { %v2085_v56 = vmul.f32 %v2084_v54, %v2068_v31  ;;  %v2199_v10 = vsel %vm2198_vm7, %v3020_v4, %v2195_v57 }
 0x999   : > { %v2200_v11 = vmul.f32 %v2199_v10, %v2183_v39 }
 0x99a   : > { %v2086_v58 = vmul.f32 %v2085_v56, %v2061_v55 }
 0x99b   : > { %2216 = vmatpush.xpose.msrb.mxu0 %v2200_v11 }
 0x99c   : > { %v2087_v59 = vadd.f32 %v2086_v58, %v2062_v30 }
 0x99e   : > { %v2088_v60 = vpack.c.bf16 %v2087_v59, %v2087_v59 }
 0x9a0   : > { %2161 = vmatmul.bf16.vlgmr.msra.gmra.mxu3 %v2088_v60 }
 0xa23   : > { %v2162_v61 = vpop.f32.mrf.mxu3 }
 0xa24   : > { %v2166_v62 = vmul.f32 %v2162_v61, %v2162_v61 }
 0xa26   : > { %v2167_v0 = vsel %vm2063_vm0, %v2166_v62, 0.0 }
 0xa27   : > { %2168 = vadd.xlane.f32.xlu2 %v2167_v0 }
 0xa2b   : > { %v2164_v1 = vpop.f32.mrf.mxu3 }
 0xa9a   : > { %v2169_v12 = vpop.xlane.xlu2 %2168 }
 0xa9b   : > { %v2170_v13 = vmax.f32 %v2169_v12, 1e-12 }
 0xa9d   : > { %3021 = vrsqrt.f32 %v2170_v13  ;;  %vm2177_vm9 = vweird.f32 %v2170_v13 }
 0xaa3   : > { %v3022_v14 = vpop.eup %3021 }
 0xaa4   : > { %v2172_v15 = vmul.f32 %v3022_v14, %v2170_v13  ;;  %vm2178_vm8 = vweird.f32 %v3022_v14 }
 0xaa5   : > { %vm2179_vm10 = vmor %vm2177_vm9, %vm2178_vm8 }
 0xaa6   : > { %v2173_v16 = vmul.f32 %v3022_v14, %v2172_v15 }
 0xaa8   : > { %v2174_v17 = vmul.f32 0.5, %v2173_v16 }
 0xaaa   : > { %v2175_v18 = vsub.f32 1.5, %v2174_v17 }
 0xaac   : > { %v2176_v19 = vmul.f32 %v3022_v14, %v2175_v18 }
 0xaae   : > { %v2180_v20 = vsel %vm2179_vm10, %v3022_v14, %v2176_v19 }
 0xaaf   : > { %v2181_v21 = vmul.f32 %v2180_v20, %v2162_v61 }
 0xab1   : > { %2182 = vst [vmem:[%s735_s1] sm:$0x1] %v2181_v21  ;;  %2217 = vmatmul.f32.vlgmr.msrb.gmra.mxu0 %v2181_v21 }
 0xb2e   : > { %v2218_v22 = vpop.f32.mrf.mxu0 }
 0xb2f   : > { %2222 = vst.msk [vmem:[%s738_s4] sm:$0x1] %vm2221_vm11, %v2218_v22 }
 0xb30 PF: > { %s3898_s0 = sld [smem:[#allocation9_spill]] }
 0xb36   : > { %s35_s3 = sadd.s32 1, %s3898_s0  }
 0xb37   : > { %p32_p7 = scmp.ge.s32.totalorder %s35_s3, 4  }
 0xb39   :  { %34 = sbr.rel (!%p32_p7) target bundleno = 11 (0xb), region = 159 }
 0xb3e   :  { %2252 = vsyncpa [#allocation3], 1 }
 0xb3f   :  { %2254 = vsyncpa [#allocation3 + $0x1], 1 }
 0xb40   :  { %2255 = vsyncpa [#allocation5], 1 }

// kernel: clip_forward.4
= control target key start
LH: loop header
LB: loop body
LE: loop exit
PB: predicated region body
PF: predicated region fallthrough
CT: control target
= control target key end

     0   :  { %s2729_s30 = smov [#allocation3]   ;;  %s3613_s0 = inlined_call_operand.vmem [shape: s32[10], index: 0, kind: input, shape index: {}]   ;;  %s3614_s1 = inlined_call_operand.vmem [shape: f32[10,16,128], index: 1, kind: input, shape index: {}]   ;;  %s3615_s2 = inlined_call_operand.vmem [shape: f32[16,128], index: 2, kind: input, shape index: {}]   ;;  %s3616_s3 = inlined_call_operand.vmem [shape: f32[1,1,128], index: 3, kind: input, shape index: {}]   ;;  %s3617_s4 = inlined_call_operand.vmem [shape: f32[1,1,128], index: 4, kind: input, shape index: {}]   ;;  %s3618_s5 = inlined_call_operand.vmem [shape: bf16[1,128,384], index: 5, kind: input, shape index: {}]   ;;  %s3619_s6 = inlined_call_operand.vmem [shape: f32[1,1,384], index: 6, kind: input, shape index: {}]   ;;  %s3620_s7 = inlined_call_operand.vmem [shape: bf16[1,128,128], index: 7, kind: input, shape index: {}]   ;;  %s3621_s8 = inlined_call_operand.vmem [shape: f32[1,1,128], index: 8, kind: input, shape index: {}]   ;;  %s3622_s9 = inlined_call_operand.vmem [shape: f32[1,1,128], index: 9, kind: input, shape index: {}]   ;;  %s3623_s10 = inlined_call_operand.vmem [shape: f32[1,1,128], index: 10, kind: input, shape index: {}]   ;;  %s3624_s11 = inlined_call_operand.vmem [shape: bf16[1,128,512], index: 11, kind: input, shape index: {}]   ;;  %s3625_s12 = inlined_call_operand.vmem [shape: f32[1,1,512], index: 12, kind: input, shape index: {}]   ;;  %s3626_s13 = inlined_call_operand.vmem [shape: bf16[1,512,128], index: 13, kind: input, shape index: {}]   ;;  %s3627_s14 = inlined_call_operand.vmem [shape: f32[1,1,128], index: 14, kind: input, shape index: {}]   ;;  %s3628_s15 = inlined_call_operand.vmem [shape: f32[1,128], index: 15, kind: input, shape index: {}]   ;;  %s3629_s16 = inlined_call_operand.vmem [shape: f32[1,128], index: 16, kind: input, shape index: {}]   ;;  %s3630_s17 = inlined_call_operand.vmem [shape: bf16[128,128], index: 17, kind: input, shape index: {}]   ;;  %s3631_s18 = inlined_call_operand.vmem [shape: f32[10,1,128], index: 18, kind: output, shape index: {}]  }
   0x1   :  { %3633 = sst [smem:[#allocation5_spill]] %s3613_s0 }
   0x2   :  { %3634 = sst [smem:[#allocation6_spill]] %s3614_s1 }
   0x3   :  { %3635 = sst [smem:[#allocation7_spill]] %s3615_s2 }
   0x4   :  { %3636 = sst [smem:[#allocation8_spill]] %s3625_s12 }
   0x5   :  { %s3637_s29 = sld [smem:[#allocation5_spill]] }
   0xb   :  { %s24_s12 = sshll.u32 %s3637_s29, 4  ;;  %s25_s12 = int_to_ptr.vmem [resolvable:$true] %s24_s12 }
   0xc   :  { %27 = dma.vmem_to_smem %s25_s12, 16, %s2729_s30, [#allocation2] }
   0xd   :  { %2723 = dma.done.wait [#allocation2], 16 }
   0xe   :  { %2724 = vsyncadd [#allocation2], 4294967280 }
   0xf   :  { %30 = sfence }
  0x10   :  { %s2831_s0 = smov 0  }
  0x11 LB: > { %s2837_s19 = sadd.s32 4294967295, %s2727_s0   ;;  %p2085_p0 = scmp.ge.s32.totalorder %s2727_s0, 1  ;;  %s2727_s0 = sphi %s2831_s0, %s36_s0  }
  0x12   : > { %p496_p1 = scmp.lt.s32.totalorder %s2727_s0, 11 }
  0x14   : > { %p497_p2 = pnand %p2085_p0, %p496_p1 }
  0x15   : > { %p546_p3 = scmp.lt.s32.totalorder (!%p497_p2), %s2837_s19, 9  ;;  %s3638_s22 = sld [smem:[#allocation7_spill]] (!%p497_p2) }
  0x16   : > { %500 = sbr.rel (%p497_p2) target bundleno = 2817 (0xb01), region = 88  ;;  %s3639_s24 = sld [smem:[#allocation6_spill]] (!%p497_p2) }
  0x17   : > { %s2732_s2 = smov (!%p497_p2), 64   ;;  %s1884_s26 = sld [smem:[#allocation3 + %s2837_s19]] (!%p497_p2) }
  0x1b   : > { %s2843_s12 = scalar_select %p546_p3, %s2837_s19, 9  ;;  %v557_v0 = vld [vmem:[%s3638_s22] sm:$0xff]  ;;  %v558_v4 = vld [vmem:[%s3638_s22 + $0x8] sm:$0xff]  ;;  %v2730_v6 = vmov 128.0   ;;  %v2545_v22 = vld [vmem:[%s3618_s5 + $0xb0] sm:$0xf0] }
  0x1c   : > { %2645 = vrcp.f32 %v2730_v6  ;;  %v2174_v21 = vld [vmem:[%s3618_s5 + $0xa8] sm:$0xf]  ;;  %v2544_v23 = vld [vmem:[%s3618_s5 + $0xac] sm:$0xf]  ;;  %v2176_v25 = vld [vmem:[%s3618_s5 + $0xb4] sm:$0xf0] }
  0x1d   : > { %s2522_s1 = sshll.u32 %s2843_s12, 4  ;;  %v2175_v24 = vor.u32 %v2545_v22, %v2174_v21  ;;  %v2182_v26 = vld [vmem:[%s3618_s5 + $0xb0] sm:$0xf]  ;;  %v2546_v27 = vld [vmem:[%s3618_s5 + $0xb8] sm:$0xf0]  ;;  %v2179_v28 = vor.u32 %v2544_v23, %v2176_v25  ;;  %vm858_vm7 = vcmask 523264   ;;  %s553_s23 = scalar_lea.vmem %s3631_s18, %s2843_s12 }
  0x1e   : > { %s550_s25 = scalar_lea.vmem %s3639_s24, %s2522_s1  ;;  %v2183_v29 = vor.u32 %v2546_v27, %v2182_v26  ;;  %v2162_v30 = vld [vmem:[%s3618_s5 + $0x90] sm:$0xf]  ;;  %v2542_v31 = vld [vmem:[%s3618_s5 + $0x98] sm:$0xf0]  ;;  %v2541_v32 = vld [vmem:[%s3618_s5 + $0x94] sm:$0xf] }
  0x1f   : > { %v555_v1 = vld [vmem:[%s550_s25] sm:$0xff]  ;;  %v556_v3 = vld [vmem:[%s550_s25 + $0x8] sm:$0xff]  ;;  %798 = vmatpush.bf16.msra.mxu0 %v2175_v24  ;;  %812 = vmatpush.bf16.msra.mxu1 %v2179_v28  ;;  %v2163_v33 = vor.u32 %v2542_v31, %v2162_v30  ;;  %v2170_v35 = vld [vmem:[%s3618_s5 + $0x98] sm:$0xf]  ;;  %vm879_vm9 = vcmask 130048   ;;  %s3640_s1 = sld [smem:[#allocation8_spill]] }
  0x20   : > { %v2852_v2 = vadd.f32 %v557_v0, %v555_v1  ;;  %v2858_v5 = vadd.f32 %v558_v4, %v556_v3  ;;  %826 = vmatpush.bf16.msra.mxu2 %v2183_v29  ;;  %v2164_v34 = vld [vmem:[%s3618_s5 + $0x9c] sm:$0xf0]  ;;  %v2543_v36 = vld [vmem:[%s3618_s5 + $0xa0] sm:$0xf0]  ;;  %v2150_v39 = vld [vmem:[%s3618_s5 + $0x78] sm:$0xf] }
  0x21   : > { %v2167_v37 = vor.u32 %v2541_v32, %v2164_v34  ;;  %v2171_v38 = vor.u32 %v2543_v36, %v2170_v35  ;;  %v2539_v40 = vld [vmem:[%s3618_s5 + $0x80] sm:$0xf0]  ;;  %v2538_v41 = vld [vmem:[%s3618_s5 + $0x7c] sm:$0xf]  ;;  %v2152_v43 = vld [vmem:[%s3618_s5 + $0x84] sm:$0xf0] }
  0x22   : > { %572 = vadd.xlane.f32.xlu0 %v2852_v2  ;;  %v2646_v7 = vpop.eup %2645  ;;  %v2151_v42 = vor.u32 %v2539_v40, %v2150_v39  ;;  %v2158_v44 = vld [vmem:[%s3618_s5 + $0x80] sm:$0xf]  ;;  %v2540_v45 = vld [vmem:[%s3618_s5 + $0x88] sm:$0xf0]  ;;  %v2155_v46 = vor.u32 %v2538_v41, %v2152_v43  ;;  %v2535_v50 = vld [vmem:[%s3618_s5 + $0x64] sm:$0xf] }
  0x23   : > { %v577_v8 = vmul.f32 128.0, %v2646_v7  ;;  %vm581_vm0 = vweird.f32 %v2646_v7  ;;  %799 = vmatpush.bf16.msra.mxu0 %v2163_v33  ;;  %813 = vmatpush.bf16.msra.mxu1 %v2167_v37  ;;  %v2159_v47 = vor.u32 %v2540_v45, %v2158_v44  ;;  %v2138_v48 = vld [vmem:[%s3618_s5 + $0x60] sm:$0xf]  ;;  %v2536_v49 = vld [vmem:[%s3618_s5 + $0x68] sm:$0xf0] }
  0x24   : > { %827 = vmatpush.bf16.msra.mxu2 %v2171_v38  ;;  %v2139_v51 = vor.u32 %v2536_v49, %v2138_v48  ;;  %v2140_v52 = vld [vmem:[%s3618_s5 + $0x6c] sm:$0xf0]  ;;  %v2146_v53 = vld [vmem:[%s3618_s5 + $0x68] sm:$0xf]  ;;  %v2537_v54 = vld [vmem:[%s3618_s5 + $0x70] sm:$0xf0] }
  0x25   : > { %v578_v9 = vsub.f32 1.0, %v577_v8  ;;  %v2143_v55 = vor.u32 %v2535_v50, %v2140_v52  ;;  %v2147_v56 = vor.u32 %v2537_v54, %v2146_v53  ;;  %v2126_v57 = vld [vmem:[%s3618_s5 + $0x48] sm:$0xf]  ;;  %v2533_v58 = vld [vmem:[%s3618_s5 + $0x50] sm:$0xf0] }
  0x26   : > { %v2532_v59 = vld [vmem:[%s3618_s5 + $0x4c] sm:$0xf]  ;;  %v2127_v60 = vor.u32 %v2533_v58, %v2126_v57  ;;  %v2128_v61 = vld [vmem:[%s3618_s5 + $0x54] sm:$0xf0]  ;;  %v2134_v62 = vld [vmem:[%s3618_s5 + $0x50] sm:$0xf] }
  0x27   : > { %v579_v10 = vmul.f32 %v2646_v7, %v578_v9  ;;  %800 = vmatpush.bf16.msra.mxu0 %v2151_v42  ;;  %814 = vmatpush.bf16.msra.mxu1 %v2155_v46  ;;  %v2534_v63 = vld [vmem:[%s3618_s5 + $0x58] sm:$0xf0]  ;;  %v2131_v0 = vor.u32 %v2532_v59, %v2128_v61  ;;  %v2114_v3 = vld [vmem:[%s3618_s5 + $0x30] sm:$0xf]  ;;  %v2529_v6 = vld [vmem:[%s3618_s5 + $0x34] sm:$0xf] }
  0x28   : > { %828 = vmatpush.bf16.msra.mxu2 %v2159_v47  ;;  %v2135_v1 = vor.u32 %v2534_v63, %v2134_v62  ;;  %v2530_v4 = vld [vmem:[%s3618_s5 + $0x38] sm:$0xf0]  ;;  %v2116_v8 = vld [vmem:[%s3618_s5 + $0x3c] sm:$0xf0]  ;;  %v2122_v9 = vld [vmem:[%s3618_s5 + $0x38] sm:$0xf] }
  0x29   : > { %v580_v11 = vadd.f32 %v2646_v7, %v579_v10  ;;  %v2531_v10 = vld [vmem:[%s3618_s5 + $0x40] sm:$0xf0]  ;;  %v2110_v21 = vld [vmem:[%s3618_s5 + $0x20] sm:$0xf]  ;;  %v2528_v22 = vld [vmem:[%s3618_s5 + $0x28] sm:$0xf0] }
  0x2a   : > { %574 = vadd.xlane.f32.xlu0 %v2858_v5  ;;  %v2111_v24 = vor.u32 %v2528_v22, %v2110_v21  ;;  %v2090_v25 = vld [vmem:[%s3618_s5] sm:$0xf]  ;;  %v2524_v26 = vld [vmem:[%s3618_s5 + $0x8] sm:$0xf0]  ;;  %v2523_v27 = vld [vmem:[%s3618_s5 + $0x4] sm:$0xf]  ;;  %v561_v22 = vlaneseq }
  0x2b   : > { %v2861_v12 = vsel %vm581_vm0, %v2646_v7, %v580_v11  ;;  %801 = vmatpush.bf16.msra.mxu0 %v2139_v51  ;;  %815 = vmatpush.bf16.msra.mxu1 %v2143_v55  ;;  %v2115_v7 = vor.u32 %v2530_v4, %v2114_v3  ;;  %v2119_v11 = vor.u32 %v2529_v6, %v2116_v8  ;;  %v2092_v30 = vld [vmem:[%s3618_s5 + $0xc] sm:$0xf0]  ;;  %v2098_v31 = vld [vmem:[%s3618_s5 + $0x8] sm:$0xf]  ;;  %v2525_v32 = vld [vmem:[%s3618_s5 + $0x10] sm:$0xf0] }
  0x2c   : > { %829 = vmatpush.bf16.msra.mxu2 %v2147_v56  ;;  %v2091_v29 = vor.u32 %v2524_v26, %v2090_v25  ;;  %v2095_v34 = vor.u32 %v2523_v27, %v2092_v30  ;;  %v2099_v35 = vor.u32 %v2525_v32, %v2098_v31  ;;  %v2639_v53 = vld [vmem:[%s3616_s3] ss:$0 sm:$0xff]  ;;  %v2731_v25 = vmov 0.0  }
  0x2d   : > { %v2640_v58 = vld [vmem:[%s3617_s4] ss:$0 sm:$0xff] }
  0x2e   : > { %v662_v63 = vld [vmem:[%s3619_s6] sm:$0x7] }
  0x2f   : > { %802 = vmatpush.bf16.msra.mxu0 %v2127_v60  ;;  %816 = vmatpush.bf16.msra.mxu1 %v2131_v0  ;;  %v666_v8 = vperm.slane %v662_v63, 2 }
  0x30   : > { %830 = vmatpush.bf16.msra.mxu2 %v2135_v1  ;;  %v665_v1 = vperm.slane %v662_v63, 1 }
  0x33   : > { %803 = vmatpush.bf16.msra.mxu0 %v2115_v7  ;;  %817 = vmatpush.bf16.msra.mxu1 %v2119_v11 }
  0x95   : > { %v573_v13 = vpop.xlane.xlu0 %572 }
  0x96   : > { %v583_v14 = vmul.f32 %v2861_v12, %v573_v13  ;;  %v2123_v13 = vor.u32 %v2531_v10, %v2122_v9  ;;  %v664_v10 = vperm.slane %v662_v63, 0 }
  0x98   : > { %v2865_v15 = vsub.f32 %v2852_v2, %v583_v14  ;;  %831 = vmatpush.bf16.msra.mxu2 %v2123_v13  ;;  %v2102_v14 = vld [vmem:[%s3618_s5 + $0x18] sm:$0xf] }
  0x9a   : > { %v587_v16 = vmul.f32 %v2865_v15, %v2865_v15 }
  0x9c   : > { %589 = vadd.xlane.f32.xlu1 %v587_v16  ;;  %v2527_v16 = vld [vmem:[%s3618_s5 + $0x20] sm:$0xf0]  ;;  %832 = vmatpush.bf16.msra.mxu2 %v2111_v24  ;;  %v3034_v24 = vand.u32 127, %v561_v22 }
  0x9d   : > { %v575_v17 = vpop.xlane.xlu0 %574 }
  0x9e   : > { %v584_v18 = vmul.f32 %v2861_v12, %v575_v17  ;;  %v2526_v17 = vld [vmem:[%s3618_s5 + $0x1c] sm:$0xf] }
  0xa0   : > { %v2871_v19 = vsub.f32 %v2858_v5, %v584_v18  ;;  %v2103_v18 = vor.u32 %v2527_v16, %v2102_v14  ;;  %833 = vmatpush.bf16.msra.mxu2 %v2099_v35 }
  0xa2   : > { %v588_v20 = vmul.f32 %v2871_v19, %v2871_v19  ;;  %804 = vmatpush.bf16.msra.mxu0 %v2103_v18 }
  0xa4   : > { %591 = vadd.xlane.f32.xlu1 %v588_v20  ;;  %v2104_v20 = vld [vmem:[%s3618_s5 + $0x24] sm:$0xf0] }
  0xa5   : > { %v2107_v23 = vor.u32 %v2526_v17, %v2104_v20 }
  0xa6   : > { %805 = vmatpush.bf16.msra.mxu0 %v2091_v29 }
  0xa7   : > { %818 = vmatpush.bf16.msra.mxu1 %v2107_v23  ;;  %v562_v23 = vshrl.u32 %v561_v22, 7 }
  0xa9   : > { %vm566_vm8 = vcmp.gt.s32.totalorder %v3034_v24, %v562_v23  ;;  %v563_v27 = vadd.s32 8, %v562_v23 }
  0xaa   : > { %v568_v26 = vsel %vm566_vm8, -1e+09, %v2731_v25 }
  0xab   : > { %819 = vmatpush.bf16.msra.mxu1 %v2095_v34  ;;  %vm567_vm10 = vcmp.gt.s32.totalorder %v3034_v24, %v563_v27 }
  0xac   : > { %v569_v31 = vsel %vm567_vm10, -1e+09, %v2731_v25 }
 0x10f   : > { %v590_v28 = vpop.xlane.xlu1 %589 }
 0x110   : > { %v593_v33 = vmul.f32 %v590_v28, %v2861_v12 }
 0x112   : > { %v595_v36 = vadd.f32 1e-05, %v593_v33 }
 0x114   : > { %2647 = vrsqrt.f32 %v595_v36  ;;  %vm603_vm2 = vweird.f32 %v595_v36 }
 0x117   : > { %v592_v37 = vpop.xlane.xlu1 %591 }
 0x118   : > { %v594_v38 = vmul.f32 %v592_v37, %v2861_v12 }
 0x11a   : > { %v2648_v39 = vpop.eup %2647  ;;  %v596_v40 = vadd.f32 1e-05, %v594_v38 }
 0x11b   : > { %v598_v41 = vmul.f32 %v2648_v39, %v595_v36  ;;  %vm604_vm1 = vweird.f32 %v2648_v39 }
 0x11c   : > { %2649 = vrsqrt.f32 %v596_v40  ;;  %vm605_vm3 = vmor %vm603_vm2, %vm604_vm1  ;;  %vm613_vm5 = vweird.f32 %v596_v40 }
 0x11d   : > { %v599_v42 = vmul.f32 %v2648_v39, %v598_v41 }
 0x11f   : > { %v600_v43 = vmul.f32 0.5, %v599_v42 }
 0x121   : > { %v601_v44 = vsub.f32 1.5, %v600_v43 }
 0x122   : > { %v2650_v45 = vpop.eup %2649 }
 0x123   : > { %v602_v46 = vmul.f32 %v2648_v39, %v601_v44  ;;  %v608_v47 = vmul.f32 %v2650_v45, %v596_v40  ;;  %vm614_vm4 = vweird.f32 %v2650_v45 }
 0x124   : > { %vm615_vm6 = vmor %vm613_vm5, %vm614_vm4 }
 0x125   : > { %v609_v48 = vmul.f32 %v2650_v45, %v608_v47  ;;  %v606_v49 = vsel %vm605_vm3, %v2648_v39, %v602_v46 }
 0x126   : > { %v617_v52 = vmul.f32 %v606_v49, %v2865_v15 }
 0x127   : > { %v610_v50 = vmul.f32 0.5, %v609_v48  ;;  %v2550_v48 = vld [vmem:[%s3620_s7 + $0x18] sm:$0xff] }
 0x128   : > { %v622_v57 = vmul.f32 %v2639_v53, %v617_v52  ;;  %1065 = vmatpush.bf16.msrb.mxu2 %v2550_v48 }
 0x129   : > { %v611_v51 = vsub.f32 1.5, %v610_v50 }
 0x12a   : > { %v627_v60 = vadd.f32 %v2640_v58, %v622_v57  ;;  %v2549_v57 = vld [vmem:[%s3620_s7 + $0x10] sm:$0xff] }
 0x12b   : > { %v612_v54 = vmul.f32 %v2650_v45, %v611_v51 }
 0x12c   : > { %1066 = vmatpush.bf16.msrb.mxu2 %v2549_v57  ;;  %v2586_v57 = vld [vmem:[%s3624_s11 + $0xf4] sm:$0xf0] }
 0x12d   : > { %v616_v55 = vsel %vm615_vm6, %v2650_v45, %v612_v54 }
 0x12e   : > { %v618_v56 = vmul.f32 %v616_v55, %v2871_v19 }
 0x130   : > { %v623_v59 = vmul.f32 %v2639_v53, %v618_v56 }
 0x132   : > { %v628_v61 = vadd.f32 %v2640_v58, %v623_v59  ;;  %v2548_v58 = vld [vmem:[%s3620_s7 + $0x8] sm:$0xff]  ;;  %v2547_v59 = vld [vmem:[%s3620_s7] sm:$0xff] }
 0x133   : > { %1067 = vmatpush.bf16.msrb.mxu2 %v2548_v58 }
 0x134   : > { %v629_v62 = vpack.c.bf16 %v628_v61, %v627_v60 }
 0x136   : > { %806 = vmatmul.bf16.vlgmr.msra.gmra.mxu0 %v629_v62  ;;  %820 = vmatmul.bf16.vlgmr.msra.gmra.mxu1 %v629_v62 }
 0x137   : > { %834 = vmatmul.bf16.vlgmr.msra.gmra.mxu2 %v629_v62 }
 0x138   : > { %1068 = vmatpush.bf16.msrb.mxu2 %v2547_v59 }
 0x1b3   : > { %v821_v15 = vpop.f32.mrf.mxu1  ;;  %v807_v0 = vpop.f32.mrf.mxu0 }
 0x1b4   : > { %v822_v4 = vadd.f32 %v821_v15, %v665_v1  ;;  %v808_v18 = vadd.f32 %v807_v0, %v664_v10 }
 0x1ba   : > { %v835_v19 = vpop.f32.mrf.mxu2 }
 0x1bb   : > { %v823_v3 = vpop.f32.mrf.mxu1  ;;  %v809_v9 = vpop.f32.mrf.mxu0  ;;  %v836_v16 = vadd.f32 %v835_v19, %v666_v8 }
 0x1bc   : > { %v824_v6 = vadd.f32 %v823_v3, %v665_v1  ;;  %v810_v13 = vadd.f32 %v809_v9, %v664_v10 }
 0x1be   : > { %v857_v7 = vpack.c.bf16 %v824_v6, %v822_v4  ;;  %v856_v21 = vpack.c.bf16 %v810_v13, %v808_v18 }
 0x1c0   : > { %v863_v11 = vsel %vm858_vm7, %v857_v7, 0 }
 0x1c1   : > { %872 = vmatpush.bf16.xpose.msra.mxu3 %v863_v11 }
 0x1c2   : > { %v837_v14 = vpop.f32.mrf.mxu2 }
 0x1c3   : > { %v838_v17 = vadd.f32 %v837_v14, %v666_v8 }
 0x1c5   : > { %v903_v20 = vpack.c.bf16 %v838_v17, %v836_v16  ;;  %v2554_v17 = vld [vmem:[%s3620_s7 + $0x38] sm:$0xff] }
 0x1c8   : > { %2184 = vmatmul.msk.bf16.vlgmr.msra.gmra.mxu3 %vm858_vm7, %v856_v21 }
 0x1c9   : > { %914 = vmatpush.bf16.msrb.mxu3 %v903_v20 }
 0x24b   : > { %v874_v28 = vpop.f32.mrf.mxu3 }
 0x24c   : > { %v875_v29 = vadd.f32 %v874_v28, %v568_v26  ;;  %v2553_v28 = vld [vmem:[%s3620_s7 + $0x30] sm:$0xff] }
 0x24e   : > { %v880_v30 = vsel %vm879_vm9, %v875_v29, -inf }
 0x24f   : > { %881 = vmax.xlane.f32.xlu2 %v880_v30  ;;  %v2551_v30 = vld [vmem:[%s3620_s7 + $0x20] sm:$0xff] }
 0x253   : > { %v876_v32 = vpop.f32.mrf.mxu3 }
 0x254   : > { %v877_v33 = vadd.f32 %v876_v32, %v569_v31 }
 0x256   : > { %v883_v34 = vsel %vm879_vm9, %v877_v33, -inf }
 0x257   : > { %884 = vmax.xlane.f32.xlu2 %v883_v34 }
 0x26f   : > { %926 = vrot.lane.b32.xlu2 %v857_v7, %s2732_s2 }
 0x2c2   : > { %v882_v35 = vpop.xlane.xlu2 %881 }
 0x2c3   : > { %v886_v36 = vsub.f32 %v875_v29, %v882_v35  ;;  %v2552_v29 = vld [vmem:[%s3620_s7 + $0x28] sm:$0xff] }
 0x2c5   : > { %v888_v37 = vmul.f32 1.442695, %v886_v36 }
 0x2c7   : > { %2651 = vpow2.f32 %v888_v37  ;;  %v2641_v37 = vld [vmem:[%s3621_s8] ss:$0 sm:$0xff] }
 0x2ca   : > { %v885_v38 = vpop.xlane.xlu2 %884 }
 0x2cb   : > { %v887_v39 = vsub.f32 %v877_v33, %v885_v38 }
 0x2cd   : > { %v2652_v40 = vpop.eup %2651  ;;  %v890_v41 = vmul.f32 1.442695, %v887_v39 }
 0x2ce   : > { %v892_v42 = vsel %vm879_vm9, %v2652_v40, 0.0 }
 0x2cf   : > { %2653 = vpow2.f32 %v890_v41  ;;  %893 = vadd.xlane.f32.xlu0 %v892_v42 }
 0x2d2   : > { %v927_v43 = vpop.permute.xlu2 %926 }
 0x2d3   : > { %v932_v44 = vsel %vm858_vm7, %v927_v43, 0 }
 0x2d4   : > { %941 = vmatpush.bf16.xpose.msra.mxu3 %v932_v44 }
 0x2d5   : > { %v2654_v45 = vpop.eup %2653 }
 0x2d6   : > { %v895_v46 = vsel %vm879_vm9, %v2654_v45, 0.0 }
 0x2d7   : > { %896 = vadd.xlane.f32.xlu1 %v895_v46 }
 0x2e3   : > { %923 = vrot.lane.b32.xlu0 %v856_v21, %s2732_s2 }
 0x2eb   : > { %972 = vrot.lane.b32.xlu0 %v903_v20, %s2732_s2 }
 0x342   : > { %v894_v47 = vpop.xlane.xlu0 %893 }
 0x343   : > { %2655 = vrcp.f32 %v894_v47 }
 0x349   : > { %v2656_v50 = vpop.eup %2655 }
 0x34a   : > { %v897_v49 = vpop.xlane.xlu1 %896  ;;  %v900_v52 = vmul.f32 %v2656_v50, %v2652_v40 }
 0x34b   : > { %2657 = vrcp.f32 %v897_v49 }
 0x351   : > { %v2658_v51 = vpop.eup %2657 }
 0x352   : > { %v901_v53 = vmul.f32 %v2658_v51, %v2654_v45  ;;  %v2336_v51 = vld [vmem:[%s3624_s11 + $0xe0] sm:$0xf] }
 0x354   : > { %v902_v54 = vpack.c.bf16 %v901_v53, %v900_v52  ;;  %v2585_v52 = vld [vmem:[%s3624_s11 + $0xec] sm:$0xf0]  ;;  %v2583_v53 = vld [vmem:[%s3624_s11 + $0xe4] sm:$0xf] }
 0x355   : > { %v924_v55 = vpop.permute.xlu0 %923 }
 0x356   : > { %2185 = vmatmul.msk.bf16.vlgmr.msrb.gmra.mxu3 %vm879_vm9, %v902_v54  ;;  %v2337_v54 = vor.u32 %v2585_v52, %v2336_v51  ;;  %v2568_v51 = vld [vmem:[%s3624_s11 + $0x6c] sm:$0xf]  ;;  %v2282_v52 = vld [vmem:[%s3624_s11 + $0x78] sm:$0xf0] }
 0x358   : > { %1338 = vmatpush.bf16.msrb.mxu3 %v2337_v54  ;;  %v2256_v54 = vld [vmem:[%s3624_s11 + $0x40] sm:$0xf] }
 0x35d   : > { %v973_v56 = vpop.permute.xlu0 %972 }
 0x35e   : > { %985 = vmatpush.bf16.msrb.mxu1 %v973_v56  ;;  %v2344_v56 = vld [vmem:[%s3624_s11 + $0xe8] sm:$0xf] }
 0x35f   : > { %v2345_v59 = vor.u32 %v2586_v57, %v2344_v56  ;;  %v2563_v56 = vld [vmem:[%s3624_s11 + $0x44] sm:$0xf] }
 0x362   : > { %1024 = vmatpush.bf16.msra.mxu1 %v2554_v17  ;;  %v2306_v17 = vld [vmem:[%s3624_s11 + $0xb0] sm:$0xf0] }
 0x366   : > { %2186 = vmatmul.msk.bf16.vlgmr.msra.gmra.mxu3 %vm858_vm7, %v924_v55  ;;  %1025 = vmatpush.bf16.msra.mxu1 %v2553_v28  ;;  %v2338_v55 = vld [vmem:[%s3624_s11 + $0xf0] sm:$0xf0]  ;;  %v2288_v28 = vld [vmem:[%s3624_s11 + $0x80] sm:$0xf] }
 0x367   : > { %v2341_v58 = vor.u32 %v2583_v53, %v2338_v55  ;;  %v2285_v53 = vor.u32 %v2568_v51, %v2282_v52  ;;  %v2565_v55 = vld [vmem:[%s3624_s11 + $0x4c] sm:$0xf0]  ;;  %v2642_v52 = vld [vmem:[%s3622_s9] ss:$0 sm:$0xff] }
 0x368   : > { %v2257_v57 = vor.u32 %v2565_v55, %v2256_v54 }
 0x369   : > { %1352 = vmatpush.bf16.msrb.mxu0 %v2341_v58  ;;  %v2258_v58 = vld [vmem:[%s3624_s11 + $0x50] sm:$0xf0] }
 0x36a   : > { %1026 = vmatpush.bf16.msra.mxu1 %v2552_v29  ;;  %v2573_v29 = vld [vmem:[%s3624_s11 + $0x8c] sm:$0xf0] }
 0x36e   : > { %1027 = vmatpush.bf16.msra.mxu1 %v2551_v30  ;;  %v2571_v30 = vld [vmem:[%s3624_s11 + $0x84] sm:$0xf] }
 0x3d9   : > { %v916_v60 = vpop.f32.mrf.mxu3 }
 0x3e1   : > { %v918_v61 = vpop.f32.mrf.mxu3 }
 0x3e2   : > { %v921_v62 = vpack.c.bf16 %v918_v61, %v916_v60  ;;  %v2584_v60 = vld [vmem:[%s3624_s11 + $0xec] sm:$0xf]  ;;  %v2346_v61 = vld [vmem:[%s3624_s11 + $0xf8] sm:$0xf0] }
 0x3e4   : > { %2221 = vmatmul.msk.bf16.vlgmr.msrb.gmra.mxu2 %vm858_vm7, %v921_v62  ;;  %v2349_v62 = vor.u32 %v2584_v60, %v2346_v61  ;;  %v2566_v60 = vld [vmem:[%s3624_s11 + $0x54] sm:$0xf0]  ;;  %v2261_v61 = vor.u32 %v2563_v56, %v2258_v58 }
 0x3e6   : > { %1380 = vmatpush.bf16.msra.mxu2 %v2349_v62 }
 0x3e9   : > { %v943_v15 = vpop.f32.mrf.mxu3 }
 0x3ea   : > { %v944_v63 = vadd.f32 %v943_v15, %v568_v26  ;;  %v2320_v15 = vld [vmem:[%s3624_s11 + $0xc0] sm:$0xf] }
 0x3ec   : > { %v948_v0 = vsel %vm879_vm9, %v944_v63, -inf }
 0x3ed   : > { %949 = vmax.xlane.f32.xlu1 %v948_v0  ;;  %v2579_v0 = vld [vmem:[%s3624_s11 + $0xc4] sm:$0xf] }
 0x3f1   : > { %v945_v1 = vpop.f32.mrf.mxu3 }
 0x3f2   : > { %v946_v19 = vadd.f32 %v945_v1, %v569_v31 }
 0x3f4   : > { %v951_v3 = vsel %vm879_vm9, %v946_v19, -inf }
 0x3f5   : > { %952 = vmax.xlane.f32.xlu1 %v951_v3  ;;  %v2328_v3 = vld [vmem:[%s3624_s11 + $0xc8] sm:$0xf] }
 0x460   : > { %v950_v4 = vpop.xlane.xlu1 %949 }
 0x461   : > { %v954_v6 = vsub.f32 %v944_v63, %v950_v4  ;;  %v2581_v63 = vld [vmem:[%s3624_s11 + $0xcc] sm:$0xf0]  ;;  %v2582_v4 = vld [vmem:[%s3624_s11 + $0xd4] sm:$0xf0] }
 0x462   : > { %v2321_v1 = vor.u32 %v2581_v63, %v2320_v15  ;;  %v2564_v15 = vld [vmem:[%s3624_s11 + $0x4c] sm:$0xf]  ;;  %v2266_v63 = vld [vmem:[%s3624_s11 + $0x58] sm:$0xf0] }
 0x463   : > { %v956_v7 = vmul.f32 1.442695, %v954_v6 }
 0x464   : > { %1339 = vmatpush.bf16.msrb.mxu3 %v2321_v1  ;;  %v2240_v1 = vld [vmem:[%s3624_s11 + $0x20] sm:$0xf] }
 0x465   : > { %2659 = vpow2.f32 %v956_v7  ;;  %v2329_v7 = vor.u32 %v2582_v4, %v2328_v3  ;;  %v2559_v3 = vld [vmem:[%s3624_s11 + $0x24] sm:$0xf] }
 0x467   : > { %v1070_v34 = vpop.f32.mrf.mxu2 }
 0x468   : > { %v953_v8 = vpop.xlane.xlu1 %952 }
 0x469   : > { %v955_v9 = vsub.f32 %v946_v19, %v953_v8  ;;  %v2322_v19 = vld [vmem:[%s3624_s11 + $0xd0] sm:$0xf0]  ;;  %v2580_v8 = vld [vmem:[%s3624_s11 + $0xcc] sm:$0xf] }
 0x46a   : > { %v2325_v6 = vor.u32 %v2579_v0, %v2322_v19  ;;  %v2269_v0 = vor.u32 %v2564_v15, %v2266_v63  ;;  %v2561_v19 = vld [vmem:[%s3624_s11 + $0x2c] sm:$0xf0]  ;;  %v2602_v15 = vld [vmem:[%s3626_s13 + $0x78] sm:$0xff] }
 0x46b   : > { %v2660_v10 = vpop.eup %2659  ;;  %v958_v11 = vmul.f32 1.442695, %v955_v9  ;;  %v2330_v9 = vld [vmem:[%s3624_s11 + $0xd8] sm:$0xf0]  ;;  %v2241_v4 = vor.u32 %v2561_v19, %v2240_v1 }
 0x46c   : > { %v960_v13 = vsel %vm879_vm9, %v2660_v10, 0.0  ;;  %1353 = vmatpush.bf16.msrb.mxu0 %v2325_v6  ;;  %v2242_v6 = vld [vmem:[%s3624_s11 + $0x30] sm:$0xf0]  ;;  %v2610_v63 = vld [vmem:[%s3626_s13 + $0xb8] sm:$0xff] }
 0x46d   : > { %2661 = vpow2.f32 %v958_v11  ;;  %961 = vadd.xlane.f32.xlu1 %v960_v13  ;;  %v2304_v11 = vld [vmem:[%s3624_s11 + $0xa0] sm:$0xf]  ;;  %v2577_v13 = vld [vmem:[%s3624_s11 + $0xac] sm:$0xf0] }
 0x46f   : > { %v1072_v40 = vpop.f32.mrf.mxu2 }
 0x473   : > { %v2662_v14 = vpop.eup %2661 }
 0x474   : > { %v963_v16 = vsel %vm879_vm9, %v2662_v14, 0.0 }
 0x475   : > { %964 = vadd.xlane.f32.xlu2 %v963_v16  ;;  %v2305_v16 = vor.u32 %v2577_v13, %v2304_v11  ;;  %v2560_v13 = vld [vmem:[%s3624_s11 + $0x2c] sm:$0xf] }
 0x477   : > { %1340 = vmatpush.bf16.msrb.mxu3 %v2305_v16  ;;  %v2224_v16 = vld [vmem:[%s3624_s11] sm:$0xf] }
 0x4e0   : > { %v962_v18 = vpop.xlane.xlu1 %961 }
 0x4e1   : > { %2663 = vrcp.f32 %v962_v18  ;;  %v2312_v18 = vld [vmem:[%s3624_s11 + $0xa8] sm:$0xf] }
 0x4e7   : > { %v2664_v21 = vpop.eup %2663 }
 0x4e8   : > { %v965_v20 = vpop.xlane.xlu2 %964  ;;  %v968_v23 = vmul.f32 %v2664_v21, %v2660_v10  ;;  %v2333_v10 = vor.u32 %v2580_v8, %v2330_v9  ;;  %v2562_v8 = vld [vmem:[%s3624_s11 + $0x34] sm:$0xf0] }
 0x4e9   : > { %2665 = vrcp.f32 %v965_v20  ;;  %v2578_v20 = vld [vmem:[%s3624_s11 + $0xb4] sm:$0xf0] }
 0x4ea   : > { %1381 = vmatpush.bf16.msra.mxu2 %v2333_v10  ;;  %v2245_v10 = vor.u32 %v2559_v3, %v2242_v6 }
 0x4ef   : > { %v2666_v22 = vpop.eup %2665 }
 0x4f0   : > { %v969_v26 = vmul.f32 %v2666_v22, %v2662_v14  ;;  %v2575_v14 = vld [vmem:[%s3624_s11 + $0xa4] sm:$0xf]  ;;  %v2313_v22 = vor.u32 %v2578_v20, %v2312_v18  ;;  %v2557_v20 = vld [vmem:[%s3624_s11 + $0xc] sm:$0xf0] }
 0x4f1   : > { %v2309_v21 = vor.u32 %v2575_v14, %v2306_v17  ;;  %v2250_v14 = vld [vmem:[%s3624_s11 + $0x38] sm:$0xf0] }
 0x4f2   : > { %v970_v27 = vpack.c.bf16 %v969_v26, %v968_v23  ;;  %v2576_v23 = vld [vmem:[%s3624_s11 + $0xac] sm:$0xf]  ;;  %v2314_v26 = vld [vmem:[%s3624_s11 + $0xb8] sm:$0xf0]  ;;  %v2253_v18 = vor.u32 %v2560_v13, %v2250_v14 }
 0x4f3   : > { %1354 = vmatpush.bf16.msrb.mxu0 %v2309_v21  ;;  %v2555_v21 = vld [vmem:[%s3624_s11 + $0x4] sm:$0xf]  ;;  %v2594_v13 = vld [vmem:[%s3626_s13 + $0x38] sm:$0xff] }
 0x4f4   : > { %2187 = vmatmul.msk.bf16.vlgmr.msrb.gmra.mxu1 %vm879_vm9, %v970_v27  ;;  %v2317_v27 = vor.u32 %v2576_v23, %v2314_v26  ;;  %v2225_v23 = vor.u32 %v2557_v20, %v2224_v16  ;;  %v2618_v14 = vld [vmem:[%s3626_s13 + $0xf8] sm:$0xff] }
 0x4f5   : > { %1366 = vmatpush.bf16.msrb.mxu1 %v2345_v59  ;;  %v2264_v59 = vld [vmem:[%s3624_s11 + $0x48] sm:$0xf] }
 0x4f6   : > { %1382 = vmatpush.bf16.msra.mxu2 %v2317_v27  ;;  %v2265_v62 = vor.u32 %v2566_v60, %v2264_v59  ;;  %v2232_v27 = vld [vmem:[%s3624_s11 + $0x8] sm:$0xf] }
 0x4f9   : > { %1367 = vmatpush.bf16.msrb.mxu1 %v2329_v7  ;;  %v2248_v7 = vld [vmem:[%s3624_s11 + $0x28] sm:$0xf] }
 0x4fa   : > { %v2249_v11 = vor.u32 %v2562_v8, %v2248_v7  ;;  %v2601_v7 = vld [vmem:[%s3626_s13 + $0x70] sm:$0xff] }
 0x4fb   : > { %v2609_v8 = vld [vmem:[%s3626_s13 + $0xb0] sm:$0xff] }
 0x4fd   : > { %1368 = vmatpush.bf16.msrb.mxu1 %v2313_v22  ;;  %v2226_v22 = vld [vmem:[%s3624_s11 + $0x10] sm:$0xf0] }
 0x4fe   : > { %v2229_v26 = vor.u32 %v2555_v21, %v2226_v22  ;;  %v2600_v21 = vld [vmem:[%s3626_s13 + $0x68] sm:$0xff] }
 0x4ff   : > { %v2608_v22 = vld [vmem:[%s3626_s13 + $0xa8] sm:$0xff] }
 0x571   : > { %v987_v31 = vpop.f32.mrf.mxu1 }
 0x579   : > { %v989_v32 = vpop.f32.mrf.mxu1 }
 0x57a   : > { %v992_v33 = vpack.c.bf16 %v989_v32, %v987_v31  ;;  %v2289_v31 = vor.u32 %v2573_v29, %v2288_v28  ;;  %v2290_v32 = vld [vmem:[%s3624_s11 + $0x90] sm:$0xf0]  ;;  %v2558_v28 = vld [vmem:[%s3624_s11 + $0x14] sm:$0xf0]  ;;  %v2556_v29 = vld [vmem:[%s3624_s11 + $0xc] sm:$0xf] }
 0x57c   : > { %2204 = vmatmul.msk.bf16.vlgmr.msra.gmra.mxu1 %vm858_vm7, %v992_v33  ;;  %v2296_v33 = vld [vmem:[%s3624_s11 + $0x88] sm:$0xf]  ;;  %1341 = vmatpush.bf16.msrb.mxu3 %v2289_v31  ;;  %v2233_v31 = vor.u32 %v2558_v28, %v2232_v27 }
 0x5f9   : > { %v1029_v35 = vpop.f32.mrf.mxu1 }
 0x5fa   : > { %v1071_v36 = vadd.f32 %v1070_v34, %v1029_v35  ;;  %v2574_v34 = vld [vmem:[%s3624_s11 + $0x94] sm:$0xf0]  ;;  %v2293_v35 = vor.u32 %v2571_v30, %v2290_v32  ;;  %v2234_v32 = vld [vmem:[%s3624_s11 + $0x18] sm:$0xf0] }
 0x5fc   : > { %v1075_v38 = vadd.f32 %v1071_v36, %v2852_v2  ;;  %v2297_v36 = vor.u32 %v2574_v34, %v2296_v33  ;;  %1355 = vmatpush.bf16.msrb.mxu0 %v2293_v35  ;;  %v2237_v33 = vor.u32 %v2556_v29, %v2234_v32 }
 0x5fe   : > { %v3082_v39 = vadd.f32 %v2641_v37, %v1075_v38  ;;  %v2298_v38 = vld [vmem:[%s3624_s11 + $0x98] sm:$0xf0]  ;;  %1369 = vmatpush.bf16.msrb.mxu1 %v2297_v36 }
 0x600   : > { %1085 = vadd.xlane.f32.xlu1 %v3082_v39 }
 0x601   : > { %v1031_v41 = vpop.f32.mrf.mxu1 }
 0x602   : > { %v1073_v42 = vadd.f32 %v1072_v40, %v1031_v41  ;;  %v2272_v41 = vld [vmem:[%s3624_s11 + $0x60] sm:$0xf] }
 0x604   : > { %v1076_v43 = vadd.f32 %v1073_v42, %v2858_v5  ;;  %v2569_v42 = vld [vmem:[%s3624_s11 + $0x6c] sm:$0xf0] }
 0x606   : > { %v3086_v44 = vadd.f32 %v2641_v37, %v1076_v43  ;;  %v2572_v37 = vld [vmem:[%s3624_s11 + $0x8c] sm:$0xf]  ;;  %v2567_v43 = vld [vmem:[%s3624_s11 + $0x64] sm:$0xf] }
 0x607   : > { %v2301_v40 = vor.u32 %v2572_v37, %v2298_v38 }
 0x608   : > { %1087 = vadd.xlane.f32.xlu0 %v3086_v44 }
 0x609   : > { %1383 = vmatpush.bf16.msra.mxu2 %v2301_v40 }
 0x60d   : > { %1384 = vmatpush.bf16.msra.mxu2 %v2285_v53 }
 0x611   : > { %1385 = vmatpush.bf16.msra.mxu2 %v2269_v0 }
 0x615   : > { %1386 = vmatpush.bf16.msra.mxu2 %v2253_v18 }
 0x619   : > { %1387 = vmatpush.bf16.msra.mxu2 %v2237_v33 }
 0x61d   : > { %1868 = vmatpush.bf16.msrb.mxu2 %v2618_v14 }
 0x673   : > { %v1086_v45 = vpop.xlane.xlu1 %1085 }
 0x674   : > { %v1089_v46 = vmul.f32 %v1086_v45, %v2861_v12  ;;  %v2273_v45 = vor.u32 %v2569_v42, %v2272_v41 }
 0x676   : > { %v3091_v47 = vsub.f32 %v3082_v39, %v1089_v46  ;;  %v2274_v46 = vld [vmem:[%s3624_s11 + $0x70] sm:$0xf0]  ;;  %1342 = vmatpush.bf16.msrb.mxu3 %v2273_v45 }
 0x678   : > { %v1093_v2 = vmul.f32 %v3091_v47, %v3091_v47 }
 0x67a   : > { %1095 = vadd.xlane.f32.xlu1 %v1093_v2  ;;  %v2280_v2 = vld [vmem:[%s3624_s11 + $0x68] sm:$0xf]  ;;  %1343 = vmatpush.bf16.msrb.mxu3 %v2257_v57  ;;  %v2643_v57 = vld [vmem:[%s3623_s10] ss:$0 sm:$0xff] }
 0x67b   : > { %v1088_v48 = vpop.xlane.xlu0 %1087 }
 0x67c   : > { %v1090_v49 = vmul.f32 %v1088_v48, %v2861_v12  ;;  %v2570_v48 = vld [vmem:[%s3624_s11 + $0x74] sm:$0xf0] }
 0x67e   : > { %v3097_v50 = vsub.f32 %v3086_v44, %v1090_v49  ;;  %v2277_v49 = vor.u32 %v2567_v43, %v2274_v46  ;;  %1344 = vmatpush.bf16.msrb.mxu3 %v2241_v4 }
 0x680   : > { %v1094_v5 = vmul.f32 %v3097_v50, %v3097_v50  ;;  %1356 = vmatpush.bf16.msrb.mxu0 %v2277_v49 }
 0x682   : > { %1097 = vadd.xlane.f32.xlu1 %v1094_v5  ;;  %v2281_v5 = vor.u32 %v2570_v48, %v2280_v2  ;;  %1345 = vmatpush.bf16.msrb.mxu3 %v2225_v23 }
 0x684   : > { %1370 = vmatpush.bf16.msrb.mxu1 %v2281_v5  ;;  %1357 = vmatpush.bf16.msrb.mxu0 %v2261_v61 }
 0x686   : > { %1826 = vmatpush.bf16.msra.mxu3 %v2594_v13 }
 0x688   : > { %1371 = vmatpush.bf16.msrb.mxu1 %v2265_v62  ;;  %1358 = vmatpush.bf16.msrb.mxu0 %v2245_v10 }
 0x68c   : > { %1372 = vmatpush.bf16.msrb.mxu1 %v2249_v11  ;;  %1359 = vmatpush.bf16.msrb.mxu0 %v2229_v26 }
 0x690   : > { %1373 = vmatpush.bf16.msrb.mxu1 %v2233_v31  ;;  %1840 = vmatpush.bf16.msra.mxu0 %v2602_v15  ;;  %v2617_v31 = vld [vmem:[%s3626_s13 + $0xf0] sm:$0xff] }
 0x691   : > { %1869 = vmatpush.bf16.msrb.mxu2 %v2617_v31 }
 0x694   : > { %1854 = vmatpush.bf16.msra.mxu1 %v2610_v63  ;;  %1841 = vmatpush.bf16.msra.mxu0 %v2601_v7 }
 0x698   : > { %1855 = vmatpush.bf16.msra.mxu1 %v2609_v8  ;;  %1842 = vmatpush.bf16.msra.mxu0 %v2600_v21 }
 0x69c   : > { %1856 = vmatpush.bf16.msra.mxu1 %v2608_v22 }
 0x6ed   : > { %v1096_v9 = vpop.xlane.xlu1 %1095 }
 0x6ee   : > { %v1099_v17 = vmul.f32 %v1096_v9, %v2861_v12 }
 0x6f0   : > { %v1101_v30 = vadd.f32 1e-05, %v1099_v17 }
 0x6f2   : > { %2667 = vrsqrt.f32 %v1101_v30  ;;  %vm1109_vm12 = vweird.f32 %v1101_v30 }
 0x6f5   : > { %v1098_v34 = vpop.xlane.xlu1 %1097 }
 0x6f6   : > { %v1100_v35 = vmul.f32 %v1098_v34, %v2861_v12 }
 0x6f8   : > { %v2668_v36 = vpop.eup %2667  ;;  %v1102_v37 = vadd.f32 1e-05, %v1100_v35 }
 0x6f9   : > { %v1104_v38 = vmul.f32 %v2668_v36, %v1101_v30  ;;  %vm1110_vm11 = vweird.f32 %v2668_v36  ;;  %v2593_v30 = vld [vmem:[%s3626_s13 + $0x30] sm:$0xff] }
 0x6fa   : > { %2669 = vrsqrt.f32 %v1102_v37  ;;  %vm1111_vm13 = vmor %vm1109_vm12, %vm1110_vm11  ;;  %vm1119_vm15 = vweird.f32 %v1102_v37  ;;  %1827 = vmatpush.bf16.msra.mxu3 %v2593_v30 }
 0x6fb   : > { %v1105_v40 = vmul.f32 %v2668_v36, %v1104_v38 }
 0x6fd   : > { %v1106_v41 = vmul.f32 0.5, %v1105_v40 }
 0x6ff   : > { %v1107_v42 = vsub.f32 1.5, %v1106_v41 }
 0x700   : > { %v2670_v43 = vpop.eup %2669 }
 0x701   : > { %v1108_v45 = vmul.f32 %v2668_v36, %v1107_v42  ;;  %v1114_v46 = vmul.f32 %v2670_v43, %v1102_v37  ;;  %vm1120_vm14 = vweird.f32 %v2670_v43  ;;  %v2607_v37 = vld [vmem:[%s3626_s13 + $0xa0] sm:$0xff]  ;;  %v2592_v42 = vld [vmem:[%s3626_s13 + $0x28] sm:$0xff] }
 0x702   : > { %vm1121_vm0 = vmor %vm1119_vm15, %vm1120_vm14  ;;  %1857 = vmatpush.bf16.msra.mxu1 %v2607_v37  ;;  %1828 = vmatpush.bf16.msra.mxu3 %v2592_v42 }
 0x703   : > { %v1115_v2 = vmul.f32 %v2670_v43, %v1114_v46  ;;  %v1112_v48 = vsel %vm1111_vm13, %v2668_v36, %v1108_v45  ;;  %v2599_v36 = vld [vmem:[%s3626_s13 + $0x60] sm:$0xff] }
 0x704   : > { %v1123_v51 = vmul.f32 %v1112_v48, %v3091_v47  ;;  %v3306_v47 = vld [vmem:[%s3640_s1] sm:$0xf]  ;;  %1843 = vmatpush.bf16.msra.mxu0 %v2599_v36 }
 0x705   : > { %v1116_v49 = vmul.f32 0.5, %v1115_v2  ;;  %v1172_v62 = vperm.slane %v3306_v47, 2  ;;  %v1170_v6 = vperm.slane %v3306_v47, 0  ;;  %v1173_v10 = vperm.slane %v3306_v47, 3 }
 0x706   : > { %v1128_v56 = vmul.f32 %v2642_v52, %v1123_v51 }
 0x707   : > { %v1117_v5 = vsub.f32 1.5, %v1116_v49 }
 0x708   : > { %v1133_v59 = vadd.f32 %v2643_v57, %v1128_v56 }
 0x709   : > { %v1118_v53 = vmul.f32 %v2670_v43, %v1117_v5 }
 0x70b   : > { %v1122_v54 = vsel %vm1121_vm0, %v2670_v43, %v1118_v53  ;;  %v2616_v43 = vld [vmem:[%s3626_s13 + $0xe8] sm:$0xff]  ;;  %v2606_v53 = vld [vmem:[%s3626_s13 + $0x98] sm:$0xff] }
 0x70c   : > { %v1124_v55 = vmul.f32 %v1122_v54, %v3097_v50  ;;  %v1171_v50 = vperm.slane %v3306_v47, 1  ;;  %1870 = vmatpush.bf16.msrb.mxu2 %v2616_v43  ;;  %1858 = vmatpush.bf16.msra.mxu1 %v2606_v53  ;;  %v2591_v54 = vld [vmem:[%s3626_s13 + $0x20] sm:$0xff] }
 0x70d   : > { %1829 = vmatpush.bf16.msra.mxu3 %v2591_v54 }
 0x70e   : > { %v1129_v58 = vmul.f32 %v2642_v52, %v1124_v55  ;;  %v2598_v52 = vld [vmem:[%s3626_s13 + $0x58] sm:$0xff]  ;;  %v2615_v55 = vld [vmem:[%s3626_s13 + $0xe0] sm:$0xff] }
 0x70f   : > { %1844 = vmatpush.bf16.msra.mxu0 %v2598_v52 }
 0x710   : > { %v1134_v60 = vadd.f32 %v2643_v57, %v1129_v58  ;;  %1871 = vmatpush.bf16.msrb.mxu2 %v2615_v55  ;;  %v2597_v58 = vld [vmem:[%s3626_s13 + $0x50] sm:$0xff] }
 0x712   : > { %v1135_v61 = vpack.c.bf16 %v1134_v60, %v1133_v59  ;;  %v2605_v59 = vld [vmem:[%s3626_s13 + $0x90] sm:$0xff] }
 0x713   : > { %1845 = vmatpush.bf16.msra.mxu0 %v2597_v58  ;;  %1859 = vmatpush.bf16.msra.mxu1 %v2605_v59 }
 0x714   : > { %1346 = vmatmul.bf16.vlgmr.msrb.gmra.mxu3 %v1135_v61  ;;  %1360 = vmatmul.bf16.vlgmr.msrb.gmra.mxu0 %v1135_v61 }
 0x715   : > { %1374 = vmatmul.bf16.vlgmr.msrb.gmra.mxu1 %v1135_v61  ;;  %1388 = vmatmul.bf16.vlgmr.msra.gmra.mxu2 %v1135_v61 }
 0x791   : > { %v1361_v0 = vpop.f32.mrf.mxu0 }
 0x792   : > { %v3316_v1 = vadd.f32 %v1361_v0, %v1171_v50  ;;  %v1375_v19 = vpop.f32.mrf.mxu1 }
 0x793   : > { %v3318_v3 = vadd.f32 %v1375_v19, %v1172_v62 }
 0x794   : > { %v2351_v4 = vmul.f32 -1.702, %v3316_v1 }
 0x795   : > { %v2352_v9 = vmul.f32 -1.702, %v3318_v3 }
 0x796   : > { %v1412_v11 = vmul.f32 1.442695, %v2351_v4  ;;  %v2596_v4 = vld [vmem:[%s3626_s13 + $0x48] sm:$0xff] }
 0x797   : > { %v1414_v16 = vmul.f32 1.442695, %v2352_v9  ;;  %v1347_v17 = vpop.f32.mrf.mxu3  ;;  %1846 = vmatpush.bf16.msra.mxu0 %v2596_v4 }
 0x798   : > { %2671 = vpow2.f32 %v1412_v11  ;;  %v3336_v18 = vadd.f32 %v1347_v17, %v1170_v6  ;;  %v1389_v20 = vpop.f32.mrf.mxu2 }
 0x799   : > { %2673 = vpow2.f32 %v1414_v16  ;;  %v3346_v23 = vadd.f32 %v1389_v20, %v1173_v10  ;;  %v1363_v26 = vpop.f32.mrf.mxu0  ;;  %v2589_v16 = vld [vmem:[%s3626_s13 + $0x10] sm:$0xff] }
 0x79a   : > { %v2350_v27 = vmul.f32 -1.702, %v3336_v18  ;;  %v3349_v28 = vadd.f32 %v1363_v26, %v1171_v50  ;;  %v1377_v29 = vpop.f32.mrf.mxu1  ;;  %v2590_v50 = vld [vmem:[%s3626_s13 + $0x18] sm:$0xff]  ;;  %v2613_v20 = vld [vmem:[%s3626_s13 + $0xd0] sm:$0xff]  ;;  %v2595_v26 = vld [vmem:[%s3626_s13 + $0x40] sm:$0xff] }
 0x79b   : > { %v2353_v32 = vmul.f32 -1.702, %v3346_v23  ;;  %v3358_v33 = vadd.f32 %v1377_v29, %v1172_v62  ;;  %v2614_v62 = vld [vmem:[%s3626_s13 + $0xd8] sm:$0xff]  ;;  %1830 = vmatpush.bf16.msra.mxu3 %v2590_v50  ;;  %1847 = vmatpush.bf16.msra.mxu0 %v2595_v26 }
 0x79c   : > { %v1410_v34 = vmul.f32 1.442695, %v2350_v27  ;;  %v2355_v35 = vmul.f32 -1.702, %v3349_v28  ;;  %1872 = vmatpush.bf16.msrb.mxu2 %v2614_v62  ;;  %v2603_v27 = vld [vmem:[%s3626_s13 + $0x80] sm:$0xff] }
 0x79d   : > { %v2356_v38 = vmul.f32 -1.702, %v3358_v33  ;;  %v1416_v5 = vmul.f32 1.442695, %v2353_v32 }
 0x79e   : > { %v2672_v40 = vpop.eup %2671  ;;  %2675 = vpow2.f32 %v1410_v34  ;;  %v1420_v41 = vmul.f32 1.442695, %v2355_v35  ;;  %v2588_v34 = vld [vmem:[%s3626_s13 + $0x8] sm:$0xff] }
 0x79f   : > { %v2674_v45 = vpop.eup %2673  ;;  %v3374_v46 = vadd.f32 1.0, %v2672_v40  ;;  %v1422_v2 = vmul.f32 1.442695, %v2356_v38  ;;  %v1349_v48 = vpop.f32.mrf.mxu3  ;;  %1831 = vmatpush.bf16.msra.mxu3 %v2589_v16  ;;  %v2612_v35 = vld [vmem:[%s3626_s13 + $0xc8] sm:$0xff] }
 0x7a0   : > { %v3376_v49 = vadd.f32 1.0, %v2674_v45  ;;  %2677 = vpow2.f32 %v1420_v41  ;;  %v3378_v51 = vadd.f32 %v1349_v48, %v1170_v6  ;;  %v2604_v6 = vld [vmem:[%s3626_s13 + $0x88] sm:$0xff]  ;;  %v1391_v14 = vpop.f32.mrf.mxu2  ;;  %1873 = vmatpush.bf16.msrb.mxu2 %v2613_v20  ;;  %v2611_v48 = vld [vmem:[%s3626_s13 + $0xc0] sm:$0xff] }
 0x7a1   : > { %2679 = vrcp.f32 %v3374_v46  ;;  %1860 = vmatpush.bf16.msra.mxu1 %v2604_v6  ;;  %v3448_v31 = vadd.f32 %v1391_v14, %v1173_v10  ;;  %v1458_v32 = vand.u32 2147483647, %v3374_v46  ;;  %v1460_v36 = vand.u32 2147483648, %v3374_v46 }
 0x7a2   : > { %2681 = vrcp.f32 %v3376_v49  ;;  %v2354_v56 = vmul.f32 -1.702, %v3378_v51  ;;  %v1473_v47 = vand.u32 2147483647, %v3376_v49  ;;  %v1475_v41 = vand.u32 2147483648, %v3376_v49 }
 0x7a3   : > { %2683 = vpow2.f32 %v1422_v2  ;;  %1832 = vmatpush.bf16.msra.mxu3 %v2588_v34  ;;  %v2357_v42 = vmul.f32 -1.702, %v3448_v31  ;;  %vm1454_vm2 = vweird.f32 %v3374_v46  ;;  %vm3469_vm3 = vcmp.eq.f32.partialorder %v1458_v32, 8.507059e+37  ;;  %v2587_v2 = vld [vmem:[%s3626_s13] sm:$0xff] }
 0x7a4   : > { %v2676_v57 = vpop.eup %2675  ;;  %2685 = vpow2.f32 %v1416_v5  ;;  %v1418_v63 = vmul.f32 1.442695, %v2354_v56  ;;  %1874 = vmatpush.bf16.msrb.mxu2 %v2612_v35  ;;  %vm1469_vm4 = vweird.f32 %v3376_v49  ;;  %vm3487_vm7 = vcmp.eq.f32.partialorder %v1473_v47, 8.507059e+37 }
 0x7a5   : > { %v3401_v60 = vadd.f32 1.0, %v2676_v57  ;;  %1861 = vmatpush.bf16.msra.mxu1 %v2603_v27  ;;  %v1476_v59 = vor.u32 1.1754944e-38, %v1475_v41  ;;  %v1424_v62 = vmul.f32 1.442695, %v2357_v42 }
 0x7a6   : > { %v2678_v61 = vpop.eup %2677 }
 0x7a7   : > { %v3409_v15 = vpop.eup %2679  ;;  %2687 = vrcp.f32 %v3401_v60  ;;  %v3424_v13 = vadd.f32 1.0, %v2678_v61  ;;  %1833 = vmatpush.bf16.msra.mxu3 %v2587_v2 }
 0x7a8   : > { %v3412_v0 = vpop.eup %2681  ;;  %v1450_v19 = vmul.f32 %v3409_v15, %v3374_v46  ;;  %2689 = vpow2.f32 %v1418_v63  ;;  %vm1455_vm1 = vweird.f32 %v3409_v15  ;;  %v1461_v46 = vor.u32 1.1754944e-38, %v1460_v36  ;;  %1875 = vmatpush.bf16.msrb.mxu2 %v2611_v48 }
 0x7a9   : > { %v2684_v7 = vpop.eup %2683  ;;  %v1465_v8 = vmul.f32 %v3412_v0, %v3376_v49  ;;  %2691 = vrcp.f32 %v3424_v13  ;;  %vm3482_vm5 = vmor %vm1454_vm2, %vm1455_vm1  ;;  %vm1470_vm6 = vweird.f32 %v3412_v0  ;;  %vm1514_vm8 = vweird.f32 %v3424_v13 }
 0x7aa   : > { %v2686_v9 = vpop.eup %2685  ;;  %v1451_v11 = vsub.f32 1.0, %v1450_v19  ;;  %v3429_v17 = vadd.f32 1.0, %v2684_v7  ;;  %v1518_v63 = vand.u32 2147483647, %v3424_v13  ;;  %v1520_v19 = vand.u32 2147483648, %v3424_v13  ;;  %vm3511_vm10 = vmor %vm1469_vm4, %vm1470_vm6 }
 0x7ab   : > { %v1466_v22 = vsub.f32 1.0, %v1465_v8  ;;  %v3444_v30 = vadd.f32 1.0, %v2686_v9 }
 0x7ac   : > { %v1452_v21 = vmul.f32 %v3409_v15, %v1451_v11  ;;  %2693 = vrcp.f32 %v3429_v17  ;;  %v1533_v14 = vand.u32 2147483647, %v3429_v17  ;;  %v1535_v16 = vand.u32 2147483648, %v3429_v17 }
 0x7ad   : > { %v3442_v29 = vpop.eup %2687  ;;  %v1467_v37 = vmul.f32 %v3412_v0, %v1466_v22  ;;  %2695 = vrcp.f32 %v3444_v30  ;;  %vm1519_vm15 = vcmp.eq.f32.partialorder %v1518_v63, 8.507059e+37  ;;  %vm1529_vm0 = vweird.f32 %v3429_v17 }
 0x7ae   : > { %v1453_v10 = vadd.f32 %v3409_v15, %v1452_v21  ;;  %v1435_v38 = vmul.f32 %v3442_v29, %v3401_v60  ;;  %v2690_v40 = vpop.eup %2689  ;;  %vm1440_vm13 = vweird.f32 %v3442_v29  ;;  %v1536_v47 = vor.u32 1.1754944e-38, %v1535_v16 }
 0x7af   : > { %v2692_v43 = vpop.eup %2691  ;;  %v1468_v56 = vadd.f32 %v3412_v0, %v1467_v37  ;;  %v3496_v58 = vadd.f32 1.0, %v2690_v40  ;;  %vm1534_vm2 = vcmp.eq.f32.partialorder %v1533_v14, 8.507059e+37  ;;  %v1445_v37 = vand.u32 2147483648, %v3401_v60 }
 0x7b0   : > { %v1510_v53 = vmul.f32 %v2692_v43, %v3424_v13  ;;  %v1457_v55 = vsel %vm3482_vm5, %v3409_v15, %v1453_v10  ;;  %v1436_v57 = vsub.f32 1.0, %v1435_v38  ;;  %vm1515_vm11 = vweird.f32 %v2692_v43 }
 0x7b1   : > { %2697 = vrcp.f32 %v3496_v58  ;;  %v1462_v4 = vsel %vm3469_vm3, %v1461_v46, %v1457_v55  ;;  %v1472_v9 = vsel %vm3511_vm10, %v3412_v0, %v1468_v56  ;;  %vm1516_vm14 = vmor %vm1514_vm8, %vm1515_vm11  ;;  %v1521_v0 = vor.u32 1.1754944e-38, %v1520_v19 }
 0x7b2   : > { %v2694_v54 = vpop.eup %2693  ;;  %v1511_v61 = vsub.f32 1.0, %v1510_v53  ;;  %v1437_v11 = vmul.f32 %v3442_v29, %v1436_v57  ;;  %2699 = vpow2.f32 %v1424_v62  ;;  %v1555_v22 = vmul.f32 %v1462_v4, %v3316_v1 }
 0x7b3   : > { %v1525_v50 = vmul.f32 %v2694_v54, %v3429_v17  ;;  %v3503_v15 = vpop.eup %2695  ;;  %vm1530_vm12 = vweird.f32 %v2694_v54  ;;  %v1477_v34 = vsel %vm3487_vm7, %v1476_v59, %v1472_v9  ;;  %vm1439_vm3 = vweird.f32 %v3401_v60 }
 0x7b4   : > { %v1512_v7 = vmul.f32 %v2692_v43, %v1511_v61  ;;  %v1480_v49 = vmul.f32 %v3503_v15, %v3444_v30  ;;  %v1438_v35 = vadd.f32 %v3442_v29, %v1437_v11  ;;  %vm1531_vm1 = vmor %vm1529_vm0, %vm1530_vm12  ;;  %v1443_v17 = vand.u32 2147483647, %v3401_v60 }
 0x7b5   : > { %v1526_v8 = vsub.f32 1.0, %v1525_v50  ;;  %v1556_v41 = vmul.f32 %v1477_v34, %v3318_v3  ;;  %vm3540_vm4 = vmor %vm1439_vm3, %vm1440_vm13  ;;  %v1505_v60 = vand.u32 2147483648, %v3496_v58  ;;  %v1503_v52 = vand.u32 2147483647, %v3496_v58 }
 0x7b6   : > { %v1513_v20 = vadd.f32 %v2692_v43, %v1512_v7  ;;  %v1442_v2 = vsel %vm3540_vm4, %v3442_v29, %v1438_v35  ;;  %v1481_v48 = vsub.f32 1.0, %v1480_v49  ;;  %v1446_v53 = vor.u32 1.1754944e-38, %v1445_v37 }
 0x7b7   : > { %v1527_v21 = vmul.f32 %v2694_v54, %v1526_v8  ;;  %v2698_v32 = vpop.eup %2697  ;;  %vm1444_vm6 = vcmp.eq.f32.partialorder %v1443_v17, 8.507059e+37  ;;  %vm1499_vm7 = vweird.f32 %v3496_v58  ;;  %v1506_v29 = vor.u32 1.1754944e-38, %v1505_v60  ;;  %v2625_v60 = vld [vmem:[%s3630_s17 + $0x30] sm:$0xff] }
 0x7b8   : > { %v1517_v26 = vsel %vm1516_vm14, %v2692_v43, %v1513_v20  ;;  %v1495_v1 = vmul.f32 %v2698_v32, %v3496_v58  ;;  %v2700_v40 = vpop.eup %2699  ;;  %vm1500_vm5 = vweird.f32 %v2698_v32  ;;  %v1482_v55 = vmul.f32 %v3503_v15, %v1481_v48 }
 0x7b9   : > { %v1528_v27 = vadd.f32 %v2694_v54, %v1527_v21  ;;  %v1522_v36 = vsel %vm1519_vm15, %v1521_v0, %v1517_v26  ;;  %v1433_v5 = vadd.f32 1.0, %v2700_v40  ;;  %vm1501_vm8 = vmor %vm1499_vm7, %vm1500_vm5  ;;  %vm1504_vm10 = vcmp.eq.f32.partialorder %v1503_v52, 8.507059e+37  ;;  %v2644_v26 = vld [vmem:[%s3627_s14] ss:$0 sm:$0xff]  ;;  %v2621_v52 = vld [vmem:[%s3630_s17 + $0x10] sm:$0xff] }
 0x7ba   : > { %v1559_v13 = vmul.f32 %v1522_v36, %v3349_v28  ;;  %v1496_v45 = vsub.f32 1.0, %v1495_v1  ;;  %v1483_v62 = vadd.f32 %v3503_v15, %v1482_v55  ;;  %vm1485_vm11 = vweird.f32 %v3503_v15 }
 0x7bb   : > { %v1532_v10 = vsel %vm1531_vm1, %v2694_v54, %v1528_v27  ;;  %2701 = vrcp.f32 %v1433_v5  ;;  %v1490_v19 = vand.u32 2147483648, %v3444_v30  ;;  %vm1484_vm12 = vweird.f32 %v3444_v30 }
 0x7bc   : > { %v1537_v38 = vsel %vm1534_vm2, %v1536_v47, %v1532_v10  ;;  %v1563_v28 = vpack.c.bf16 %v1559_v13, %v1555_v22  ;;  %v1497_v3 = vmul.f32 %v2698_v32, %v1496_v45  ;;  %v1488_v4 = vand.u32 2147483647, %v3444_v30  ;;  %vm1486_vm13 = vmor %vm1484_vm12, %vm1485_vm11 }
 0x7bd   : > { %v1560_v43 = vmul.f32 %v1537_v38, %v3358_v33  ;;  %v1447_v33 = vsel %vm1444_vm6, %v1446_v53, %v1442_v2  ;;  %v1550_v7 = vand.u32 2147483648, %v1433_v5  ;;  %v1548_v8 = vand.u32 2147483647, %v1433_v5  ;;  %v2626_v2 = vld [vmem:[%s3630_s17 + $0x38] sm:$0xff]  ;;  %v2620_v53 = vld [vmem:[%s3630_s17 + $0x8] sm:$0xff] }
 0x7be   : > { %1848 = vmatmul.bf16.vlgmr.msra.gmra.mxu0 %v1563_v28  ;;  %v1498_v54 = vadd.f32 %v2698_v32, %v1497_v3  ;;  %v1554_v59 = vmul.f32 %v1447_v33, %v3336_v18  ;;  %v1487_v18 = vsel %vm1486_vm13, %v3503_v15, %v1483_v62  ;;  %v1491_v9 = vor.u32 1.1754944e-38, %v1490_v19  ;;  %v2622_v3 = vld [vmem:[%s3630_s17 + $0x18] sm:$0xff] }
 0x7bf   : > { %v1564_v46 = vpack.c.bf16 %v1560_v43, %v1556_v41  ;;  %vm1489_vm15 = vcmp.eq.f32.partialorder %v1488_v4, 8.507059e+37  ;;  %vm1544_vm0 = vweird.f32 %v1433_v5  ;;  %v1551_v16 = vor.u32 1.1754944e-38, %v1550_v7  ;;  %2004 = vmatpush.bf16.msrb.mxu0 %v2626_v2 }
 0x7c0   : > { %v1502_v56 = vsel %vm1501_vm8, %v2698_v32, %v1498_v54  ;;  %v1492_v14 = vsel %vm1489_vm15, %v1491_v9, %v1487_v18  ;;  %vm1549_vm2 = vcmp.eq.f32.partialorder %v1548_v8, 8.507059e+37  ;;  %v1885_v17 = vstv %s1884_s26  ;;  %v2619_v54 = vld [vmem:[%s3630_s17] sm:$0xff] }
 0x7c1   : > { %1862 = vmatmul.bf16.vlgmr.msra.gmra.mxu1 %v1564_v46  ;;  %v1507_v57 = vsel %vm1504_vm10, %v1506_v29, %v1502_v56  ;;  %v2702_v50 = vpop.eup %2701  ;;  %v1557_v21 = vmul.f32 %v1492_v14, %v3346_v23  ;;  %vm1886_vm3 = vcmp.eq.s32.totalorder %v3034_v24, %v1885_v17  ;;  %vm1914_vm4 = vcmask 1040384   ;;  %v2623_v46 = vld [vmem:[%s3630_s17 + $0x20] sm:$0xff] }
 0x7c2   : > { %v1558_v61 = vmul.f32 %v1507_v57, %v3378_v51  ;;  %v1540_v58 = vmul.f32 %v2702_v50, %v1433_v5  ;;  %vm1545_vm14 = vweird.f32 %v2702_v50  ;;  %v2486_v28 = vsel %vm1886_vm3, 1.0, %v2731_v25  ;;  %v2624_v5 = vld [vmem:[%s3630_s17 + $0x28] sm:$0xff] }
 0x7c3   : > { %vm1546_vm1 = vmor %vm1544_vm0, %vm1545_vm14  ;;  %2005 = vmatpush.bf16.msrb.mxu0 %v2625_v60 }
 0x7c4   : > { %v1562_v63 = vpack.c.bf16 %v1558_v61, %v1554_v59  ;;  %v1541_v6 = vsub.f32 1.0, %v1540_v58  ;;  %v1912_v58 = vld [vmem:[%s3628_s15] sm:$0x1] }
 0x7c6   : > { %1834 = vmatmul.bf16.vlgmr.msra.gmra.mxu3 %v1562_v63  ;;  %v1542_v51 = vmul.f32 %v2702_v50, %v1541_v6 }
 0x7c7   : > { %2006 = vmatpush.bf16.msrb.mxu0 %v2624_v5 }
 0x7c8   : > { %v1543_v11 = vadd.f32 %v2702_v50, %v1542_v51 }
 0x7ca   : > { %v1547_v20 = vsel %vm1546_vm1, %v2702_v50, %v1543_v11 }
 0x7cb   : > { %v1552_v30 = vsel %vm1549_vm2, %v1551_v16, %v1547_v20  ;;  %2007 = vmatpush.bf16.msrb.mxu0 %v2623_v46 }
 0x7cc   : > { %v1561_v49 = vmul.f32 %v1552_v30, %v3448_v31 }
 0x7ce   : > { %v1565_v0 = vpack.c.bf16 %v1561_v49, %v1557_v21 }
 0x7cf   : > { %2008 = vmatpush.bf16.msrb.mxu0 %v2622_v3 }
 0x7d0   : > { %1876 = vmatmul.bf16.vlgmr.msrb.gmra.mxu2 %v1565_v0 }
 0x7d3   : > { %2009 = vmatpush.bf16.msrb.mxu0 %v2621_v52 }
 0x7d7   : > { %2010 = vmatpush.bf16.msrb.mxu0 %v2620_v53 }
 0x7db   : > { %2011 = vmatpush.bf16.msrb.mxu0 %v2619_v54 }
 0x83b   : > { %v1849_v22 = vpop.f32.mrf.mxu0 }
 0x83e   : > { %v1863_v27 = vpop.f32.mrf.mxu1 }
 0x843   : > { %v1851_v36 = vpop.f32.mrf.mxu0 }
 0x846   : > { %v1865_v23 = vpop.f32.mrf.mxu1 }
 0x849   : > { %v1835_v15 = vpop.f32.mrf.mxu3 }
 0x84a   : > { %v1836_v34 = vadd.f32 %v2644_v26, %v1835_v15 }
 0x84c   : > { %v1850_v13 = vadd.f32 %v1849_v22, %v1836_v34 }
 0x84e   : > { %v1864_v1 = vadd.f32 %v1863_v27, %v1850_v13 }
 0x851   : > { %v1837_v32 = vpop.f32.mrf.mxu3 }
 0x852   : > { %v1838_v35 = vadd.f32 %v2644_v26, %v1837_v32 }
 0x853   : > { %v1877_v47 = vpop.f32.mrf.mxu2 }
 0x854   : > { %v1852_v10 = vadd.f32 %v1851_v36, %v1838_v35  ;;  %v1878_v38 = vadd.f32 %v1877_v47, %v1864_v1 }
 0x856   : > { %v1866_v31 = vadd.f32 %v1865_v23, %v1852_v10  ;;  %v1882_v42 = vadd.f32 %v1878_v38, %v3082_v39 }
 0x85b   : > { %v1879_v37 = vpop.f32.mrf.mxu2 }
 0x85c   : > { %v1880_v40 = vadd.f32 %v1879_v37, %v1866_v31 }
 0x85e   : > { %v1883_v41 = vadd.f32 %v1880_v40, %v3086_v44 }
 0x860   : > { %1906 = vmatpush.msrb.mxu3 %v1883_v41 }
 0x862   : > { %1907 = vmatpush.msrb.mxu3 %v1882_v42 }
 0x863   : > { %2487 = vmatmul.msk.f32.vlgmr.msrb.gmra.mxu3 %vm879_vm9, %v2486_v28 }
 0x8e6   : > { %v1909_v43 = vpop.f32.mrf.mxu3 }
 0x8e7   : > { %v1915_v45 = vsel %vm1914_vm4, %v1909_v43, 0.0 }
 0x8e8   : > { %1916 = vadd.xlane.f32.xlu1 %v1915_v45 }
 0x95b   : > { %v1917_v24 = vpop.xlane.xlu1 %1916 }
 0x95c   : > { %v1918_v44 = vmul.f32 %v1917_v24, %v2861_v12 }
 0x95e   : > { %v1919_v39 = vsub.f32 %v1909_v43, %v1918_v44 }
 0x960   : > { %v1920_v48 = vmul.f32 %v1919_v39, %v1919_v39 }
 0x962   : > { %v1921_v25 = vsel %vm1914_vm4, %v1920_v48, 0.0 }
 0x963   : > { %1922 = vadd.xlane.f32.xlu1 %v1921_v25 }
 0x9d6   : > { %v1923_v33 = vpop.xlane.xlu1 %1922 }
 0x9d7   : > { %v1924_v29 = vmul.f32 %v1923_v33, %v2861_v12  ;;  %v1913_v12 = vld [vmem:[%s3629_s16] sm:$0x1] }
 0x9d9   : > { %v1925_v55 = vadd.f32 1e-05, %v1924_v29 }
 0x9db   : > { %2703 = vrsqrt.f32 %v1925_v55  ;;  %vm1932_vm5 = vweird.f32 %v1925_v55 }
 0x9e1   : > { %v2704_v56 = vpop.eup %2703 }
 0x9e2   : > { %v1927_v57 = vmul.f32 %v2704_v56, %v1925_v55  ;;  %vm1933_vm9 = vweird.f32 %v2704_v56 }
 0x9e3   : > { %vm1934_vm6 = vmor %vm1932_vm5, %vm1933_vm9 }
 0x9e4   : > { %v1928_v59 = vmul.f32 %v2704_v56, %v1927_v57 }
 0x9e6   : > { %v1929_v61 = vmul.f32 0.5, %v1928_v59 }
 0x9e8   : > { %v1930_v50 = vsub.f32 1.5, %v1929_v61 }
 0x9ea   : > { %v1931_v62 = vmul.f32 %v2704_v56, %v1930_v50 }
 0x9ec   : > { %v1935_v63 = vsel %vm1934_vm6, %v2704_v56, %v1931_v62 }
 0x9ed   : > { %v1936_v19 = vmul.f32 %v1935_v63, %v1919_v39 }
 0x9ef   : > { %v1937_v4 = vmul.f32 %v1936_v19, %v1912_v58 }
 0x9f1   : > { %v1938_v6 = vadd.f32 %v1937_v4, %v1913_v12 }
 0x9f3   : > { %v1939_v7 = vpack.c.bf16 %v1938_v6, %v1938_v6 }
 0x9f5   : > { %2012 = vmatmul.bf16.vlgmr.msrb.gmra.mxu0 %v1939_v7 }
 0xa72   : > { %v2013_v18 = vpop.f32.mrf.mxu0 }
 0xa73   : > { %v2017_v51 = vmul.f32 %v2013_v18, %v2013_v18 }
 0xa75   : > { %v2018_v8 = vsel %vm1914_vm4, %v2017_v51, 0.0 }
 0xa76   : > { %2019 = vadd.xlane.f32.xlu2 %v2018_v8 }
 0xa7a   : > { %v2015_v9 = vpop.f32.mrf.mxu0 }
 0xae9   : > { %v2020_v11 = vpop.xlane.xlu2 %2019 }
 0xaea   : > { %v2021_v14 = vmax.f32 %v2020_v11, 1e-12 }
 0xaec   : > { %2705 = vrsqrt.f32 %v2021_v14  ;;  %vm2028_vm8 = vweird.f32 %v2021_v14 }
 0xaf2   : > { %v2706_v16 = vpop.eup %2705 }
 0xaf3   : > { %v2023_v20 = vmul.f32 %v2706_v16, %v2021_v14  ;;  %vm2029_vm7 = vweird.f32 %v2706_v16 }
 0xaf4   : > { %vm2030_vm10 = vmor %vm2028_vm8, %vm2029_vm7 }
 0xaf5   : > { %v2024_v30 = vmul.f32 %v2706_v16, %v2023_v20 }
 0xaf7   : > { %v2025_v21 = vmul.f32 0.5, %v2024_v30 }
 0xaf9   : > { %v2026_v49 = vsub.f32 1.5, %v2025_v21 }
 0xafb   : > { %v2027_v0 = vmul.f32 %v2706_v16, %v2026_v49 }
 0xafd   : > { %v2031_v15 = vsel %vm2030_vm10, %v2706_v16, %v2027_v0 }
 0xafe   : > { %v2032_v22 = vmul.f32 %v2031_v15, %v2013_v18 }
 0xb00   : > { %2033 = vst [vmem:[%s553_s23] sm:$0x1] %v2032_v22 }
 0xb01 PF: > { %s36_s0 = sadd.s32 1, %s2727_s0  }
 0xb02   : > { %p33_p4 = scmp.ge.s32.totalorder %s36_s0, 12  }
 0xb04   :  { %35 = sbr.rel (!%p33_p4) target bundleno = 17 (0x11), region = 118 }

</bundles_post_ra>
